<compile_context>
chip_gen: v6e
topology: v6e:2x2x1
jax: 0.10.0
libtpu: 0.0.40
codegen_flags: <defaults>
</compile_context>

<pallas_src>
import functools

import jax
import jax.numpy as jnp
from jax.experimental import pallas as pl
from jax.experimental.pallas import tpu as pltpu

# ----------------------------- configuration ------------------------------
DIM_SELF = 32          # model dim (c)
NUM_HEADS = 4          # heads (h), head_dim = 8
NUM_LAYERS = 2
MLP_RATIO = 2.0        # mlp hidden = 64
BATCH = 2
SEQ = 8
LN_EPS = 1e-5


# ------------------------------ Pallas kernel ------------------------------
def transformer_kernel(
    x_ref,                      # (B, N, C)
    ln1_g_ref, ln1_b_ref,       # (L, 1, C)
    wqkv_ref,                   # (L, 3*B*H, C, hd)   head-major fused q/k/v
    wp_ref,                     # (L, B*H, hd, C)     per-head output proj
    bp_ref,                     # (L, 1, C)
    ln2_g_ref, ln2_b_ref,       # (L, 1, C)
    w1_ref, b1_ref,             # (L, C, Hm), (L, 1, Hm)
    w2_ref, b2_ref,             # (L, Hm, C), (L, 1, C)
    o_ref,                      # (B, N, C)
    *, num_layers, num_heads,
):
    B, N, C = x_ref.shape
    H = num_heads
    hd = C // H
    G = B * H
    scale = hd ** (-0.5)

    def layernorm(v, g, b):
        mu = jnp.mean(v, axis=-1, keepdims=True)
        var = jnp.mean((v - mu) ** 2, axis=-1, keepdims=True)
        return (v - mu) * jax.lax.rsqrt(var + LN_EPS) * g + b

    x = x_ref[...]                                           # (B, N, C)

    for l in range(num_layers):                              # static unroll
        # ---------------- multi-head self-attention on LN1(x) -------------
        xn = layernorm(x, ln1_g_ref[l], ln1_b_ref[l])        # (B, N, C)
        # Broadcast activations along heads (leading dims only -> cheap).
        xn_h = jnp.broadcast_to(xn[:, None], (B, H, N, C)).reshape(G, N, C)
        xn_g = jnp.broadcast_to(xn_h[None], (3, G, N, C)).reshape(3 * G, N, C)

        # One batched contraction for all of Q, K, V over every (batch, head).
        qkv = jnp.einsum('gnc,gcd->gnd', xn_g, wqkv_ref[l],
                         preferred_element_type=jnp.float32)  # (3G, N, hd)
        q = qkv[:G]                                           # leading-dim slices
        k = qkv[G:2 * G]
        v = qkv[2 * G:]

        s = jnp.einsum('gnd,gmd->gnm', q, k,
                       preferred_element_type=jnp.float32) * scale  # (G, N, N)
        s_max = jnp.max(s, axis=-1, keepdims=True)
        e = jnp.exp(s - s_max)
        p = e * pl.reciprocal(jnp.sum(e, axis=-1, keepdims=True), approx=True)

        o = jnp.einsum('gnm,gmd->gnd', p, v,
                       preferred_element_type=jnp.float32)    # (G, N, hd)

        # Per-head output projection; head concat becomes a leading-dim sum.
        proj = jnp.einsum('gnd,gde->gne', o, wp_ref[l],
                          preferred_element_type=jnp.float32)  # (G, N, C)
        attn = proj.reshape(B, H, N, C).sum(axis=1) + bp_ref[l]  # (B, N, C)

        x = x + attn                                          # residual 1

        # ------------------------- MLP on LN2(x) ---------------------------
        xn2 = layernorm(x, ln2_g_ref[l], ln2_b_ref[l])
        h1 = jnp.einsum('bnc,ch->bnh', xn2, w1_ref[l],
                        preferred_element_type=jnp.float32) + b1_ref[l]
        h1 = jnp.maximum(h1, 0.0)                             # ReLU
        mlp = jnp.einsum('bnh,hc->bnc', h1, w2_ref[l],
                         preferred_element_type=jnp.float32) + b2_ref[l]

        x = x + mlp                                           # residual 2

    o_ref[...] = x


# ------------------------------ host wrapper -------------------------------
def build_kernel_params(params):
    """Stack per-layer params and pre-layout attention weights head-major."""
    C, H, B = DIM_SELF, NUM_HEADS, BATCH
    hd = C // H

    def stack(name):
        return jnp.stack([p[name] for p in params], axis=0)

    wqkv_layers, wp_layers = [], []
    for p in params:
        wq, wkv, wp = p["wq"], p["wkv"], p["wp"]
        wk, wv = wkv[:, :C], wkv[:, C:]
        # g3 = s*(B*H) + b*H + h  ->  W_s[:, h*hd:(h+1)*hd]   (replicated over b)
        per_g = []
        for ws in (wq, wk, wv):
            per_head = jnp.stack(
                [ws[:, h * hd:(h + 1) * hd] for h in range(H)], axis=0)  # (H,C,hd)
            per_g.append(jnp.tile(per_head, (B, 1, 1)))                  # (B*H,C,hd)
        wqkv_layers.append(jnp.concatenate(per_g, axis=0))               # (3*B*H,C,hd)

        wp_head = jnp.stack(
            [wp[h * hd:(h + 1) * hd, :] for h in range(H)], axis=0)      # (H,hd,C)
        wp_layers.append(jnp.tile(wp_head, (B, 1, 1)))                   # (B*H,hd,C)

    return {
        "ln1_g": stack("ln1_g"), "ln1_b": stack("ln1_b"),
        "wqkv_g": jnp.stack(wqkv_layers, axis=0),   # (L, 3*B*H, C, hd)
        "wp_g": jnp.stack(wp_layers, axis=0),       # (L, B*H, hd, C)
        "bp": stack("bp"),
        "ln2_g": stack("ln2_g"), "ln2_b": stack("ln2_b"),
        "w1": stack("w1"), "b1": stack("b1"),
        "w2": stack("w2"), "b2": stack("b2"),
    }


@jax.jit
def transformer_forward(x, kparams):
    B, N, C = x.shape
    kernel = functools.partial(
        transformer_kernel, num_layers=NUM_LAYERS, num_heads=NUM_HEADS)

    names = ("ln1_g", "ln1_b", "wqkv_g", "wp_g", "bp",
             "ln2_g", "ln2_b", "w1", "b1", "w2", "b2")
    args = [x] + [kparams[n] for n in names]

    def full_spec(shape):
        nd = len(shape)
        return pl.BlockSpec(shape, lambda i, _nd=nd: (0,) * _nd)

    return pl.pallas_call(
        kernel,
        out_shape=jax.ShapeDtypeStruct((B, N, C), jnp.float32),
        grid_spec=pltpu.PrefetchScalarGridSpec(
            num_scalar_prefetch=0,
            grid=(1,),                                   # one step: whole problem
            in_specs=[full_spec(a.shape) for a in args],
            out_specs=full_spec((B, N, C)),
        ),
        compiler_params=pltpu.CompilerParams(
            dimension_semantics=("arbitrary",)),
    )(*args)


# ------------------------- pure-JAX reference check ------------------------
def reference_forward(x, params):
    def layernorm(v, g, b):
        mu = jnp.mean(v, axis=-1, keepdims=True)
        var = jnp.mean((v - mu) ** 2, axis=-1, keepdims=True)
        return (v - mu) * jax.lax.rsqrt(var + LN_EPS) * g + b

    B, N, C = x.shape
    hd = C // NUM_HEADS
    scale = hd ** (-0.5)
    for p in params:
        xn = layernorm(x, p["ln1_g"][0], p["ln1_b"][0])
        q = (xn @ p["wq"]).reshape(B, N, NUM_HEADS, hd)
        kv = (xn @ p["wkv"]).reshape(B, N, 2, NUM_HEADS, hd)
        k, v = kv[:, :, 0], kv[:, :, 1]
        att = jnp.einsum("bnhd,bmhd->bnmh", q, k) * scale
        att = jax.nn.softmax(att, axis=2)
        out = jnp.einsum("bnmh,bmhd->bnhd", att, v).reshape(B, N, C)
        out = out @ p["wp"] + p["bp"][0]
        x = x + out
        xn2 = layernorm(x, p["ln2_g"][0], p["ln2_b"][0])
        h = jnp.maximum(xn2 @ p["w1"] + p["b1"][0], 0.0)
        x = x + (h @ p["w2"] + p["b2"][0])
    return x


# ----------------------------- parameter init ------------------------------
def init_params(key, num_layers, c, mlp_ratio):
    h_mlp = int(c * mlp_ratio)
    params = []
    for _ in range(num_layers):
        keys = jax.random.split(key, 8)
        key = keys[0]
        params.append({
            "ln1_g": jnp.ones((1, c), jnp.float32),
            "ln1_b": jnp.zeros((1, c), jnp.float32),
            "wq":  0.05 * jax.random.normal(keys[1], (c, c), jnp.float32),
            "wkv": 0.05 * jax.random.normal(keys[2], (c, 2 * c), jnp.float32),
            "wp":  0.05 * jax.random.normal(keys[3], (c, c), jnp.float32),
            "bp":  0.01 * jax.random.normal(keys[4], (1, c), jnp.float32),
            "ln2_g": jnp.ones((1, c), jnp.float32),
            "ln2_b": jnp.zeros((1, c), jnp.float32),
            "w1":  0.05 * jax.random.normal(keys[5], (c, h_mlp), jnp.float32),
            "b1":  0.01 * jax.random.normal(keys[6], (1, h_mlp), jnp.float32),
            "w2":  0.05 * jax.random.normal(keys[7], (h_mlp, c), jnp.float32),
            "b2":  jnp.zeros((1, c), jnp.float32),
        })
    return params


if __name__ == "__main__":
    key = jax.random.PRNGKey(0)
    kx, kp = jax.random.split(key)
    x = jax.random.normal(kx, (BATCH, SEQ, DIM_SELF), jnp.float32)
    params = init_params(kp, NUM_LAYERS, DIM_SELF, MLP_RATIO)
    kparams = build_kernel_params(params)

    out = transformer_forward(x, kparams)
    out = jax.block_until_ready(out)

    ref = reference_forward(x, params)
    assert out.shape == (BATCH, SEQ, DIM_SELF)
    # tolerance accounts for pl.reciprocal(approx=True) in the softmax
    assert jnp.allclose(out, ref, atol=1e-3, rtol=1e-3), "mismatch vs reference"

    print("KERNEL_OK")
</pallas_src>

<mosaic_0001>
module attributes {stable_mosaic.version = 11 : i64} {
  func.func @transformer_kernel(%arg0: i32, %arg1: memref<2x8x32xf32, #tpu.memory_space<vmem>>, %arg2: memref<2x1x32xf32, #tpu.memory_space<vmem>>, %arg3: memref<2x1x32xf32, #tpu.memory_space<vmem>>, %arg4: memref<2x24x32x8xf32, #tpu.memory_space<vmem>>, %arg5: memref<2x8x8x32xf32, #tpu.memory_space<vmem>>, %arg6: memref<2x1x32xf32, #tpu.memory_space<vmem>>, %arg7: memref<2x1x32xf32, #tpu.memory_space<vmem>>, %arg8: memref<2x1x32xf32, #tpu.memory_space<vmem>>, %arg9: memref<2x32x64xf32, #tpu.memory_space<vmem>>, %arg10: memref<2x1x64xf32, #tpu.memory_space<vmem>>, %arg11: memref<2x64x32xf32, #tpu.memory_space<vmem>>, %arg12: memref<2x1x32xf32, #tpu.memory_space<vmem>>, %arg13: memref<2x8x32xf32, #tpu.memory_space<vmem>>) attributes {dimension_semantics = [#tpu.dimension_semantics<arbitrary>], iteration_bounds = array<i64: 1>, scalar_prefetch = 0 : i64, scratch_operands = 0 : i64, tpu.core_type = #tpu.core_type<tc>, window_params = [{pipeline_mode = #tpu.pipeline_mode<synchronous>, transform_indices = @transform_0, window_bounds = array<i64: 2, 8, 32>}, {pipeline_mode = #tpu.pipeline_mode<synchronous>, transform_indices = @transform_1, window_bounds = array<i64: 2, 1, 32>}, {pipeline_mode = #tpu.pipeline_mode<synchronous>, transform_indices = @transform_2, window_bounds = array<i64: 2, 1, 32>}, {pipeline_mode = #tpu.pipeline_mode<synchronous>, transform_indices = @transform_3, window_bounds = array<i64: 2, 24, 32, 8>}, {pipeline_mode = #tpu.pipeline_mode<synchronous>, transform_indices = @transform_4, window_bounds = array<i64: 2, 8, 8, 32>}, {pipeline_mode = #tpu.pipeline_mode<synchronous>, transform_indices = @transform_5, window_bounds = array<i64: 2, 1, 32>}, {pipeline_mode = #tpu.pipeline_mode<synchronous>, transform_indices = @transform_6, window_bounds = array<i64: 2, 1, 32>}, {pipeline_mode = #tpu.pipeline_mode<synchronous>, transform_indices = @transform_7, window_bounds = array<i64: 2, 1, 32>}, {pipeline_mode = #tpu.pipeline_mode<synchronous>, transform_indices = @transform_8, window_bounds = array<i64: 2, 32, 64>}, {pipeline_mode = #tpu.pipeline_mode<synchronous>, transform_indices = @transform_9, window_bounds = array<i64: 2, 1, 64>}, {pipeline_mode = #tpu.pipeline_mode<synchronous>, transform_indices = @transform_10, window_bounds = array<i64: 2, 64, 32>}, {pipeline_mode = #tpu.pipeline_mode<synchronous>, transform_indices = @transform_11, window_bounds = array<i64: 2, 1, 32>}, {pipeline_mode = #tpu.pipeline_mode<synchronous>, transform_indices = @transform_12, window_bounds = array<i64: 2, 8, 32>}]} {
    %c0 = arith.constant 0 : index
    %c0_0 = arith.constant 0 : index
    %c0_1 = arith.constant 0 : index
    %0 = vector.load %arg1[%c0, %c0_0, %c0_1] : memref<2x8x32xf32, #tpu.memory_space<vmem>>, vector<2x8x32xf32>
    %c0_2 = arith.constant 0 : index
    %c0_3 = arith.constant 0 : index
    %c0_4 = arith.constant 0 : index
    %1 = vector.load %arg2[%c0_2, %c0_3, %c0_4] : memref<2x1x32xf32, #tpu.memory_space<vmem>>, vector<1x1x32xf32>
    %2 = vector.shape_cast %1 : vector<1x1x32xf32> to vector<1x32xf32>
    %c0_5 = arith.constant 0 : index
    %c0_6 = arith.constant 0 : index
    %c0_7 = arith.constant 0 : index
    %3 = vector.load %arg3[%c0_5, %c0_6, %c0_7] : memref<2x1x32xf32, #tpu.memory_space<vmem>>, vector<1x1x32xf32>
    %4 = vector.shape_cast %3 : vector<1x1x32xf32> to vector<1x32xf32>
    %cst = arith.constant dense<0.000000e+00> : vector<2x8xf32>
    %5 = vector.multi_reduction <add>, %0, %cst [2] : vector<2x8x32xf32> to vector<2x8xf32>
    %6 = vector.shape_cast %5 : vector<2x8xf32> to vector<2x8x1xf32>
    %cst_8 = arith.constant 3.200000e+01 : f32
    %7 = vector.broadcast %cst_8 : f32 to vector<2x8x1xf32>
    %8 = arith.divf %6, %7 : vector<2x8x1xf32>
    %9 = vector.broadcast %8 : vector<2x8x1xf32> to vector<2x8x32xf32>
    %10 = arith.subf %0, %9 : vector<2x8x32xf32>
    %11 = arith.mulf %10, %10 : vector<2x8x32xf32>
    %cst_9 = arith.constant dense<0.000000e+00> : vector<2x8xf32>
    %12 = vector.multi_reduction <add>, %11, %cst_9 [2] : vector<2x8x32xf32> to vector<2x8xf32>
    %13 = vector.shape_cast %12 : vector<2x8xf32> to vector<2x8x1xf32>
    %cst_10 = arith.constant 3.200000e+01 : f32
    %14 = vector.broadcast %cst_10 : f32 to vector<2x8x1xf32>
    %15 = arith.divf %13, %14 : vector<2x8x1xf32>
    %16 = vector.broadcast %8 : vector<2x8x1xf32> to vector<2x8x32xf32>
    %17 = arith.subf %0, %16 : vector<2x8x32xf32>
    %cst_11 = arith.constant 9.99999974E-6 : f32
    %18 = vector.broadcast %cst_11 : f32 to vector<2x8x1xf32>
    %19 = arith.addf %15, %18 : vector<2x8x1xf32>
    %20 = math.rsqrt %19 : vector<2x8x1xf32>
    %21 = vector.broadcast %20 : vector<2x8x1xf32> to vector<2x8x32xf32>
    %22 = arith.mulf %17, %21 : vector<2x8x32xf32>
    %23 = vector.shape_cast %2 : vector<1x32xf32> to vector<1x1x32xf32>
    %24 = vector.broadcast %23 : vector<1x1x32xf32> to vector<2x8x32xf32>
    %25 = arith.mulf %22, %24 : vector<2x8x32xf32>
    %26 = vector.shape_cast %4 : vector<1x32xf32> to vector<1x1x32xf32>
    %27 = vector.broadcast %26 : vector<1x1x32xf32> to vector<2x8x32xf32>
    %28 = arith.addf %25, %27 : vector<2x8x32xf32>
    %29 = vector.shape_cast %28 : vector<2x8x32xf32> to vector<2x1x8x32xf32>
    %30 = vector.shape_cast %29 : vector<2x1x8x32xf32> to vector<2x1x8x32xf32>
    %31 = vector.broadcast %30 : vector<2x1x8x32xf32> to vector<2x4x8x32xf32>
    %32 = vector.shape_cast %31 : vector<2x4x8x32xf32> to vector<8x8x32xf32>
    %33 = vector.shape_cast %32 : vector<8x8x32xf32> to vector<1x8x8x32xf32>
    %34 = vector.shape_cast %33 : vector<1x8x8x32xf32> to vector<1x8x8x32xf32>
    %35 = vector.broadcast %34 : vector<1x8x8x32xf32> to vector<3x8x8x32xf32>
    %36 = vector.shape_cast %35 : vector<3x8x8x32xf32> to vector<24x8x32xf32>
    %c0_12 = arith.constant 0 : index
    %c0_13 = arith.constant 0 : index
    %c0_14 = arith.constant 0 : index
    %c0_15 = arith.constant 0 : index
    %37 = vector.load %arg4[%c0_12, %c0_13, %c0_14, %c0_15] : memref<2x24x32x8xf32, #tpu.memory_space<vmem>>, vector<1x24x32x8xf32>
    %38 = vector.shape_cast %37 : vector<1x24x32x8xf32> to vector<24x32x8xf32>
    "tpu.trace_start"() <{level = 10 : i32, message = "gnc,gcd->gnd"}> : () -> ()
    %cst_16 = arith.constant dense<0.000000e+00> : vector<24x8x8xf32>
    %39 = tpu.matmul %36, %38, %cst_16 {dimension_numbers = #tpu.dot_dimension_numbers<[2], [1], [1], [2], [0, 0, 0, 1, 1, 2], [0], [0]>} : vector<24x8x32xf32>, vector<24x32x8xf32>, vector<24x8x8xf32> -> vector<24x8x8xf32>
    "tpu.trace_stop"() : () -> ()
    %40 = vector.extract_strided_slice %39 {offsets = [0, 0, 0], sizes = [8, 8, 8], strides = [1, 1, 1]} : vector<24x8x8xf32> to vector<8x8x8xf32>
    %41 = vector.extract_strided_slice %39 {offsets = [8, 0, 0], sizes = [8, 8, 8], strides = [1, 1, 1]} : vector<24x8x8xf32> to vector<8x8x8xf32>
    %42 = vector.extract_strided_slice %39 {offsets = [16, 0, 0], sizes = [8, 8, 8], strides = [1, 1, 1]} : vector<24x8x8xf32> to vector<8x8x8xf32>
    "tpu.trace_start"() <{level = 10 : i32, message = "gnd,gmd->gnm"}> : () -> ()
    %cst_17 = arith.constant dense<0.000000e+00> : vector<8x8x8xf32>
    %43 = tpu.matmul %40, %41, %cst_17 {dimension_numbers = #tpu.dot_dimension_numbers<[2], [2], [1], [1], [0, 0, 0, 1, 1, 1], [0], [0]>} : vector<8x8x8xf32>, vector<8x8x8xf32>, vector<8x8x8xf32> -> vector<8x8x8xf32>
    "tpu.trace_stop"() : () -> ()
    %cst_18 = arith.constant 0.353553385 : f32
    %44 = vector.broadcast %cst_18 : f32 to vector<8x8x8xf32>
    %45 = arith.mulf %43, %44 : vector<8x8x8xf32>
    %cst_19 = arith.constant dense<0xFF800000> : vector<8x8xf32>
    %46 = vector.multi_reduction <maximumf>, %45, %cst_19 [2] : vector<8x8x8xf32> to vector<8x8xf32>
    %47 = vector.shape_cast %46 : vector<8x8xf32> to vector<8x8x1xf32>
    %48 = vector.broadcast %47 : vector<8x8x1xf32> to vector<8x8x8xf32>
    %49 = arith.subf %45, %48 : vector<8x8x8xf32>
    %50 = math.exp %49 : vector<8x8x8xf32>
    %cst_20 = arith.constant dense<0.000000e+00> : vector<8x8xf32>
    %51 = vector.multi_reduction <add>, %50, %cst_20 [2] : vector<8x8x8xf32> to vector<8x8xf32>
    %52 = vector.shape_cast %51 : vector<8x8xf32> to vector<8x8x1xf32>
    %53 = tpu.reciprocal %52 {approx = true} : vector<8x8x1xf32> -> vector<8x8x1xf32>
    %54 = vector.broadcast %53 : vector<8x8x1xf32> to vector<8x8x8xf32>
    %55 = arith.mulf %50, %54 : vector<8x8x8xf32>
    "tpu.trace_start"() <{level = 10 : i32, message = "gnm,gmd->gnd"}> : () -> ()
    %cst_21 = arith.constant dense<0.000000e+00> : vector<8x8x8xf32>
    %56 = tpu.matmul %55, %42, %cst_21 {dimension_numbers = #tpu.dot_dimension_numbers<[2], [1], [1], [2], [0, 0, 0, 1, 1, 2], [0], [0]>} : vector<8x8x8xf32>, vector<8x8x8xf32>, vector<8x8x8xf32> -> vector<8x8x8xf32>
    "tpu.trace_stop"() : () -> ()
    %c0_22 = arith.constant 0 : index
    %c0_23 = arith.constant 0 : index
    %c0_24 = arith.constant 0 : index
    %c0_25 = arith.constant 0 : index
    %57 = vector.load %arg5[%c0_22, %c0_23, %c0_24, %c0_25] : memref<2x8x8x32xf32, #tpu.memory_space<vmem>>, vector<1x8x8x32xf32>
    %58 = vector.shape_cast %57 : vector<1x8x8x32xf32> to vector<8x8x32xf32>
    "tpu.trace_start"() <{level = 10 : i32, message = "gnd,gde->gne"}> : () -> ()
    %cst_26 = arith.constant dense<0.000000e+00> : vector<8x8x32xf32>
    %59 = tpu.matmul %56, %58, %cst_26 {dimension_numbers = #tpu.dot_dimension_numbers<[2], [1], [1], [2], [0, 0, 0, 1, 1, 2], [0], [0]>} : vector<8x8x8xf32>, vector<8x8x32xf32>, vector<8x8x32xf32> -> vector<8x8x32xf32>
    "tpu.trace_stop"() : () -> ()
    %60 = vector.shape_cast %59 : vector<8x8x32xf32> to vector<2x4x8x32xf32>
    %cst_27 = arith.constant dense<0.000000e+00> : vector<2x8x32xf32>
    %61 = vector.multi_reduction <add>, %60, %cst_27 [1] : vector<2x4x8x32xf32> to vector<2x8x32xf32>
    %c0_28 = arith.constant 0 : index
    %c0_29 = arith.constant 0 : index
    %c0_30 = arith.constant 0 : index
    %62 = vector.load %arg6[%c0_28, %c0_29, %c0_30] : memref<2x1x32xf32, #tpu.memory_space<vmem>>, vector<1x1x32xf32>
    %63 = vector.shape_cast %62 : vector<1x1x32xf32> to vector<1x32xf32>
    %64 = vector.shape_cast %63 : vector<1x32xf32> to vector<1x1x32xf32>
    %65 = vector.broadcast %64 : vector<1x1x32xf32> to vector<2x8x32xf32>
    %66 = arith.addf %61, %65 : vector<2x8x32xf32>
    %67 = arith.addf %0, %66 : vector<2x8x32xf32>
    %c0_31 = arith.constant 0 : index
    %c0_32 = arith.constant 0 : index
    %c0_33 = arith.constant 0 : index
    %68 = vector.load %arg7[%c0_31, %c0_32, %c0_33] : memref<2x1x32xf32, #tpu.memory_space<vmem>>, vector<1x1x32xf32>
    %69 = vector.shape_cast %68 : vector<1x1x32xf32> to vector<1x32xf32>
    %c0_34 = arith.constant 0 : index
    %c0_35 = arith.constant 0 : index
    %c0_36 = arith.constant 0 : index
    %70 = vector.load %arg8[%c0_34, %c0_35, %c0_36] : memref<2x1x32xf32, #tpu.memory_space<vmem>>, vector<1x1x32xf32>
    %71 = vector.shape_cast %70 : vector<1x1x32xf32> to vector<1x32xf32>
    %cst_37 = arith.constant dense<0.000000e+00> : vector<2x8xf32>
    %72 = vector.multi_reduction <add>, %67, %cst_37 [2] : vector<2x8x32xf32> to vector<2x8xf32>
    %73 = vector.shape_cast %72 : vector<2x8xf32> to vector<2x8x1xf32>
    %cst_38 = arith.constant 3.200000e+01 : f32
    %74 = vector.broadcast %cst_38 : f32 to vector<2x8x1xf32>
    %75 = arith.divf %73, %74 : vector<2x8x1xf32>
    %76 = vector.broadcast %75 : vector<2x8x1xf32> to vector<2x8x32xf32>
    %77 = arith.subf %67, %76 : vector<2x8x32xf32>
    %78 = arith.mulf %77, %77 : vector<2x8x32xf32>
    %cst_39 = arith.constant dense<0.000000e+00> : vector<2x8xf32>
    %79 = vector.multi_reduction <add>, %78, %cst_39 [2] : vector<2x8x32xf32> to vector<2x8xf32>
    %80 = vector.shape_cast %79 : vector<2x8xf32> to vector<2x8x1xf32>
    %cst_40 = arith.constant 3.200000e+01 : f32
    %81 = vector.broadcast %cst_40 : f32 to vector<2x8x1xf32>
    %82 = arith.divf %80, %81 : vector<2x8x1xf32>
    %83 = vector.broadcast %75 : vector<2x8x1xf32> to vector<2x8x32xf32>
    %84 = arith.subf %67, %83 : vector<2x8x32xf32>
    %cst_41 = arith.constant 9.99999974E-6 : f32
    %85 = vector.broadcast %cst_41 : f32 to vector<2x8x1xf32>
    %86 = arith.addf %82, %85 : vector<2x8x1xf32>
    %87 = math.rsqrt %86 : vector<2x8x1xf32>
    %88 = vector.broadcast %87 : vector<2x8x1xf32> to vector<2x8x32xf32>
    %89 = arith.mulf %84, %88 : vector<2x8x32xf32>
    %90 = vector.shape_cast %69 : vector<1x32xf32> to vector<1x1x32xf32>
    %91 = vector.broadcast %90 : vector<1x1x32xf32> to vector<2x8x32xf32>
    %92 = arith.mulf %89, %91 : vector<2x8x32xf32>
    %93 = vector.shape_cast %71 : vector<1x32xf32> to vector<1x1x32xf32>
    %94 = vector.broadcast %93 : vector<1x1x32xf32> to vector<2x8x32xf32>
    %95 = arith.addf %92, %94 : vector<2x8x32xf32>
    %c0_42 = arith.constant 0 : index
    %c0_43 = arith.constant 0 : index
    %c0_44 = arith.constant 0 : index
    %96 = vector.load %arg9[%c0_42, %c0_43, %c0_44] : memref<2x32x64xf32, #tpu.memory_space<vmem>>, vector<1x32x64xf32>
    %97 = vector.shape_cast %96 : vector<1x32x64xf32> to vector<32x64xf32>
    "tpu.trace_start"() <{level = 10 : i32, message = "bnc,ch->bnh"}> : () -> ()
    %cst_45 = arith.constant dense<0.000000e+00> : vector<2x8x64xf32>
    %98 = tpu.matmul %95, %97, %cst_45 {dimension_numbers = #tpu.dot_dimension_numbers<[2], [0], [0, 1], [1], [0, 0, 0, 1, 1, 1], [], []>} : vector<2x8x32xf32>, vector<32x64xf32>, vector<2x8x64xf32> -> vector<2x8x64xf32>
    "tpu.trace_stop"() : () -> ()
    %c0_46 = arith.constant 0 : index
    %c0_47 = arith.constant 0 : index
    %c0_48 = arith.constant 0 : index
    %99 = vector.load %arg10[%c0_46, %c0_47, %c0_48] : memref<2x1x64xf32, #tpu.memory_space<vmem>>, vector<1x1x64xf32>
    %100 = vector.shape_cast %99 : vector<1x1x64xf32> to vector<1x64xf32>
    %101 = vector.shape_cast %100 : vector<1x64xf32> to vector<1x1x64xf32>
    %102 = vector.broadcast %101 : vector<1x1x64xf32> to vector<2x8x64xf32>
    %103 = arith.addf %98, %102 : vector<2x8x64xf32>
    %cst_49 = arith.constant 0.000000e+00 : f32
    %104 = vector.broadcast %cst_49 : f32 to vector<2x8x64xf32>
    %105 = arith.maximumf %103, %104 : vector<2x8x64xf32>
    %c0_50 = arith.constant 0 : index
    %c0_51 = arith.constant 0 : index
    %c0_52 = arith.constant 0 : index
    %106 = vector.load %arg11[%c0_50, %c0_51, %c0_52] : memref<2x64x32xf32, #tpu.memory_space<vmem>>, vector<1x64x32xf32>
    %107 = vector.shape_cast %106 : vector<1x64x32xf32> to vector<64x32xf32>
    "tpu.trace_start"() <{level = 10 : i32, message = "bnh,hc->bnc"}> : () -> ()
    %cst_53 = arith.constant dense<0.000000e+00> : vector<2x8x32xf32>
    %108 = tpu.matmul %105, %107, %cst_53 {dimension_numbers = #tpu.dot_dimension_numbers<[2], [0], [0, 1], [1], [0, 0, 0, 1, 1, 1], [], []>} : vector<2x8x64xf32>, vector<64x32xf32>, vector<2x8x32xf32> -> vector<2x8x32xf32>
    "tpu.trace_stop"() : () -> ()
    %c0_54 = arith.constant 0 : index
    %c0_55 = arith.constant 0 : index
    %c0_56 = arith.constant 0 : index
    %109 = vector.load %arg12[%c0_54, %c0_55, %c0_56] : memref<2x1x32xf32, #tpu.memory_space<vmem>>, vector<1x1x32xf32>
    %110 = vector.shape_cast %109 : vector<1x1x32xf32> to vector<1x32xf32>
    %111 = vector.shape_cast %110 : vector<1x32xf32> to vector<1x1x32xf32>
    %112 = vector.broadcast %111 : vector<1x1x32xf32> to vector<2x8x32xf32>
    %113 = arith.addf %108, %112 : vector<2x8x32xf32>
    %114 = arith.addf %67, %113 : vector<2x8x32xf32>
    %c1 = arith.constant 1 : index
    %c0_57 = arith.constant 0 : index
    %c0_58 = arith.constant 0 : index
    %115 = vector.load %arg2[%c1, %c0_57, %c0_58] : memref<2x1x32xf32, #tpu.memory_space<vmem>>, vector<1x1x32xf32>
    %116 = vector.shape_cast %115 : vector<1x1x32xf32> to vector<1x32xf32>
    %c1_59 = arith.constant 1 : index
    %c0_60 = arith.constant 0 : index
    %c0_61 = arith.constant 0 : index
    %117 = vector.load %arg3[%c1_59, %c0_60, %c0_61] : memref<2x1x32xf32, #tpu.memory_space<vmem>>, vector<1x1x32xf32>
    %118 = vector.shape_cast %117 : vector<1x1x32xf32> to vector<1x32xf32>
    %cst_62 = arith.constant dense<0.000000e+00> : vector<2x8xf32>
    %119 = vector.multi_reduction <add>, %114, %cst_62 [2] : vector<2x8x32xf32> to vector<2x8xf32>
    %120 = vector.shape_cast %119 : vector<2x8xf32> to vector<2x8x1xf32>
    %cst_63 = arith.constant 3.200000e+01 : f32
    %121 = vector.broadcast %cst_63 : f32 to vector<2x8x1xf32>
    %122 = arith.divf %120, %121 : vector<2x8x1xf32>
    %123 = vector.broadcast %122 : vector<2x8x1xf32> to vector<2x8x32xf32>
    %124 = arith.subf %114, %123 : vector<2x8x32xf32>
    %125 = arith.mulf %124, %124 : vector<2x8x32xf32>
    %cst_64 = arith.constant dense<0.000000e+00> : vector<2x8xf32>
    %126 = vector.multi_reduction <add>, %125, %cst_64 [2] : vector<2x8x32xf32> to vector<2x8xf32>
    %127 = vector.shape_cast %126 : vector<2x8xf32> to vector<2x8x1xf32>
    %cst_65 = arith.constant 3.200000e+01 : f32
    %128 = vector.broadcast %cst_65 : f32 to vector<2x8x1xf32>
    %129 = arith.divf %127, %128 : vector<2x8x1xf32>
    %130 = vector.broadcast %122 : vector<2x8x1xf32> to vector<2x8x32xf32>
    %131 = arith.subf %114, %130 : vector<2x8x32xf32>
    %cst_66 = arith.constant 9.99999974E-6 : f32
    %132 = vector.broadcast %cst_66 : f32 to vector<2x8x1xf32>
    %133 = arith.addf %129, %132 : vector<2x8x1xf32>
    %134 = math.rsqrt %133 : vector<2x8x1xf32>
    %135 = vector.broadcast %134 : vector<2x8x1xf32> to vector<2x8x32xf32>
    %136 = arith.mulf %131, %135 : vector<2x8x32xf32>
    %137 = vector.shape_cast %116 : vector<1x32xf32> to vector<1x1x32xf32>
    %138 = vector.broadcast %137 : vector<1x1x32xf32> to vector<2x8x32xf32>
    %139 = arith.mulf %136, %138 : vector<2x8x32xf32>
    %140 = vector.shape_cast %118 : vector<1x32xf32> to vector<1x1x32xf32>
    %141 = vector.broadcast %140 : vector<1x1x32xf32> to vector<2x8x32xf32>
    %142 = arith.addf %139, %141 : vector<2x8x32xf32>
    %143 = vector.shape_cast %142 : vector<2x8x32xf32> to vector<2x1x8x32xf32>
    %144 = vector.shape_cast %143 : vector<2x1x8x32xf32> to vector<2x1x8x32xf32>
    %145 = vector.broadcast %144 : vector<2x1x8x32xf32> to vector<2x4x8x32xf32>
    %146 = vector.shape_cast %145 : vector<2x4x8x32xf32> to vector<8x8x32xf32>
    %147 = vector.shape_cast %146 : vector<8x8x32xf32> to vector<1x8x8x32xf32>
    %148 = vector.shape_cast %147 : vector<1x8x8x32xf32> to vector<1x8x8x32xf32>
    %149 = vector.broadcast %148 : vector<1x8x8x32xf32> to vector<3x8x8x32xf32>
    %150 = vector.shape_cast %149 : vector<3x8x8x32xf32> to vector<24x8x32xf32>
    %c1_67 = arith.constant 1 : index
    %c0_68 = arith.constant 0 : index
    %c0_69 = arith.constant 0 : index
    %c0_70 = arith.constant 0 : index
    %151 = vector.load %arg4[%c1_67, %c0_68, %c0_69, %c0_70] : memref<2x24x32x8xf32, #tpu.memory_space<vmem>>, vector<1x24x32x8xf32>
    %152 = vector.shape_cast %151 : vector<1x24x32x8xf32> to vector<24x32x8xf32>
    "tpu.trace_start"() <{level = 10 : i32, message = "gnc,gcd->gnd"}> : () -> ()
    %cst_71 = arith.constant dense<0.000000e+00> : vector<24x8x8xf32>
    %153 = tpu.matmul %150, %152, %cst_71 {dimension_numbers = #tpu.dot_dimension_numbers<[2], [1], [1], [2], [0, 0, 0, 1, 1, 2], [0], [0]>} : vector<24x8x32xf32>, vector<24x32x8xf32>, vector<24x8x8xf32> -> vector<24x8x8xf32>
    "tpu.trace_stop"() : () -> ()
    %154 = vector.extract_strided_slice %153 {offsets = [0, 0, 0], sizes = [8, 8, 8], strides = [1, 1, 1]} : vector<24x8x8xf32> to vector<8x8x8xf32>
    %155 = vector.extract_strided_slice %153 {offsets = [8, 0, 0], sizes = [8, 8, 8], strides = [1, 1, 1]} : vector<24x8x8xf32> to vector<8x8x8xf32>
    %156 = vector.extract_strided_slice %153 {offsets = [16, 0, 0], sizes = [8, 8, 8], strides = [1, 1, 1]} : vector<24x8x8xf32> to vector<8x8x8xf32>
    "tpu.trace_start"() <{level = 10 : i32, message = "gnd,gmd->gnm"}> : () -> ()
    %cst_72 = arith.constant dense<0.000000e+00> : vector<8x8x8xf32>
    %157 = tpu.matmul %154, %155, %cst_72 {dimension_numbers = #tpu.dot_dimension_numbers<[2], [2], [1], [1], [0, 0, 0, 1, 1, 1], [0], [0]>} : vector<8x8x8xf32>, vector<8x8x8xf32>, vector<8x8x8xf32> -> vector<8x8x8xf32>
    "tpu.trace_stop"() : () -> ()
    %cst_73 = arith.constant 0.353553385 : f32
    %158 = vector.broadcast %cst_73 : f32 to vector<8x8x8xf32>
    %159 = arith.mulf %157, %158 : vector<8x8x8xf32>
    %cst_74 = arith.constant dense<0xFF800000> : vector<8x8xf32>
    %160 = vector.multi_reduction <maximumf>, %159, %cst_74 [2] : vector<8x8x8xf32> to vector<8x8xf32>
    %161 = vector.shape_cast %160 : vector<8x8xf32> to vector<8x8x1xf32>
    %162 = vector.broadcast %161 : vector<8x8x1xf32> to vector<8x8x8xf32>
    %163 = arith.subf %159, %162 : vector<8x8x8xf32>
    %164 = math.exp %163 : vector<8x8x8xf32>
    %cst_75 = arith.constant dense<0.000000e+00> : vector<8x8xf32>
    %165 = vector.multi_reduction <add>, %164, %cst_75 [2] : vector<8x8x8xf32> to vector<8x8xf32>
    %166 = vector.shape_cast %165 : vector<8x8xf32> to vector<8x8x1xf32>
    %167 = tpu.reciprocal %166 {approx = true} : vector<8x8x1xf32> -> vector<8x8x1xf32>
    %168 = vector.broadcast %167 : vector<8x8x1xf32> to vector<8x8x8xf32>
    %169 = arith.mulf %164, %168 : vector<8x8x8xf32>
    "tpu.trace_start"() <{level = 10 : i32, message = "gnm,gmd->gnd"}> : () -> ()
    %cst_76 = arith.constant dense<0.000000e+00> : vector<8x8x8xf32>
    %170 = tpu.matmul %169, %156, %cst_76 {dimension_numbers = #tpu.dot_dimension_numbers<[2], [1], [1], [2], [0, 0, 0, 1, 1, 2], [0], [0]>} : vector<8x8x8xf32>, vector<8x8x8xf32>, vector<8x8x8xf32> -> vector<8x8x8xf32>
    "tpu.trace_stop"() : () -> ()
    %c1_77 = arith.constant 1 : index
    %c0_78 = arith.constant 0 : index
    %c0_79 = arith.constant 0 : index
    %c0_80 = arith.constant 0 : index
    %171 = vector.load %arg5[%c1_77, %c0_78, %c0_79, %c0_80] : memref<2x8x8x32xf32, #tpu.memory_space<vmem>>, vector<1x8x8x32xf32>
    %172 = vector.shape_cast %171 : vector<1x8x8x32xf32> to vector<8x8x32xf32>
    "tpu.trace_start"() <{level = 10 : i32, message = "gnd,gde->gne"}> : () -> ()
    %cst_81 = arith.constant dense<0.000000e+00> : vector<8x8x32xf32>
    %173 = tpu.matmul %170, %172, %cst_81 {dimension_numbers = #tpu.dot_dimension_numbers<[2], [1], [1], [2], [0, 0, 0, 1, 1, 2], [0], [0]>} : vector<8x8x8xf32>, vector<8x8x32xf32>, vector<8x8x32xf32> -> vector<8x8x32xf32>
    "tpu.trace_stop"() : () -> ()
    %174 = vector.shape_cast %173 : vector<8x8x32xf32> to vector<2x4x8x32xf32>
    %cst_82 = arith.constant dense<0.000000e+00> : vector<2x8x32xf32>
    %175 = vector.multi_reduction <add>, %174, %cst_82 [1] : vector<2x4x8x32xf32> to vector<2x8x32xf32>
    %c1_83 = arith.constant 1 : index
    %c0_84 = arith.constant 0 : index
    %c0_85 = arith.constant 0 : index
    %176 = vector.load %arg6[%c1_83, %c0_84, %c0_85] : memref<2x1x32xf32, #tpu.memory_space<vmem>>, vector<1x1x32xf32>
    %177 = vector.shape_cast %176 : vector<1x1x32xf32> to vector<1x32xf32>
    %178 = vector.shape_cast %177 : vector<1x32xf32> to vector<1x1x32xf32>
    %179 = vector.broadcast %178 : vector<1x1x32xf32> to vector<2x8x32xf32>
    %180 = arith.addf %175, %179 : vector<2x8x32xf32>
    %181 = arith.addf %114, %180 : vector<2x8x32xf32>
    %c1_86 = arith.constant 1 : index
    %c0_87 = arith.constant 0 : index
    %c0_88 = arith.constant 0 : index
    %182 = vector.load %arg7[%c1_86, %c0_87, %c0_88] : memref<2x1x32xf32, #tpu.memory_space<vmem>>, vector<1x1x32xf32>
    %183 = vector.shape_cast %182 : vector<1x1x32xf32> to vector<1x32xf32>
    %c1_89 = arith.constant 1 : index
    %c0_90 = arith.constant 0 : index
    %c0_91 = arith.constant 0 : index
    %184 = vector.load %arg8[%c1_89, %c0_90, %c0_91] : memref<2x1x32xf32, #tpu.memory_space<vmem>>, vector<1x1x32xf32>
    %185 = vector.shape_cast %184 : vector<1x1x32xf32> to vector<1x32xf32>
    %cst_92 = arith.constant dense<0.000000e+00> : vector<2x8xf32>
    %186 = vector.multi_reduction <add>, %181, %cst_92 [2] : vector<2x8x32xf32> to vector<2x8xf32>
    %187 = vector.shape_cast %186 : vector<2x8xf32> to vector<2x8x1xf32>
    %cst_93 = arith.constant 3.200000e+01 : f32
    %188 = vector.broadcast %cst_93 : f32 to vector<2x8x1xf32>
    %189 = arith.divf %187, %188 : vector<2x8x1xf32>
    %190 = vector.broadcast %189 : vector<2x8x1xf32> to vector<2x8x32xf32>
    %191 = arith.subf %181, %190 : vector<2x8x32xf32>
    %192 = arith.mulf %191, %191 : vector<2x8x32xf32>
    %cst_94 = arith.constant dense<0.000000e+00> : vector<2x8xf32>
    %193 = vector.multi_reduction <add>, %192, %cst_94 [2] : vector<2x8x32xf32> to vector<2x8xf32>
    %194 = vector.shape_cast %193 : vector<2x8xf32> to vector<2x8x1xf32>
    %cst_95 = arith.constant 3.200000e+01 : f32
    %195 = vector.broadcast %cst_95 : f32 to vector<2x8x1xf32>
    %196 = arith.divf %194, %195 : vector<2x8x1xf32>
    %197 = vector.broadcast %189 : vector<2x8x1xf32> to vector<2x8x32xf32>
    %198 = arith.subf %181, %197 : vector<2x8x32xf32>
    %cst_96 = arith.constant 9.99999974E-6 : f32
    %199 = vector.broadcast %cst_96 : f32 to vector<2x8x1xf32>
    %200 = arith.addf %196, %199 : vector<2x8x1xf32>
    %201 = math.rsqrt %200 : vector<2x8x1xf32>
    %202 = vector.broadcast %201 : vector<2x8x1xf32> to vector<2x8x32xf32>
    %203 = arith.mulf %198, %202 : vector<2x8x32xf32>
    %204 = vector.shape_cast %183 : vector<1x32xf32> to vector<1x1x32xf32>
    %205 = vector.broadcast %204 : vector<1x1x32xf32> to vector<2x8x32xf32>
    %206 = arith.mulf %203, %205 : vector<2x8x32xf32>
    %207 = vector.shape_cast %185 : vector<1x32xf32> to vector<1x1x32xf32>
    %208 = vector.broadcast %207 : vector<1x1x32xf32> to vector<2x8x32xf32>
    %209 = arith.addf %206, %208 : vector<2x8x32xf32>
    %c1_97 = arith.constant 1 : index
    %c0_98 = arith.constant 0 : index
    %c0_99 = arith.constant 0 : index
    %210 = vector.load %arg9[%c1_97, %c0_98, %c0_99] : memref<2x32x64xf32, #tpu.memory_space<vmem>>, vector<1x32x64xf32>
    %211 = vector.shape_cast %210 : vector<1x32x64xf32> to vector<32x64xf32>
    "tpu.trace_start"() <{level = 10 : i32, message = "bnc,ch->bnh"}> : () -> ()
    %cst_100 = arith.constant dense<0.000000e+00> : vector<2x8x64xf32>
    %212 = tpu.matmul %209, %211, %cst_100 {dimension_numbers = #tpu.dot_dimension_numbers<[2], [0], [0, 1], [1], [0, 0, 0, 1, 1, 1], [], []>} : vector<2x8x32xf32>, vector<32x64xf32>, vector<2x8x64xf32> -> vector<2x8x64xf32>
    "tpu.trace_stop"() : () -> ()
    %c1_101 = arith.constant 1 : index
    %c0_102 = arith.constant 0 : index
    %c0_103 = arith.constant 0 : index
    %213 = vector.load %arg10[%c1_101, %c0_102, %c0_103] : memref<2x1x64xf32, #tpu.memory_space<vmem>>, vector<1x1x64xf32>
    %214 = vector.shape_cast %213 : vector<1x1x64xf32> to vector<1x64xf32>
    %215 = vector.shape_cast %214 : vector<1x64xf32> to vector<1x1x64xf32>
    %216 = vector.broadcast %215 : vector<1x1x64xf32> to vector<2x8x64xf32>
    %217 = arith.addf %212, %216 : vector<2x8x64xf32>
    %cst_104 = arith.constant 0.000000e+00 : f32
    %218 = vector.broadcast %cst_104 : f32 to vector<2x8x64xf32>
    %219 = arith.maximumf %217, %218 : vector<2x8x64xf32>
    %c1_105 = arith.constant 1 : index
    %c0_106 = arith.constant 0 : index
    %c0_107 = arith.constant 0 : index
    %220 = vector.load %arg11[%c1_105, %c0_106, %c0_107] : memref<2x64x32xf32, #tpu.memory_space<vmem>>, vector<1x64x32xf32>
    %221 = vector.shape_cast %220 : vector<1x64x32xf32> to vector<64x32xf32>
    "tpu.trace_start"() <{level = 10 : i32, message = "bnh,hc->bnc"}> : () -> ()
    %cst_108 = arith.constant dense<0.000000e+00> : vector<2x8x32xf32>
    %222 = tpu.matmul %219, %221, %cst_108 {dimension_numbers = #tpu.dot_dimension_numbers<[2], [0], [0, 1], [1], [0, 0, 0, 1, 1, 1], [], []>} : vector<2x8x64xf32>, vector<64x32xf32>, vector<2x8x32xf32> -> vector<2x8x32xf32>
    "tpu.trace_stop"() : () -> ()
    %c1_109 = arith.constant 1 : index
    %c0_110 = arith.constant 0 : index
    %c0_111 = arith.constant 0 : index
    %223 = vector.load %arg12[%c1_109, %c0_110, %c0_111] : memref<2x1x32xf32, #tpu.memory_space<vmem>>, vector<1x1x32xf32>
    %224 = vector.shape_cast %223 : vector<1x1x32xf32> to vector<1x32xf32>
    %225 = vector.shape_cast %224 : vector<1x32xf32> to vector<1x1x32xf32>
    %226 = vector.broadcast %225 : vector<1x1x32xf32> to vector<2x8x32xf32>
    %227 = arith.addf %222, %226 : vector<2x8x32xf32>
    %228 = arith.addf %181, %227 : vector<2x8x32xf32>
    %c0_112 = arith.constant 0 : index
    %c0_113 = arith.constant 0 : index
    %c0_114 = arith.constant 0 : index
    %229 = vector.load %arg13[%c0_112, %c0_113, %c0_114] : memref<2x8x32xf32, #tpu.memory_space<vmem>>, vector<2x8x32xf32>
    tpu.vector_store %arg13[%c0_112, %c0_113, %c0_114], %228 {strides = array<i32>} : memref<2x8x32xf32, #tpu.memory_space<vmem>>, vector<2x8x32xf32>,
    return
  }
  func.func @transform_0(%arg0: i32) -> (i32, i32, i32) {
    %c0_i32 = arith.constant 0 : i32
    %c0_i32_0 = arith.constant 0 : i32
    %c0_i32_1 = arith.constant 0 : i32
    %c0_i32_2 = arith.constant 0 : i32
    return %c0_i32, %c0_i32_0, %c0_i32_1 : i32, i32, i32
  }
  func.func @transform_1(%arg0: i32) -> (i32, i32, i32) {
    %c0_i32 = arith.constant 0 : i32
    %c0_i32_0 = arith.constant 0 : i32
    %c0_i32_1 = arith.constant 0 : i32
    %c0_i32_2 = arith.constant 0 : i32
    return %c0_i32, %c0_i32_0, %c0_i32_1 : i32, i32, i32
  }
  func.func @transform_2(%arg0: i32) -> (i32, i32, i32) {
    %c0_i32 = arith.constant 0 : i32
    %c0_i32_0 = arith.constant 0 : i32
    %c0_i32_1 = arith.constant 0 : i32
    %c0_i32_2 = arith.constant 0 : i32
    return %c0_i32, %c0_i32_0, %c0_i32_1 : i32, i32, i32
  }
  func.func @transform_3(%arg0: i32) -> (i32, i32, i32, i32) {
    %c0_i32 = arith.constant 0 : i32
    %c0_i32_0 = arith.constant 0 : i32
    %c0_i32_1 = arith.constant 0 : i32
    %c0_i32_2 = arith.constant 0 : i32
    %c0_i32_3 = arith.constant 0 : i32
    return %c0_i32, %c0_i32_0, %c0_i32_1, %c0_i32_2 : i32, i32, i32, i32
  }
  func.func @transform_4(%arg0: i32) -> (i32, i32, i32, i32) {
    %c0_i32 = arith.constant 0 : i32
    %c0_i32_0 = arith.constant 0 : i32
    %c0_i32_1 = arith.constant 0 : i32
    %c0_i32_2 = arith.constant 0 : i32
    %c0_i32_3 = arith.constant 0 : i32
    return %c0_i32, %c0_i32_0, %c0_i32_1, %c0_i32_2 : i32, i32, i32, i32
  }
  func.func @transform_5(%arg0: i32) -> (i32, i32, i32) {
    %c0_i32 = arith.constant 0 : i32
    %c0_i32_0 = arith.constant 0 : i32
    %c0_i32_1 = arith.constant 0 : i32
    %c0_i32_2 = arith.constant 0 : i32
    return %c0_i32, %c0_i32_0, %c0_i32_1 : i32, i32, i32
  }
  func.func @transform_6(%arg0: i32) -> (i32, i32, i32) {
    %c0_i32 = arith.constant 0 : i32
    %c0_i32_0 = arith.constant 0 : i32
    %c0_i32_1 = arith.constant 0 : i32
    %c0_i32_2 = arith.constant 0 : i32
    return %c0_i32, %c0_i32_0, %c0_i32_1 : i32, i32, i32
  }
  func.func @transform_7(%arg0: i32) -> (i32, i32, i32) {
    %c0_i32 = arith.constant 0 : i32
    %c0_i32_0 = arith.constant 0 : i32
    %c0_i32_1 = arith.constant 0 : i32
    %c0_i32_2 = arith.constant 0 : i32
    return %c0_i32, %c0_i32_0, %c0_i32_1 : i32, i32, i32
  }
  func.func @transform_8(%arg0: i32) -> (i32, i32, i32) {
    %c0_i32 = arith.constant 0 : i32
    %c0_i32_0 = arith.constant 0 : i32
    %c0_i32_1 = arith.constant 0 : i32
    %c0_i32_2 = arith.constant 0 : i32
    return %c0_i32, %c0_i32_0, %c0_i32_1 : i32, i32, i32
  }
  func.func @transform_9(%arg0: i32) -> (i32, i32, i32) {
    %c0_i32 = arith.constant 0 : i32
    %c0_i32_0 = arith.constant 0 : i32
    %c0_i32_1 = arith.constant 0 : i32
    %c0_i32_2 = arith.constant 0 : i32
    return %c0_i32, %c0_i32_0, %c0_i32_1 : i32, i32, i32
  }
  func.func @transform_10(%arg0: i32) -> (i32, i32, i32) {
    %c0_i32 = arith.constant 0 : i32
    %c0_i32_0 = arith.constant 0 : i32
    %c0_i32_1 = arith.constant 0 : i32
    %c0_i32_2 = arith.constant 0 : i32
    return %c0_i32, %c0_i32_0, %c0_i32_1 : i32, i32, i32
  }
  func.func @transform_11(%arg0: i32) -> (i32, i32, i32) {
    %c0_i32 = arith.constant 0 : i32
    %c0_i32_0 = arith.constant 0 : i32
    %c0_i32_1 = arith.constant 0 : i32
    %c0_i32_2 = arith.constant 0 : i32
    return %c0_i32, %c0_i32_0, %c0_i32_1 : i32, i32, i32
  }
  func.func @transform_12(%arg0: i32) -> (i32, i32, i32) {
    %c0_i32 = arith.constant 0 : i32
    %c0_i32_0 = arith.constant 0 : i32
    %c0_i32_1 = arith.constant 0 : i32
    %c0_i32_2 = arith.constant 0 : i32
    return %c0_i32, %c0_i32_0, %c0_i32_1 : i32, i32, i32
  }
}

</mosaic_0001>

<bundles_post_ra>
// kernel: transformer_forward.1
= control target key start
LH: loop header
LB: loop body
LE: loop exit
PB: predicated region body
PF: predicated region fallthrough
CT: control target
= control target key end

     0   :  { %vm46_vm0 = vcmask 261120   ;;  %s11141_s0 = inlined_call_operand.vmem [shape: f32[2,8,32], index: 0, kind: input, shape index: {}]   ;;  %s11142_s1 = inlined_call_operand.vmem [shape: f32[2,1,32], index: 1, kind: input, shape index: {}]   ;;  %s11143_s2 = inlined_call_operand.vmem [shape: f32[2,1,32], index: 2, kind: input, shape index: {}]   ;;  %s11144_s3 = inlined_call_operand.vmem [shape: f32[2,24,32,8], index: 3, kind: input, shape index: {}]   ;;  %s11145_s4 = inlined_call_operand.vmem [shape: f32[2,8,8,32], index: 4, kind: input, shape index: {}]   ;;  %s11146_s5 = inlined_call_operand.vmem [shape: f32[2,1,32], index: 5, kind: input, shape index: {}]   ;;  %s11147_s6 = inlined_call_operand.vmem [shape: f32[2,1,32], index: 6, kind: input, shape index: {}]   ;;  %s11148_s7 = inlined_call_operand.vmem [shape: f32[2,1,32], index: 7, kind: input, shape index: {}]   ;;  %s11149_s8 = inlined_call_operand.vmem [shape: f32[2,32,64], index: 8, kind: input, shape index: {}]   ;;  %s11150_s9 = inlined_call_operand.vmem [shape: f32[2,1,64], index: 9, kind: input, shape index: {}]   ;;  %s11151_s10 = inlined_call_operand.vmem [shape: f32[2,64,32], index: 10, kind: input, shape index: {}]   ;;  %s11152_s11 = inlined_call_operand.vmem [shape: f32[2,1,32], index: 11, kind: input, shape index: {}]   ;;  %s11153_s12 = inlined_call_operand.hbm [shape: f32[2,8,32], index: 12, kind: output, shape index: {}]  }
   0x1   :  { %v42_v0 = vld [vmem:[%s11141_s0] sm:$0xff]  ;;  %v43_v1 = vld [vmem:[%s11141_s0 + $0x8] sm:$0xff] }
   0x2   :  { %17 = vsyncpa [#allocation3], 0  ;;  %v47_v2 = vsel %vm46_vm0, %v42_v0, 0.0  ;;  %v50_v3 = vsel %vm46_vm0, %v43_v1, 0.0  ;;  %v9573_v14 = vmov 0.0   ;;  %v93_v15 = vld [vmem:[%s11144_s3 + $0x18] sm:$0xff] }
   0x3   :  { %48 = vadd.xlane.f32.xlu0 %v47_v2  ;;  %8636 = vmatprep.subr.mxu0 %v9573_v14  ;;  %v97_v16 = vld [vmem:[%s11144_s3 + $0x38] sm:$0xff]  ;;  %v92_v17 = vld [vmem:[%s11144_s3 + $0x10] sm:$0xff]  ;;  %v91_v19 = vld [vmem:[%s11144_s3 + $0x8] sm:$0xff]  ;;  %vm9574_vm1 = vmmov 0   ;;  %vm1872_vm2 = vcmask 64512   ;;  %vm3931_vm3 = vcmask 523264  }
   0x4   :  { %8647 = vmatprep.subr.mxu1 %v9573_v14  ;;  %8637 = vmatpush3.msra.mxu0 %v93_v15  ;;  %v96_v18 = vld [vmem:[%s11144_s3 + $0x30] sm:$0xff]  ;;  %v95_v20 = vld [vmem:[%s11144_s3 + $0x28] sm:$0xff]  ;;  %v90_v21 = vld [vmem:[%s11144_s3] sm:$0xff] }
   0x5   :  { %8648 = vmatpush3.msra.mxu1 %v97_v16  ;;  %8638 = vmatprep.subr.mxu0 %v9573_v14  ;;  %v94_v22 = vld [vmem:[%s11144_s3 + $0x20] sm:$0xff]  ;;  %v101_v35 = vld [vmem:[%s11144_s3 + $0x58] sm:$0xff]  ;;  %v100_v37 = vld [vmem:[%s11144_s3 + $0x50] sm:$0xff] }
   0x6   :  { %8649 = vmatprep.subr.mxu1 %v9573_v14  ;;  %8639 = vmatpush3.msra.mxu0 %v92_v17  ;;  %v8011_v30 = vld [vmem:[%s11142_s1] ss:$0 sm:$0xff]  ;;  %v105_v36 = vld [vmem:[%s11144_s3 + $0x78] sm:$0xff]  ;;  %v104_v38 = vld [vmem:[%s11144_s3 + $0x70] sm:$0xff] }
   0x7   :  { %51 = vadd.xlane.f32.xlu0 %v50_v3  ;;  %8650 = vmatpush3.msra.mxu1 %v96_v18  ;;  %v8012_v32 = vld [vmem:[%s11143_s2] ss:$0 sm:$0xff]  ;;  %v99_v39 = vld [vmem:[%s11144_s3 + $0x48] sm:$0xff]  ;;  %v109_v44 = vld [vmem:[%s11144_s3 + $0x98] sm:$0xff] }
   0x8   :  { %8640 = vmatprep.subr.mxu0 %v9573_v14  ;;  %8651 = vmatprep.subr.mxu1 %v9573_v14  ;;  %v103_v40 = vld [vmem:[%s11144_s3 + $0x68] sm:$0xff]  ;;  %v98_v41 = vld [vmem:[%s11144_s3 + $0x40] sm:$0xff]  ;;  %v113_v45 = vld [vmem:[%s11144_s3 + $0xb8] sm:$0xff] }
   0x9   :  { %8641 = vmatpush3.msra.mxu0 %v91_v19  ;;  %8652 = vmatpush3.msra.mxu1 %v95_v20  ;;  %v102_v42 = vld [vmem:[%s11144_s3 + $0x60] sm:$0xff]  ;;  %v108_v47 = vld [vmem:[%s11144_s3 + $0x90] sm:$0xff]  ;;  %v107_v49 = vld [vmem:[%s11144_s3 + $0x88] sm:$0xff] }
   0xa   :  { %8642 = vmatprep.subr.mxu0 %v9573_v14  ;;  %8653 = vmatprep.subr.mxu1 %v9573_v14  ;;  %v112_v48 = vld [vmem:[%s11144_s3 + $0xb0] sm:$0xff]  ;;  %v111_v50 = vld [vmem:[%s11144_s3 + $0xa8] sm:$0xff]  ;;  %v106_v52 = vld [vmem:[%s11144_s3 + $0x80] sm:$0xff] }
   0xb   :  { %8643 = vmatpush3.msra.mxu0 %v90_v21  ;;  %8654 = vmatpush3.msra.mxu1 %v94_v22  ;;  %v110_v53 = vld [vmem:[%s11144_s3 + $0xa0] sm:$0xff]  ;;  %v117_v55 = vld [vmem:[%s11144_s3 + $0xd8] sm:$0xff]  ;;  %v116_v57 = vld [vmem:[%s11144_s3 + $0xd0] sm:$0xff] }
   0xc   :  { %8644 = vmatprep.mubr.msk.f32.mxu0 %vm9574_vm1, %v9573_v14  ;;  %8655 = vmatprep.mubr.msk.f32.mxu1 %vm9574_vm1, %v9573_v14  ;;  %v121_v56 = vld [vmem:[%s11144_s3 + $0xf8] sm:$0xff]  ;;  %v120_v58 = vld [vmem:[%s11144_s3 + $0xf0] sm:$0xff]  ;;  %v115_v59 = vld [vmem:[%s11144_s3 + $0xc8] sm:$0xff] }
   0xd   :  { %8658 = vmatprep.subr.mxu0 %v9573_v14  ;;  %8669 = vmatprep.subr.mxu1 %v9573_v14  ;;  %v119_v60 = vld [vmem:[%s11144_s3 + $0xe8] sm:$0xff]  ;;  %v114_v61 = vld [vmem:[%s11144_s3 + $0xc0] sm:$0xff]  ;;  %v125_v63 = vld [vmem:[%s11144_s3 + $0x118] sm:$0xff] }
   0xe   :  { %v118_v62 = vld [vmem:[%s11144_s3 + $0xe0] sm:$0xff]  ;;  %v128_v2 = vld [vmem:[%s11144_s3 + $0x130] sm:$0xff]  ;;  %v123_v3 = vld [vmem:[%s11144_s3 + $0x108] sm:$0xff] }
   0xf   :  { %v134_v15 = vld [vmem:[%s11144_s3 + $0x160] sm:$0xff]  ;;  %v141_v16 = vld [vmem:[%s11144_s3 + $0x198] sm:$0xff]  ;;  %v140_v18 = vld [vmem:[%s11144_s3 + $0x190] sm:$0xff] }
  0x10   :  { %v145_v17 = vld [vmem:[%s11144_s3 + $0x1b8] sm:$0xff]  ;;  %v144_v19 = vld [vmem:[%s11144_s3 + $0x1b0] sm:$0xff]  ;;  %v139_v20 = vld [vmem:[%s11144_s3 + $0x188] sm:$0xff] }
  0x11   :  { %v143_v21 = vld [vmem:[%s11144_s3 + $0x1a8] sm:$0xff]  ;;  %v138_v22 = vld [vmem:[%s11144_s3 + $0x180] sm:$0xff] }
  0x8c   :  { %v49_v4 = vpop.xlane.xlu0 %48 }
  0x8d   :  { %v54_v5 = vmul.f32 0.03125, %v49_v4  ;;  %v127_v4 = vld [vmem:[%s11144_s3 + $0x128] sm:$0xff] }
  0x8f   :  { %v56_v6 = vsub.f32 %v42_v0, %v54_v5  ;;  %v129_v0 = vld [vmem:[%s11144_s3 + $0x138] sm:$0xff]  ;;  %v122_v5 = vld [vmem:[%s11144_s3 + $0x100] sm:$0xff] }
  0x90   :  { %v52_v7 = vpop.xlane.xlu0 %51 }
  0x91   :  { %v55_v8 = vmul.f32 0.03125, %v52_v7  ;;  %v58_v9 = vmul.f32 %v56_v6, %v56_v6  ;;  %v133_v7 = vld [vmem:[%s11144_s3 + $0x158] sm:$0xff] }
  0x93   :  { %v9651_v10 = vsub.f32 %v43_v1, %v55_v8  ;;  %v60_v11 = vsel %vm46_vm0, %v58_v9, 0.0  ;;  %v124_v1 = vld [vmem:[%s11144_s3 + $0x110] sm:$0xff]  ;;  %v137_v8 = vld [vmem:[%s11144_s3 + $0x178] sm:$0xff] }
  0x94   :  { %61 = vadd.xlane.f32.xlu1 %v60_v11  ;;  %v132_v9 = vld [vmem:[%s11144_s3 + $0x150] sm:$0xff]  ;;  %v131_v11 = vld [vmem:[%s11144_s3 + $0x148] sm:$0xff] }
  0x95   :  { %v59_v12 = vmul.f32 %v9651_v10, %v9651_v10 }
  0x97   :  { %v63_v13 = vsel %vm46_vm0, %v59_v12, 0.0  ;;  %v135_v12 = vld [vmem:[%s11144_s3 + $0x168] sm:$0xff] }
  0x98   :  { %64 = vadd.xlane.f32.xlu1 %v63_v13  ;;  %v130_v13 = vld [vmem:[%s11144_s3 + $0x140] sm:$0xff] }
 0x11d   :  { %v62_v23 = vpop.xlane.xlu1 %61 }
 0x11e   :  { %v66_v24 = vmul.f32 0.03125, %v62_v23  ;;  %v142_v23 = vld [vmem:[%s11144_s3 + $0x1a0] sm:$0xff] }
 0x120   :  { %v68_v25 = vadd.f32 1e-05, %v66_v24  ;;  %v149_v24 = vld [vmem:[%s11144_s3 + $0x1d8] sm:$0xff] }
 0x121   :  { %v65_v26 = vpop.xlane.xlu1 %64 }
 0x122   :  { %9469 = vrsqrt.f32 %v68_v25  ;;  %v67_v27 = vmul.f32 0.03125, %v65_v26  ;;  %v153_v25 = vld [vmem:[%s11144_s3 + $0x1f8] sm:$0xff]  ;;  %v148_v26 = vld [vmem:[%s11144_s3 + $0x1d0] sm:$0xff] }
 0x124   :  { %v69_v28 = vadd.f32 1e-05, %v67_v27  ;;  %v152_v27 = vld [vmem:[%s11144_s3 + $0x1f0] sm:$0xff] }
 0x126   :  { %9471 = vrsqrt.f32 %v69_v28  ;;  %v147_v28 = vld [vmem:[%s11144_s3 + $0x1c8] sm:$0xff] }
 0x12f   :  { %v9470_v29 = vpop.eup %9469 }
 0x130   :  { %v72_v31 = vmul.f32 %v9470_v29, %v56_v6  ;;  %v126_v6 = vld [vmem:[%s11144_s3 + $0x120] sm:$0xff]  ;;  %v151_v29 = vld [vmem:[%s11144_s3 + $0x1e8] sm:$0xff] }
 0x132   :  { %v80_v33 = vmul.f32 %v8011_v30, %v72_v31  ;;  %v150_v31 = vld [vmem:[%s11144_s3 + $0x1e0] sm:$0xff] }
 0x133   :  { %v9472_v43 = vpop.eup %9471 }
 0x134   :  { %v9701_v34 = vadd.f32 %v8012_v32, %v80_v33  ;;  %v73_v46 = vmul.f32 %v9472_v43, %v9651_v10  ;;  %v136_v10 = vld [vmem:[%s11144_s3 + $0x170] sm:$0xff]  ;;  %v161_v33 = vld [vmem:[%s11144_s3 + $0x238] sm:$0xff] }
 0x135   :  { %v164_v43 = vld [vmem:[%s11144_s3 + $0x250] sm:$0xff] }
 0x136   :  { %8645 = vmatmul.mubr.msk.f32.vlgmr.msra.gmra.mxu0 %vm46_vm0, %v9701_v34  ;;  %8656 = vmatmul.mubr.msk.f32.vlgmr.msra.gmra.mxu1 %vm46_vm0, %v9701_v34  ;;  %v81_v51 = vmul.f32 %v8011_v30, %v73_v46  ;;  %v146_v30 = vld [vmem:[%s11144_s3 + $0x1c0] sm:$0xff]  ;;  %v167_v46 = vld [vmem:[%s11144_s3 + $0x268] sm:$0xff] }
 0x137   :  { %8659 = vmatpush3.msra.mxu0 %v101_v35  ;;  %8670 = vmatpush3.msra.mxu1 %v105_v36  ;;  %v156_v35 = vld [vmem:[%s11144_s3 + $0x210] sm:$0xff] }
 0x138   :  { %8660 = vmatprep.subr.mxu0 %v9573_v14  ;;  %8671 = vmatprep.subr.mxu1 %v9573_v14  ;;  %v9778_v54 = vadd.f32 %v8012_v32, %v81_v51  ;;  %v157_v32 = vld [vmem:[%s11144_s3 + $0x218] sm:$0xff]  ;;  %v160_v36 = vld [vmem:[%s11144_s3 + $0x230] sm:$0xff] }
 0x139   :  { %8661 = vmatpush3.msra.mxu0 %v100_v37  ;;  %8672 = vmatpush3.msra.mxu1 %v104_v38  ;;  %v155_v37 = vld [vmem:[%s11144_s3 + $0x208] sm:$0xff]  ;;  %v172_v51 = vld [vmem:[%s11144_s3 + $0x290] sm:$0xff] }
 0x13a   :  { %8662 = vmatprep.subr.mxu0 %v9573_v14  ;;  %8673 = vmatprep.subr.mxu1 %v9573_v14  ;;  %v159_v38 = vld [vmem:[%s11144_s3 + $0x228] sm:$0xff] }
 0x13b   :  { %8663 = vmatpush3.msra.mxu0 %v99_v39  ;;  %8674 = vmatpush3.msra.mxu1 %v103_v40  ;;  %v154_v39 = vld [vmem:[%s11144_s3 + $0x200] sm:$0xff] }
 0x13c   :  { %8664 = vmatprep.subr.mxu0 %v9573_v14  ;;  %8675 = vmatprep.subr.mxu1 %v9573_v14  ;;  %v158_v40 = vld [vmem:[%s11144_s3 + $0x220] sm:$0xff] }
 0x13d   :  { %8665 = vmatpush3.msra.mxu0 %v98_v41  ;;  %8666 = vmatprep.mubr.msk.f32.mxu0 %vm9574_vm1, %v9573_v14  ;;  %v165_v41 = vld [vmem:[%s11144_s3 + $0x258] sm:$0xff] }
 0x13e   :  { %8676 = vmatpush3.msra.mxu1 %v102_v42  ;;  %8677 = vmatprep.mubr.msk.f32.mxu1 %vm9574_vm1, %v9573_v14  ;;  %v169_v42 = vld [vmem:[%s11144_s3 + $0x278] sm:$0xff] }
 0x13f   :  { %8667 = vmatmul.mubr.msk.f32.vlgmr.msra.gmra.mxu0 %vm46_vm0, %v9701_v34  ;;  %8678 = vmatmul.mubr.msk.f32.vlgmr.msra.gmra.mxu1 %vm46_vm0, %v9701_v34 }
 0x140   :  { %8680 = vmatprep.subr.mxu0 %v9573_v14  ;;  %8691 = vmatprep.subr.mxu1 %v9573_v14 }
 0x141   :  { %8681 = vmatpush3.msra.mxu0 %v109_v44  ;;  %8692 = vmatpush3.msra.mxu1 %v113_v45  ;;  %v168_v44 = vld [vmem:[%s11144_s3 + $0x270] sm:$0xff]  ;;  %v163_v45 = vld [vmem:[%s11144_s3 + $0x248] sm:$0xff] }
 0x142   :  { %8682 = vmatprep.subr.mxu0 %v9573_v14  ;;  %8693 = vmatprep.subr.mxu1 %v9573_v14 }
 0x143   :  { %8683 = vmatpush3.msra.mxu0 %v108_v47  ;;  %8694 = vmatpush3.msra.mxu1 %v112_v48  ;;  %v162_v47 = vld [vmem:[%s11144_s3 + $0x240] sm:$0xff] }
 0x144   :  { %8684 = vmatprep.subr.mxu0 %v9573_v14  ;;  %8695 = vmatprep.subr.mxu1 %v9573_v14  ;;  %v166_v48 = vld [vmem:[%s11144_s3 + $0x260] sm:$0xff] }
 0x145   :  { %8685 = vmatpush3.msra.mxu0 %v107_v49  ;;  %8696 = vmatpush3.msra.mxu1 %v111_v50  ;;  %v173_v49 = vld [vmem:[%s11144_s3 + $0x298] sm:$0xff] }
 0x146   :  { %8686 = vmatprep.subr.mxu0 %v9573_v14  ;;  %8697 = vmatprep.subr.mxu1 %v9573_v14  ;;  %v177_v50 = vld [vmem:[%s11144_s3 + $0x2b8] sm:$0xff] }
 0x147   :  { %8687 = vmatpush3.msra.mxu0 %v106_v52  ;;  %8688 = vmatprep.mubr.msk.f32.mxu0 %vm9574_vm1, %v9573_v14  ;;  %v176_v52 = vld [vmem:[%s11144_s3 + $0x2b0] sm:$0xff] }
 0x148   :  { %8698 = vmatpush3.msra.mxu1 %v110_v53  ;;  %8699 = vmatprep.mubr.msk.f32.mxu1 %vm9574_vm1, %v9573_v14  ;;  %v175_v53 = vld [vmem:[%s11144_s3 + $0x2a8] sm:$0xff] }
 0x149   :  { %8689 = vmatmul.mubr.msk.f32.vlgmr.msra.gmra.mxu0 %vm46_vm0, %v9778_v54  ;;  %8700 = vmatmul.mubr.msk.f32.vlgmr.msra.gmra.mxu1 %vm46_vm0, %v9778_v54 }
 0x14a   :  { %8702 = vmatprep.subr.mxu0 %v9573_v14  ;;  %8713 = vmatprep.subr.mxu1 %v9573_v14 }
 0x14b   :  { %8703 = vmatpush3.msra.mxu0 %v117_v55  ;;  %8714 = vmatpush3.msra.mxu1 %v121_v56  ;;  %v170_v55 = vld [vmem:[%s11144_s3 + $0x280] sm:$0xff] }
 0x14c   :  { %8704 = vmatprep.subr.mxu0 %v9573_v14  ;;  %8715 = vmatprep.subr.mxu1 %v9573_v14  ;;  %v174_v56 = vld [vmem:[%s11144_s3 + $0x2a0] sm:$0xff] }
 0x14d   :  { %8705 = vmatpush3.msra.mxu0 %v116_v57  ;;  %8716 = vmatpush3.msra.mxu1 %v120_v58  ;;  %v181_v57 = vld [vmem:[%s11144_s3 + $0x2d8] sm:$0xff] }
 0x14e   :  { %8706 = vmatprep.subr.mxu0 %v9573_v14  ;;  %8717 = vmatprep.subr.mxu1 %v9573_v14  ;;  %v185_v58 = vld [vmem:[%s11144_s3 + $0x2f8] sm:$0xff] }
 0x14f   :  { %8707 = vmatpush3.msra.mxu0 %v115_v59  ;;  %8718 = vmatpush3.msra.mxu1 %v119_v60  ;;  %v180_v59 = vld [vmem:[%s11144_s3 + $0x2d0] sm:$0xff] }
 0x150   :  { %8708 = vmatprep.subr.mxu0 %v9573_v14  ;;  %8719 = vmatprep.subr.mxu1 %v9573_v14  ;;  %v184_v60 = vld [vmem:[%s11144_s3 + $0x2f0] sm:$0xff] }
 0x151   :  { %8709 = vmatpush3.msra.mxu0 %v114_v61  ;;  %8710 = vmatprep.mubr.msk.f32.mxu0 %vm9574_vm1, %v9573_v14  ;;  %v179_v61 = vld [vmem:[%s11144_s3 + $0x2c8] sm:$0xff] }
 0x152   :  { %8720 = vmatpush3.msra.mxu1 %v118_v62  ;;  %8721 = vmatprep.mubr.msk.f32.mxu1 %vm9574_vm1, %v9573_v14  ;;  %v183_v62 = vld [vmem:[%s11144_s3 + $0x2e8] sm:$0xff] }
 0x153   :  { %8711 = vmatmul.mubr.msk.f32.vlgmr.msra.gmra.mxu0 %vm46_vm0, %v9778_v54  ;;  %8722 = vmatmul.mubr.msk.f32.vlgmr.msra.gmra.mxu1 %vm46_vm0, %v9778_v54 }
 0x154   :  { %8724 = vmatprep.subr.mxu0 %v9573_v14  ;;  %8735 = vmatprep.subr.mxu1 %v9573_v14 }
 0x155   :  { %8725 = vmatpush3.msra.mxu0 %v125_v63  ;;  %8736 = vmatpush3.msra.mxu1 %v129_v0  ;;  %v178_v63 = vld [vmem:[%s11144_s3 + $0x2c0] sm:$0xff] }
 0x156   :  { %8726 = vmatprep.subr.mxu0 %v9573_v14  ;;  %8737 = vmatprep.subr.mxu1 %v9573_v14  ;;  %v182_v0 = vld [vmem:[%s11144_s3 + $0x2e0] sm:$0xff] }
 0x157   :  { %8727 = vmatpush3.msra.mxu0 %v124_v1  ;;  %8738 = vmatpush3.msra.mxu1 %v128_v2 }
 0x158   :  { %8728 = vmatprep.subr.mxu0 %v9573_v14  ;;  %8739 = vmatprep.subr.mxu1 %v9573_v14 }
 0x159   :  { %8729 = vmatpush3.msra.mxu0 %v123_v3  ;;  %8740 = vmatpush3.msra.mxu1 %v127_v4 }
 0x15a   :  { %8730 = vmatprep.subr.mxu0 %v9573_v14  ;;  %8741 = vmatprep.subr.mxu1 %v9573_v14 }
 0x15b   :  { %8731 = vmatpush3.msra.mxu0 %v122_v5  ;;  %8732 = vmatprep.mubr.msk.f32.mxu0 %vm9574_vm1, %v9573_v14 }
 0x15c   :  { %8742 = vmatpush3.msra.mxu1 %v126_v6  ;;  %8743 = vmatprep.mubr.msk.f32.mxu1 %vm9574_vm1, %v9573_v14 }
 0x15d   :  { %8733 = vmatmul.mubr.msk.f32.vlgmr.msra.gmra.mxu0 %vm46_vm0, %v9701_v34  ;;  %8744 = vmatmul.mubr.msk.f32.vlgmr.msra.gmra.mxu1 %vm46_vm0, %v9701_v34 }
 0x15e   :  { %8746 = vmatprep.subr.mxu0 %v9573_v14  ;;  %8757 = vmatprep.subr.mxu1 %v9573_v14 }
 0x15f   :  { %8747 = vmatpush3.msra.mxu0 %v133_v7  ;;  %8758 = vmatpush3.msra.mxu1 %v137_v8 }
 0x160   :  { %8748 = vmatprep.subr.mxu0 %v9573_v14  ;;  %8759 = vmatprep.subr.mxu1 %v9573_v14 }
 0x161   :  { %8749 = vmatpush3.msra.mxu0 %v132_v9  ;;  %8760 = vmatpush3.msra.mxu1 %v136_v10 }
 0x162   :  { %8750 = vmatprep.subr.mxu0 %v9573_v14  ;;  %8761 = vmatprep.subr.mxu1 %v9573_v14 }
 0x163   :  { %8751 = vmatpush3.msra.mxu0 %v131_v11  ;;  %8762 = vmatpush3.msra.mxu1 %v135_v12 }
 0x164   :  { %8752 = vmatprep.subr.mxu0 %v9573_v14  ;;  %8763 = vmatprep.subr.mxu1 %v9573_v14 }
 0x165   :  { %8753 = vmatpush3.msra.mxu0 %v130_v13  ;;  %8754 = vmatprep.mubr.msk.f32.mxu0 %vm9574_vm1, %v9573_v14 }
 0x166   :  { %8764 = vmatpush3.msra.mxu1 %v134_v15  ;;  %8765 = vmatprep.mubr.msk.f32.mxu1 %vm9574_vm1, %v9573_v14 }
 0x167   :  { %8755 = vmatmul.mubr.msk.f32.vlgmr.msra.gmra.mxu0 %vm46_vm0, %v9701_v34  ;;  %8766 = vmatmul.mubr.msk.f32.vlgmr.msra.gmra.mxu1 %vm46_vm0, %v9701_v34 }
 0x168   :  { %8768 = vmatprep.subr.mxu0 %v9573_v14  ;;  %8779 = vmatprep.subr.mxu1 %v9573_v14 }
 0x169   :  { %8769 = vmatpush3.msra.mxu0 %v141_v16  ;;  %8780 = vmatpush3.msra.mxu1 %v145_v17 }
 0x16a   :  { %8770 = vmatprep.subr.mxu0 %v9573_v14  ;;  %8781 = vmatprep.subr.mxu1 %v9573_v14 }
 0x16b   :  { %8771 = vmatpush3.msra.mxu0 %v140_v18  ;;  %8782 = vmatpush3.msra.mxu1 %v144_v19 }
 0x16c   :  { %8772 = vmatprep.subr.mxu0 %v9573_v14  ;;  %8783 = vmatprep.subr.mxu1 %v9573_v14 }
 0x16d   :  { %8773 = vmatpush3.msra.mxu0 %v139_v20  ;;  %8784 = vmatpush3.msra.mxu1 %v143_v21 }
 0x16e   :  { %8774 = vmatprep.subr.mxu0 %v9573_v14  ;;  %8785 = vmatprep.subr.mxu1 %v9573_v14 }
 0x16f   :  { %8775 = vmatpush3.msra.mxu0 %v138_v22  ;;  %8776 = vmatprep.mubr.msk.f32.mxu0 %vm9574_vm1, %v9573_v14 }
 0x170   :  { %8786 = vmatpush3.msra.mxu1 %v142_v23  ;;  %8787 = vmatprep.mubr.msk.f32.mxu1 %vm9574_vm1, %v9573_v14 }
 0x171   :  { %8777 = vmatmul.mubr.msk.f32.vlgmr.msra.gmra.mxu0 %vm46_vm0, %v9778_v54  ;;  %8788 = vmatmul.mubr.msk.f32.vlgmr.msra.gmra.mxu1 %vm46_vm0, %v9778_v54 }
 0x172   :  { %8790 = vmatprep.subr.mxu0 %v9573_v14  ;;  %8801 = vmatprep.subr.mxu1 %v9573_v14 }
 0x173   :  { %8791 = vmatpush3.msra.mxu0 %v149_v24  ;;  %8802 = vmatpush3.msra.mxu1 %v153_v25 }
 0x174   :  { %8792 = vmatprep.subr.mxu0 %v9573_v14  ;;  %8803 = vmatprep.subr.mxu1 %v9573_v14 }
 0x175   :  { %8793 = vmatpush3.msra.mxu0 %v148_v26  ;;  %8804 = vmatpush3.msra.mxu1 %v152_v27 }
 0x176   :  { %8794 = vmatprep.subr.mxu0 %v9573_v14  ;;  %8805 = vmatprep.subr.mxu1 %v9573_v14 }
 0x177   :  { %8795 = vmatpush3.msra.mxu0 %v147_v28  ;;  %8806 = vmatpush3.msra.mxu1 %v151_v29 }
 0x178   :  { %8796 = vmatprep.subr.mxu0 %v9573_v14  ;;  %8807 = vmatprep.subr.mxu1 %v9573_v14 }
 0x179   :  { %8797 = vmatpush3.msra.mxu0 %v146_v30  ;;  %8798 = vmatprep.mubr.msk.f32.mxu0 %vm9574_vm1, %v9573_v14 }
 0x17a   :  { %8808 = vmatpush3.msra.mxu1 %v150_v31  ;;  %8809 = vmatprep.mubr.msk.f32.mxu1 %vm9574_vm1, %v9573_v14 }
 0x17b   :  { %8799 = vmatmul.mubr.msk.f32.vlgmr.msra.gmra.mxu0 %vm46_vm0, %v9778_v54  ;;  %8810 = vmatmul.mubr.msk.f32.vlgmr.msra.gmra.mxu1 %vm46_vm0, %v9778_v54 }
 0x17c   :  { %8812 = vmatprep.subr.mxu0 %v9573_v14  ;;  %8823 = vmatprep.subr.mxu1 %v9573_v14 }
 0x17d   :  { %8813 = vmatpush3.msra.mxu0 %v157_v32  ;;  %8824 = vmatpush3.msra.mxu1 %v161_v33 }
 0x17e   :  { %8814 = vmatprep.subr.mxu0 %v9573_v14  ;;  %8825 = vmatprep.subr.mxu1 %v9573_v14 }
 0x17f   :  { %8815 = vmatpush3.msra.mxu0 %v156_v35  ;;  %8826 = vmatpush3.msra.mxu1 %v160_v36 }
 0x180   :  { %8816 = vmatprep.subr.mxu0 %v9573_v14  ;;  %8827 = vmatprep.subr.mxu1 %v9573_v14 }
 0x181   :  { %8817 = vmatpush3.msra.mxu0 %v155_v37  ;;  %8828 = vmatpush3.msra.mxu1 %v159_v38 }
 0x182   :  { %8818 = vmatprep.subr.mxu0 %v9573_v14  ;;  %8829 = vmatprep.subr.mxu1 %v9573_v14 }
 0x183   :  { %8819 = vmatpush3.msra.mxu0 %v154_v39  ;;  %8820 = vmatprep.mubr.msk.f32.mxu0 %vm9574_vm1, %v9573_v14 }
 0x184   :  { %8830 = vmatpush3.msra.mxu1 %v158_v40  ;;  %8831 = vmatprep.mubr.msk.f32.mxu1 %vm9574_vm1, %v9573_v14 }
 0x185   :  { %8821 = vmatmul.mubr.msk.f32.vlgmr.msra.gmra.mxu0 %vm46_vm0, %v9701_v34  ;;  %8832 = vmatmul.mubr.msk.f32.vlgmr.msra.gmra.mxu1 %vm46_vm0, %v9701_v34 }
 0x186   :  { %8834 = vmatprep.subr.mxu0 %v9573_v14  ;;  %8845 = vmatprep.subr.mxu1 %v9573_v14 }
 0x187   :  { %8835 = vmatpush3.msra.mxu0 %v165_v41  ;;  %8846 = vmatpush3.msra.mxu1 %v169_v42 }
 0x188   :  { %8836 = vmatprep.subr.mxu0 %v9573_v14  ;;  %8847 = vmatprep.subr.mxu1 %v9573_v14 }
 0x189   :  { %8837 = vmatpush3.msra.mxu0 %v164_v43  ;;  %8848 = vmatpush3.msra.mxu1 %v168_v44 }
 0x18a   :  { %8838 = vmatprep.subr.mxu0 %v9573_v14  ;;  %8849 = vmatprep.subr.mxu1 %v9573_v14 }
 0x18b   :  { %8839 = vmatpush3.msra.mxu0 %v163_v45  ;;  %8850 = vmatpush3.msra.mxu1 %v167_v46 }
 0x18c   :  { %8840 = vmatprep.subr.mxu0 %v9573_v14  ;;  %8851 = vmatprep.subr.mxu1 %v9573_v14 }
 0x18d   :  { %8841 = vmatpush3.msra.mxu0 %v162_v47  ;;  %8842 = vmatprep.mubr.msk.f32.mxu0 %vm9574_vm1, %v9573_v14 }
 0x18e   :  { %8852 = vmatpush3.msra.mxu1 %v166_v48  ;;  %8853 = vmatprep.mubr.msk.f32.mxu1 %vm9574_vm1, %v9573_v14 }
 0x18f   :  { %8843 = vmatmul.mubr.msk.f32.vlgmr.msra.gmra.mxu0 %vm46_vm0, %v9701_v34  ;;  %8854 = vmatmul.mubr.msk.f32.vlgmr.msra.gmra.mxu1 %vm46_vm0, %v9701_v34  ;;  %v171_v34 = vld [vmem:[%s11144_s3 + $0x288] sm:$0xff] }
 0x190   :  { %8856 = vmatprep.subr.mxu0 %v9573_v14  ;;  %8867 = vmatprep.subr.mxu1 %v9573_v14 }
 0x191   :  { %8857 = vmatpush3.msra.mxu0 %v173_v49  ;;  %8868 = vmatpush3.msra.mxu1 %v177_v50 }
 0x192   :  { %8858 = vmatprep.subr.mxu0 %v9573_v14  ;;  %8869 = vmatprep.subr.mxu1 %v9573_v14 }
 0x193   :  { %8859 = vmatpush3.msra.mxu0 %v172_v51  ;;  %8870 = vmatpush3.msra.mxu1 %v176_v52 }
 0x194   :  { %8860 = vmatprep.subr.mxu0 %v9573_v14  ;;  %8871 = vmatprep.subr.mxu1 %v9573_v14 }
 0x195   :  { %8861 = vmatpush3.msra.mxu0 %v171_v34  ;;  %8872 = vmatpush3.msra.mxu1 %v175_v53 }
 0x196   :  { %8862 = vmatprep.subr.mxu0 %v9573_v14  ;;  %8873 = vmatprep.subr.mxu1 %v9573_v14 }
 0x197   :  { %8863 = vmatpush3.msra.mxu0 %v170_v55  ;;  %8864 = vmatprep.mubr.msk.f32.mxu0 %vm9574_vm1, %v9573_v14 }
 0x198   :  { %8874 = vmatpush3.msra.mxu1 %v174_v56  ;;  %8875 = vmatprep.mubr.msk.f32.mxu1 %vm9574_vm1, %v9573_v14 }
 0x199   :  { %8865 = vmatmul.mubr.msk.f32.vlgmr.msra.gmra.mxu0 %vm46_vm0, %v9778_v54  ;;  %8876 = vmatmul.mubr.msk.f32.vlgmr.msra.gmra.mxu1 %vm46_vm0, %v9778_v54 }
 0x19a   :  { %8878 = vmatprep.subr.mxu0 %v9573_v14  ;;  %8889 = vmatprep.subr.mxu1 %v9573_v14 }
 0x19b   :  { %8879 = vmatpush3.msra.mxu0 %v181_v57  ;;  %8890 = vmatpush3.msra.mxu1 %v185_v58 }
 0x19c   :  { %8880 = vmatprep.subr.mxu0 %v9573_v14  ;;  %8891 = vmatprep.subr.mxu1 %v9573_v14 }
 0x19d   :  { %8881 = vmatpush3.msra.mxu0 %v180_v59  ;;  %8892 = vmatpush3.msra.mxu1 %v184_v60 }
 0x19e   :  { %8882 = vmatprep.subr.mxu0 %v9573_v14  ;;  %8893 = vmatprep.subr.mxu1 %v9573_v14 }
 0x19f   :  { %8883 = vmatpush3.msra.mxu0 %v179_v61  ;;  %8894 = vmatpush3.msra.mxu1 %v183_v62 }
 0x1a0   :  { %8884 = vmatprep.subr.mxu0 %v9573_v14  ;;  %8895 = vmatprep.subr.mxu1 %v9573_v14 }
 0x1a1   :  { %8885 = vmatpush3.msra.mxu0 %v178_v63  ;;  %8886 = vmatprep.mubr.msk.f32.mxu0 %vm9574_vm1, %v9573_v14 }
 0x1a2   :  { %8896 = vmatpush3.msra.mxu1 %v182_v0  ;;  %8897 = vmatprep.mubr.msk.f32.mxu1 %vm9574_vm1, %v9573_v14 }
 0x1a3   :  { %8887 = vmatmul.mubr.msk.f32.vlgmr.msra.gmra.mxu0 %vm46_vm0, %v9778_v54  ;;  %8898 = vmatmul.mubr.msk.f32.vlgmr.msra.gmra.mxu1 %vm46_vm0, %v9778_v54 }
 0x1a4   :  { %8900 = vmatprep.subr.mxu0 %v9573_v14  ;;  %8902 = vmatprep.mubr.msk.f32.mxu0 %vm9574_vm1, %v9573_v14 }
 0x1a5   :  { %8915 = vmatprep.subr.mxu1 %v9573_v14  ;;  %8917 = vmatprep.mubr.msk.f32.mxu1 %vm9574_vm1, %v9573_v14 }
 0x1f6   :  { %v255_v1 = vpop.f32.mrf.mxu0  ;;  %v325_v2 = vpop.f32.mrf.mxu1 }
 0x1f8   :  { %v8646_v3 = vpop.f32.mrf.mxu0  ;;  %v8657_v4 = vpop.f32.mrf.mxu1 }
 0x1ff   :  { %v395_v5 = vpop.f32.mrf.mxu0  ;;  %v465_v6 = vpop.f32.mrf.mxu1 }
 0x201   :  { %v8668_v7 = vpop.f32.mrf.mxu0  ;;  %v8679_v8 = vpop.f32.mrf.mxu1 }
 0x209   :  { %v538_v9 = vpop.f32.mrf.mxu0  ;;  %v608_v54 = vpop.f32.mrf.mxu1 }
 0x20b   :  { %v8690_v10 = vpop.f32.mrf.mxu0  ;;  %v8701_v11 = vpop.f32.mrf.mxu1 }
 0x213   :  { %v678_v12 = vpop.f32.mrf.mxu0  ;;  %v748_v13 = vpop.f32.mrf.mxu1 }
 0x215   :  { %v8712_v15 = vpop.f32.mrf.mxu0  ;;  %v8723_v16 = vpop.f32.mrf.mxu1 }
 0x21d   :  { %v818_v17 = vpop.f32.mrf.mxu0  ;;  %v888_v18 = vpop.f32.mrf.mxu1 }
 0x21e   :  { %8901 = vmatpush3.xpose.msk.msra.mxu0 %vm1872_vm2, %v818_v17 }
 0x21f   :  { %v8734_v19 = vpop.f32.mrf.mxu0  ;;  %v8745_v20 = vpop.f32.mrf.mxu1  ;;  %8905 = vmatprep.subr.mxu0 %v9573_v14 }
 0x221   :  { %8903 = vmatmul.mubr.msk.f32.vlgmr.msra.gmra.mxu0 %vm1872_vm2, %v255_v1 }
 0x222   :  { %8906 = vmatpush3.xpose.msk.msra.mxu0 %vm1872_vm2, %v888_v18  ;;  %8907 = vmatprep.mubr.msk.f32.mxu0 %vm9574_vm1, %v9573_v14 }
 0x223   :  { %8910 = vmatprep.subr.mxu0 %v9573_v14 }
 0x225   :  { %8908 = vmatmul.mubr.msk.f32.vlgmr.msra.gmra.mxu0 %vm1872_vm2, %v325_v2 }
 0x226   :  { %8912 = vmatprep.mubr.msk.f32.mxu0 %vm9574_vm1, %v9573_v14 }
 0x227   :  { %v958_v21 = vpop.f32.mrf.mxu0  ;;  %v1028_v22 = vpop.f32.mrf.mxu1 }
 0x228   :  { %8911 = vmatpush3.xpose.msk.msra.mxu0 %vm1872_vm2, %v958_v21  ;;  %8916 = vmatpush3.xpose.msk.msra.mxu1 %vm1872_vm2, %v1028_v22 }
 0x229   :  { %v8756_v23 = vpop.f32.mrf.mxu0  ;;  %v8767_v24 = vpop.f32.mrf.mxu1  ;;  %8920 = vmatprep.subr.mxu0 %v9573_v14  ;;  %8925 = vmatprep.subr.mxu1 %v9573_v14 }
 0x22b   :  { %8913 = vmatmul.mubr.msk.f32.vlgmr.msra.gmra.mxu0 %vm1872_vm2, %v395_v5  ;;  %8918 = vmatmul.mubr.msk.f32.vlgmr.msra.gmra.mxu1 %vm1872_vm2, %v465_v6 }
 0x22c   :  { %8922 = vmatprep.mubr.msk.f32.mxu0 %vm9574_vm1, %v9573_v14  ;;  %8927 = vmatprep.mubr.msk.f32.mxu1 %vm9574_vm1, %v9573_v14 }
 0x231   :  { %v1098_v25 = vpop.f32.mrf.mxu0  ;;  %v1168_v26 = vpop.f32.mrf.mxu1 }
 0x232   :  { %8921 = vmatpush3.xpose.msk.msra.mxu0 %vm1872_vm2, %v1098_v25  ;;  %8926 = vmatpush3.xpose.msk.msra.mxu1 %vm1872_vm2, %v1168_v26 }
 0x233   :  { %v8778_v27 = vpop.f32.mrf.mxu0  ;;  %v8789_v28 = vpop.f32.mrf.mxu1  ;;  %8930 = vmatprep.subr.mxu0 %v9573_v14  ;;  %8935 = vmatprep.subr.mxu1 %v9573_v14 }
 0x235   :  { %8923 = vmatmul.mubr.msk.f32.vlgmr.msra.gmra.mxu0 %vm1872_vm2, %v538_v9  ;;  %8928 = vmatmul.mubr.msk.f32.vlgmr.msra.gmra.mxu1 %vm1872_vm2, %v608_v54 }
 0x236   :  { %8932 = vmatprep.mubr.msk.f32.mxu0 %vm9574_vm1, %v9573_v14  ;;  %8937 = vmatprep.mubr.msk.f32.mxu1 %vm9574_vm1, %v9573_v14 }
 0x23b   :  { %v1238_v29 = vpop.f32.mrf.mxu0  ;;  %v1308_v30 = vpop.f32.mrf.mxu1 }
 0x23c   :  { %8931 = vmatpush3.xpose.msk.msra.mxu0 %vm1872_vm2, %v1238_v29  ;;  %8936 = vmatpush3.xpose.msk.msra.mxu1 %vm1872_vm2, %v1308_v30 }
 0x23d   :  { %v8800_v31 = vpop.f32.mrf.mxu0  ;;  %v8811_v32 = vpop.f32.mrf.mxu1  ;;  %8940 = vmatprep.subr.mxu0 %v9573_v14  ;;  %8945 = vmatprep.subr.mxu1 %v9573_v14 }
 0x23f   :  { %8933 = vmatmul.mubr.msk.f32.vlgmr.msra.gmra.mxu0 %vm1872_vm2, %v678_v12  ;;  %8938 = vmatmul.mubr.msk.f32.vlgmr.msra.gmra.mxu1 %vm1872_vm2, %v748_v13 }
 0x240   :  { %8942 = vmatprep.mubr.msk.f32.mxu0 %vm9574_vm1, %v9573_v14  ;;  %8947 = vmatprep.mubr.msk.f32.mxu1 %vm9574_vm1, %v9573_v14 }
 0x245   :  { %v1378_v33 = vpop.f32.mrf.mxu0  ;;  %v1448_v35 = vpop.f32.mrf.mxu1 }
 0x246   :  { %8941 = vmatpush3.msra.mxu0 %v1378_v33  ;;  %8946 = vmatpush3.msra.mxu1 %v1448_v35 }
 0x247   :  { %v8822_v36 = vpop.f32.mrf.mxu0  ;;  %v8833_v37 = vpop.f32.mrf.mxu1  ;;  %8950 = vmatprep.subr.mxu0 %v9573_v14  ;;  %8955 = vmatprep.subr.mxu1 %v9573_v14 }
 0x24f   :  { %v10196_v38 = vpop.f32.mrf.mxu0  ;;  %v10198_v39 = vpop.f32.mrf.mxu1 }
 0x251   :  { %v8844_v40 = vpop.f32.mrf.mxu0  ;;  %v8855_v41 = vpop.f32.mrf.mxu1 }
 0x259   :  { %v10200_v42 = vpop.f32.mrf.mxu0  ;;  %v10202_v43 = vpop.f32.mrf.mxu1 }
 0x25b   :  { %v8866_v44 = vpop.f32.mrf.mxu0  ;;  %v8877_v45 = vpop.f32.mrf.mxu1 }
 0x263   :  { %v10204_v46 = vpop.f32.mrf.mxu0  ;;  %v10206_v47 = vpop.f32.mrf.mxu1 }
 0x265   :  { %v8888_v48 = vpop.f32.mrf.mxu0  ;;  %v8899_v49 = vpop.f32.mrf.mxu1 }
 0x2e1   :  { %v1945_v50 = vpop.f32.mrf.mxu0 }
 0x2e2   :  { %v2481_v51 = vmul.f32 0.35355338, %v1945_v50 }
 0x2e3   :  { %v8904_v52 = vpop.f32.mrf.mxu0 }
 0x2e4   :  { %v2489_v34 = vsel %vm1872_vm2, %v2481_v51, -inf }
 0x2e5   :  { %2490 = vmax.xlane.f32.xlu0 %v2489_v34  ;;  %v2021_v53 = vpop.f32.mrf.mxu0 }
 0x2e6   :  { %v2482_v55 = vmul.f32 0.35355338, %v2021_v53 }
 0x2e7   :  { %v8909_v56 = vpop.f32.mrf.mxu0 }
 0x2e8   :  { %v2492_v57 = vsel %vm1872_vm2, %v2482_v55, -inf }
 0x2e9   :  { %2493 = vmax.xlane.f32.xlu1 %v2492_v57 }
 0x2eb   :  { %v2173_v58 = vpop.f32.mrf.mxu1  ;;  %v2097_v59 = vpop.f32.mrf.mxu0 }
 0x2ec   :  { %v2484_v60 = vmul.f32 0.35355338, %v2173_v58  ;;  %v2483_v61 = vmul.f32 0.35355338, %v2097_v59 }
 0x2ed   :  { %v8914_v62 = vpop.f32.mrf.mxu0  ;;  %v8919_v63 = vpop.f32.mrf.mxu1 }
 0x2ee   :  { %v2498_v0 = vsel %vm1872_vm2, %v2484_v60, -inf  ;;  %v2495_v1 = vsel %vm1872_vm2, %v2483_v61, -inf }
 0x2ef   :  { %2499 = vmax.xlane.f32.xlu1 %v2498_v0  ;;  %2496 = vmax.xlane.f32.xlu0 %v2495_v1 }
 0x2f5   :  { %v2249_v2 = vpop.f32.mrf.mxu0  ;;  %v2325_v3 = vpop.f32.mrf.mxu1 }
 0x2f6   :  { %v2485_v4 = vmul.f32 0.35355338, %v2249_v2  ;;  %v2486_v5 = vmul.f32 0.35355338, %v2325_v3 }
 0x2f7   :  { %v8924_v6 = vpop.f32.mrf.mxu0  ;;  %v8929_v7 = vpop.f32.mrf.mxu1 }
 0x2f8   :  { %v2504_v8 = vsel %vm1872_vm2, %v2486_v5, -inf  ;;  %v2501_v9 = vsel %vm1872_vm2, %v2485_v4, -inf }
 0x2f9   :  { %2505 = vmax.xlane.f32.xlu1 %v2504_v8  ;;  %2502 = vmax.xlane.f32.xlu0 %v2501_v9 }
 0x2ff   :  { %v2401_v54 = vpop.f32.mrf.mxu0  ;;  %v2477_v10 = vpop.f32.mrf.mxu1 }
 0x300   :  { %v2487_v11 = vmul.f32 0.35355338, %v2401_v54  ;;  %v2488_v12 = vmul.f32 0.35355338, %v2477_v10 }
 0x301   :  { %v8934_v13 = vpop.f32.mrf.mxu0  ;;  %v8939_v15 = vpop.f32.mrf.mxu1 }
 0x302   :  { %v2510_v16 = vsel %vm1872_vm2, %v2488_v12, -inf  ;;  %v2507_v17 = vsel %vm1872_vm2, %v2487_v11, -inf }
 0x303   :  { %2511 = vmax.xlane.f32.xlu1 %v2510_v16  ;;  %2508 = vmax.xlane.f32.xlu0 %v2507_v17 }
 0x36e   :  { %v2491_v18 = vpop.xlane.xlu0 %2490 }
 0x36f   :  { %v2513_v19 = vsub.f32 %v2481_v51, %v2491_v18 }
 0x371   :  { %v2521_v20 = vmul.f32 1.442695, %v2513_v19 }
 0x372   :  { %v2494_v21 = vpop.xlane.xlu1 %2493 }
 0x373   :  { %9473 = vpow2.f32 %v2521_v20  ;;  %v2514_v22 = vsub.f32 %v2482_v55, %v2494_v21  ;;  %v3163_v21 = vld [vmem:[%s11145_s4 + $0x10] sm:$0xff] }
 0x375   :  { %v2523_v23 = vmul.f32 1.442695, %v2514_v22 }
 0x377   :  { %9475 = vpow2.f32 %v2523_v23 }
 0x378   :  { %v2500_v24 = vpop.xlane.xlu1 %2499  ;;  %v2497_v25 = vpop.xlane.xlu0 %2496 }
 0x379   :  { %v2516_v26 = vsub.f32 %v2484_v60, %v2500_v24  ;;  %v2515_v27 = vsub.f32 %v2483_v61, %v2497_v25  ;;  %v3164_v24 = vld [vmem:[%s11145_s4 + $0x18] sm:$0xff] }
 0x37b   :  { %v2527_v28 = vmul.f32 1.442695, %v2516_v26  ;;  %v2525_v29 = vmul.f32 1.442695, %v2515_v27  ;;  %v3166_v27 = vld [vmem:[%s11145_s4 + $0x28] sm:$0xff] }
 0x37d   :  { %9477 = vpow2.f32 %v2527_v28 }
 0x37e   :  { %9479 = vpow2.f32 %v2525_v29  ;;  %v3165_v29 = vld [vmem:[%s11145_s4 + $0x20] sm:$0xff] }
 0x380   :  { %v9474_v30 = vpop.eup %9473 }
 0x381   :  { %v2537_v31 = vsel %vm1872_vm2, %v9474_v30, 0.0 }
 0x382   :  { %v2506_v32 = vpop.xlane.xlu1 %2505  ;;  %v2503_v33 = vpop.xlane.xlu0 %2502  ;;  %2538 = vadd.xlane.f32.xlu0 %v2537_v31 }
 0x383   :  { %v2518_v35 = vsub.f32 %v2486_v5, %v2506_v32  ;;  %v2517_v36 = vsub.f32 %v2485_v4, %v2503_v33  ;;  %v3168_v33 = vld [vmem:[%s11145_s4 + $0x38] sm:$0xff] }
 0x384   :  { %v9476_v37 = vpop.eup %9475 }
 0x385   :  { %v2531_v40 = vmul.f32 1.442695, %v2518_v35  ;;  %v2529_v41 = vmul.f32 1.442695, %v2517_v36  ;;  %v2540_v44 = vsel %vm1872_vm2, %v9476_v37, 0.0  ;;  %v3167_v36 = vld [vmem:[%s11145_s4 + $0x30] sm:$0xff] }
 0x386   :  { %2541 = vadd.xlane.f32.xlu1 %v2540_v44 }
 0x387   :  { %9481 = vpow2.f32 %v2531_v40 }
 0x388   :  { %9483 = vpow2.f32 %v2529_v41 }
 0x38a   :  { %v9478_v45 = vpop.eup %9477 }
 0x38b   :  { %v9480_v48 = vpop.eup %9479  ;;  %v2546_v49 = vsel %vm1872_vm2, %v9478_v45, 0.0 }
 0x38c   :  { %v2512_v50 = vpop.xlane.xlu1 %2511  ;;  %v2509_v51 = vpop.xlane.xlu0 %2508  ;;  %2547 = vadd.xlane.f32.xlu1 %v2546_v49  ;;  %v2543_v52 = vsel %vm1872_vm2, %v9480_v48, 0.0 }
 0x38d   :  { %v2520_v34 = vsub.f32 %v2488_v12, %v2512_v50  ;;  %v2519_v53 = vsub.f32 %v2487_v11, %v2509_v51  ;;  %2544 = vadd.xlane.f32.xlu0 %v2543_v52 }
 0x38f   :  { %v2535_v55 = vmul.f32 1.442695, %v2520_v34  ;;  %v2533_v56 = vmul.f32 1.442695, %v2519_v53 }
 0x391   :  { %9485 = vpow2.f32 %v2535_v55 }
 0x392   :  { %9487 = vpow2.f32 %v2533_v56 }
 0x394   :  { %v9482_v57 = vpop.eup %9481 }
 0x395   :  { %v9484_v58 = vpop.eup %9483  ;;  %v2552_v59 = vsel %vm1872_vm2, %v9482_v57, 0.0 }
 0x396   :  { %2553 = vadd.xlane.f32.xlu1 %v2552_v59  ;;  %v2549_v60 = vsel %vm1872_vm2, %v9484_v58, 0.0 }
 0x397   :  { %2550 = vadd.xlane.f32.xlu0 %v2549_v60 }
 0x39e   :  { %v9486_v61 = vpop.eup %9485 }
 0x39f   :  { %v9488_v62 = vpop.eup %9487  ;;  %v2558_v63 = vsel %vm1872_vm2, %v9486_v61, 0.0 }
 0x3a0   :  { %2559 = vadd.xlane.f32.xlu1 %v2558_v63  ;;  %v2555_v0 = vsel %vm1872_vm2, %v9488_v62, 0.0 }
 0x3a1   :  { %2556 = vadd.xlane.f32.xlu0 %v2555_v0  ;;  %v8069_v0 = vld [vmem:[%s11146_s5] ss:$0 sm:$0xff] }
 0x40b   :  { %v2539_v1 = vpop.xlane.xlu0 %2538 }
 0x40c   :  { %9489 = vrcp.f32 %v2539_v1 }
 0x40f   :  { %v2542_v2 = vpop.xlane.xlu1 %2541 }
 0x410   :  { %9491 = vrcp.f32 %v2542_v2 }
 0x415   :  { %v2548_v3 = vpop.xlane.xlu1 %2547 }
 0x416   :  { %9493 = vrcp.f32 %v2548_v3  ;;  %v2545_v4 = vpop.xlane.xlu0 %2544  ;;  %v9549_v3 = vld [vmem:[%s11141_s0] sm:$0xff] }
 0x417   :  { %9495 = vrcp.f32 %v2545_v4 }
 0x419   :  { %v9490_v5 = vpop.eup %9489 }
 0x41a   :  { %v2569_v6 = vmul.f32 %v9490_v5, %v9474_v30 }
 0x41c   :  { %8943 = vmatmul.mubr.msk.f32.vlgmr.msra.gmra.mxu0 %vm1872_vm2, %v2569_v6 }
 0x41d   :  { %v9492_v7 = vpop.eup %9491  ;;  %8951 = vmatpush3.msra.mxu0 %v10196_v38  ;;  %8952 = vmatprep.mubr.msk.f32.mxu0 %vm9574_vm1, %v9573_v14 }
 0x41e   :  { %v2570_v8 = vmul.f32 %v9492_v7, %v9476_v37  ;;  %8960 = vmatprep.subr.mxu0 %v9573_v14 }
 0x41f   :  { %v2554_v9 = vpop.xlane.xlu1 %2553 }
 0x420   :  { %9497 = vrcp.f32 %v2554_v9  ;;  %v2551_v54 = vpop.xlane.xlu0 %2550  ;;  %8948 = vmatmul.mubr.msk.f32.vlgmr.msra.gmra.mxu1 %vm1872_vm2, %v2570_v8 }
 0x421   :  { %9499 = vrcp.f32 %v2551_v54  ;;  %8956 = vmatpush3.msra.mxu1 %v10198_v39  ;;  %8957 = vmatprep.mubr.msk.f32.mxu1 %vm9574_vm1, %v9573_v14 }
 0x422   :  { %8965 = vmatprep.subr.mxu1 %v9573_v14 }
 0x423   :  { %v9494_v38 = vpop.eup %9493 }
 0x424   :  { %v9496_v10 = vpop.eup %9495  ;;  %v2572_v11 = vmul.f32 %v9494_v38, %v9478_v45 }
 0x425   :  { %v2571_v12 = vmul.f32 %v9496_v10, %v9480_v48 }
 0x426   :  { %8958 = vmatmul.mubr.msk.f32.vlgmr.msra.gmra.mxu1 %vm1872_vm2, %v2572_v11 }
 0x427   :  { %8953 = vmatmul.mubr.msk.f32.vlgmr.msra.gmra.mxu0 %vm1872_vm2, %v2571_v12  ;;  %8966 = vmatpush3.msra.mxu1 %v10202_v43 }
 0x428   :  { %8961 = vmatpush3.msra.mxu0 %v10200_v42  ;;  %8962 = vmatprep.mubr.msk.f32.mxu0 %vm9574_vm1, %v9573_v14 }
 0x429   :  { %v2560_v39 = vpop.xlane.xlu1 %2559  ;;  %8967 = vmatprep.mubr.msk.f32.mxu1 %vm9574_vm1, %v9573_v14  ;;  %8970 = vmatprep.subr.mxu0 %v9573_v14 }
 0x42a   :  { %9501 = vrcp.f32 %v2560_v39  ;;  %v2557_v13 = vpop.xlane.xlu0 %2556  ;;  %8975 = vmatprep.subr.mxu1 %v9573_v14 }
 0x42b   :  { %9503 = vrcp.f32 %v2557_v13 }
 0x42d   :  { %v9498_v15 = vpop.eup %9497 }
 0x42e   :  { %v9500_v16 = vpop.eup %9499  ;;  %v2574_v17 = vmul.f32 %v9498_v15, %v9482_v57 }
 0x42f   :  { %v2573_v43 = vmul.f32 %v9500_v16, %v9484_v58 }
 0x430   :  { %8968 = vmatmul.mubr.msk.f32.vlgmr.msra.gmra.mxu1 %vm1872_vm2, %v2574_v17 }
 0x431   :  { %8963 = vmatmul.mubr.msk.f32.vlgmr.msra.gmra.mxu0 %vm1872_vm2, %v2573_v43  ;;  %8976 = vmatpush3.msra.mxu1 %v10206_v47  ;;  %v3162_v47 = vld [vmem:[%s11145_s4 + $0x8] sm:$0xff] }
 0x432   :  { %8971 = vmatpush3.msra.mxu0 %v10204_v46  ;;  %8972 = vmatprep.mubr.msk.f32.mxu0 %vm9574_vm1, %v9573_v14  ;;  %v3161_v46 = vld [vmem:[%s11145_s4] sm:$0xff] }
 0x433   :  { %8977 = vmatprep.mubr.msk.f32.mxu1 %vm9574_vm1, %v9573_v14  ;;  %8980 = vmatprep.subr.mxu0 %v9573_v14 }
 0x434   :  { %8985 = vmatprep.subr.mxu1 %v9573_v14 }
 0x437   :  { %v9502_v42 = vpop.eup %9501 }
 0x438   :  { %v9504_v18 = vpop.eup %9503  ;;  %v2576_v19 = vmul.f32 %v9502_v42, %v9486_v61 }
 0x439   :  { %v2575_v20 = vmul.f32 %v9504_v18, %v9488_v62  ;;  %v9550_v18 = vld [vmem:[%s11141_s0 + $0x8] sm:$0xff] }
 0x43a   :  { %8978 = vmatmul.mubr.msk.f32.vlgmr.msra.gmra.mxu1 %vm1872_vm2, %v2576_v19 }
 0x43b   :  { %8973 = vmatmul.mubr.msk.f32.vlgmr.msra.gmra.mxu0 %vm1872_vm2, %v2575_v20  ;;  %8987 = vmatprep.mubr.msk.f32.mxu1 %vm9574_vm1, %v9573_v14 }
 0x43c   :  { %8982 = vmatprep.mubr.msk.f32.mxu0 %vm9574_vm1, %v9573_v14  ;;  %8981 = vmatpush3.msra.mxu0 %v3161_v46 }
 0x43d   :  { %8990 = vmatprep.subr.mxu0 %v9573_v14  ;;  %8986 = vmatpush3.msra.mxu1 %v3162_v47 }
 0x43e   :  { %8995 = vmatprep.subr.mxu1 %v9573_v14 }
 0x4dc   :  { %v2646_v22 = vpop.f32.mrf.mxu0 }
 0x4dd   :  { %8983 = vmatmul.mubr.msk.f32.vlgmr.msra.gmra.mxu0 %vm1872_vm2, %v2646_v22 }
 0x4de   :  { %v8944_v23 = vpop.f32.mrf.mxu0  ;;  %8991 = vmatpush3.msra.mxu0 %v3163_v21  ;;  %8992 = vmatprep.mubr.msk.f32.mxu0 %vm9574_vm1, %v9573_v14 }
 0x4df   :  { %9000 = vmatprep.subr.mxu0 %v9573_v14 }
 0x4e0   :  { %v2719_v25 = vpop.f32.mrf.mxu1 }
 0x4e1   :  { %8988 = vmatmul.mubr.msk.f32.vlgmr.msra.gmra.mxu1 %vm1872_vm2, %v2719_v25 }
 0x4e2   :  { %v8949_v26 = vpop.f32.mrf.mxu1  ;;  %8996 = vmatpush3.msra.mxu1 %v3164_v24  ;;  %8997 = vmatprep.mubr.msk.f32.mxu1 %vm9574_vm1, %v9573_v14 }
 0x4e3   :  { %9005 = vmatprep.subr.mxu1 %v9573_v14 }
 0x4e6   :  { %v2865_v28 = vpop.f32.mrf.mxu1 }
 0x4e7   :  { %v2792_v30 = vpop.f32.mrf.mxu0  ;;  %8998 = vmatmul.mubr.msk.f32.vlgmr.msra.gmra.mxu1 %vm1872_vm2, %v2865_v28 }
 0x4e8   :  { %8993 = vmatmul.mubr.msk.f32.vlgmr.msra.gmra.mxu0 %vm1872_vm2, %v2792_v30  ;;  %v8959_v31 = vpop.f32.mrf.mxu1  ;;  %9006 = vmatpush3.msra.mxu1 %v3166_v27  ;;  %v3824_v30 = vld [vmem:[%s11149_s8 + $0x10] sm:$0xff] }
 0x4e9   :  { %v8954_v32 = vpop.f32.mrf.mxu0  ;;  %9001 = vmatpush3.msra.mxu0 %v3165_v29  ;;  %9002 = vmatprep.mubr.msk.f32.mxu0 %vm9574_vm1, %v9573_v14  ;;  %v3825_v29 = vld [vmem:[%s11149_s8 + $0x18] sm:$0xff]  ;;  %v3823_v31 = vld [vmem:[%s11149_s8 + $0x8] sm:$0xff] }
 0x4ea   :  { %9007 = vmatprep.mubr.msk.f32.mxu1 %vm9574_vm1, %v9573_v14  ;;  %9010 = vmatprep.subr.mxu0 %v9573_v14  ;;  %v3923_v32 = vld [vmem:[%s11151_s10 + $0x38] sm:$0xff] }
 0x4eb   :  { %9015 = vmatprep.subr.mxu1 %v9573_v14 }
 0x4f0   :  { %v3011_v35 = vpop.f32.mrf.mxu1 }
 0x4f1   :  { %v2938_v37 = vpop.f32.mrf.mxu0  ;;  %9008 = vmatmul.mubr.msk.f32.vlgmr.msra.gmra.mxu1 %vm1872_vm2, %v3011_v35  ;;  %v3822_v35 = vld [vmem:[%s11149_s8] sm:$0xff] }
 0x4f2   :  { %9003 = vmatmul.mubr.msk.f32.vlgmr.msra.gmra.mxu0 %vm1872_vm2, %v2938_v37  ;;  %v8969_v40 = vpop.f32.mrf.mxu1  ;;  %9016 = vmatpush3.msra.mxu1 %v3168_v33  ;;  %v3922_v33 = vld [vmem:[%s11151_s10 + $0x30] sm:$0xff]  ;;  %v3920_v37 = vld [vmem:[%s11151_s10 + $0x20] sm:$0xff] }
 0x4f3   :  { %v8964_v41 = vpop.f32.mrf.mxu0  ;;  %9011 = vmatpush3.msra.mxu0 %v3167_v36  ;;  %9012 = vmatprep.mubr.msk.f32.mxu0 %vm9574_vm1, %v9573_v14  ;;  %v3921_v36 = vld [vmem:[%s11151_s10 + $0x28] sm:$0xff] }
 0x4f4   :  { %9017 = vmatprep.mubr.msk.f32.mxu1 %vm9574_vm1, %v9573_v14  ;;  %9020 = vmatprep.subr.mxu0 %v3825_v29 }
 0x4f5   :  { %9031 = vmatprep.subr.mxu1 %v3923_v32 }
 0x4fa   :  { %v3157_v44 = vpop.f32.mrf.mxu1 }
 0x4fb   :  { %v3084_v45 = vpop.f32.mrf.mxu0  ;;  %9018 = vmatmul.mubr.msk.f32.vlgmr.msra.gmra.mxu1 %vm1872_vm2, %v3157_v44 }
 0x4fc   :  { %9013 = vmatmul.mubr.msk.f32.vlgmr.msra.gmra.mxu0 %vm1872_vm2, %v3084_v45  ;;  %v8979_v48 = vpop.f32.mrf.mxu1  ;;  %9032 = vmatpush3.msra.mxu1 %v3923_v32 }
 0x4fd   :  { %v8974_v49 = vpop.f32.mrf.mxu0  ;;  %9021 = vmatpush3.msra.mxu0 %v3825_v29  ;;  %9033 = vmatprep.subr.mxu1 %v3922_v33  ;;  %v8070_v48 = vld [vmem:[%s11147_s6] ss:$0 sm:$0xff] }
 0x4fe   :  { %9022 = vmatprep.subr.mxu0 %v3824_v30  ;;  %9034 = vmatpush3.msra.mxu1 %v3922_v33 }
 0x4ff   :  { %9023 = vmatpush3.msra.mxu0 %v3824_v30  ;;  %9035 = vmatprep.subr.mxu1 %v3921_v36 }
 0x500   :  { %9024 = vmatprep.subr.mxu0 %v3823_v31  ;;  %9036 = vmatpush3.msra.mxu1 %v3921_v36 }
 0x501   :  { %9025 = vmatpush3.msra.mxu0 %v3823_v31  ;;  %9037 = vmatprep.subr.mxu1 %v3920_v37 }
 0x502   :  { %9026 = vmatprep.subr.mxu0 %v3822_v35  ;;  %9038 = vmatpush3.msra.mxu1 %v3920_v37  ;;  %v8080_v37 = vld [vmem:[%s11142_s1 + $0x1] ss:$0 sm:$0xff] }
 0x503   :  { %9027 = vmatpush3.msra.mxu0 %v3822_v35 }
 0x504   :  { %9050 = vmatprep.subr.mxu0 %v9573_v14 }
 0x59d   :  { %v3238_v50 = vpop.f32.mrf.mxu0 }
 0x59e   :  { %v3753_v55 = vsel %vm46_vm0, %v3238_v50, 0.0 }
 0x59f   :  { %v8984_v51 = vpop.f32.mrf.mxu0 }
 0x5a0   :  { %v8071_v51 = vld [vmem:[%s11148_s7] ss:$0 sm:$0xff] }
 0x5a1   :  { %v3311_v52 = vpop.f32.mrf.mxu1 }
 0x5a2   :  { %v3754_v53 = vsel %vm46_vm0, %v3311_v52, 0.0 }
 0x5a3   :  { %v8989_v34 = vpop.f32.mrf.mxu1  ;;  %v3755_v57 = vadd.f32 %v3754_v53, %v3753_v55 }
 0x5a7   :  { %v3457_v56 = vpop.f32.mrf.mxu1 }
 0x5a8   :  { %v3384_v58 = vpop.f32.mrf.mxu0  ;;  %v3758_v63 = vsel %vm46_vm0, %v3457_v56, 0.0 }
 0x5a9   :  { %v3756_v59 = vsel %vm46_vm0, %v3384_v58, 0.0  ;;  %v8999_v60 = vpop.f32.mrf.mxu1 }
 0x5aa   :  { %v3757_v61 = vadd.f32 %v3756_v59, %v3755_v57  ;;  %v8994_v62 = vpop.f32.mrf.mxu0  ;;  %v3919_v60 = vld [vmem:[%s11151_s10 + $0x18] sm:$0xff] }
 0x5ab   :  { %9039 = vmatprep.subr.mxu1 %v3919_v60  ;;  %v3917_v62 = vld [vmem:[%s11151_s10 + $0x8] sm:$0xff] }
 0x5ac   :  { %v3759_v1 = vadd.f32 %v3758_v63, %v3757_v61  ;;  %9040 = vmatpush3.msra.mxu1 %v3919_v60  ;;  %v3918_v61 = vld [vmem:[%s11151_s10 + $0x10] sm:$0xff]  ;;  %v3916_v63 = vld [vmem:[%s11151_s10] sm:$0xff]  ;;  %v8109_v60 = vld [vmem:[%s11144_s3 + $0x3d8] sm:$0xff] }
 0x5ad   :  { %9041 = vmatprep.subr.mxu1 %v3918_v61 }
 0x5ae   :  { %v3774_v2 = vadd.f32 %v8069_v0, %v3759_v1  ;;  %9042 = vmatpush3.msra.mxu1 %v3918_v61  ;;  %v8096_v61 = vld [vmem:[%s11144_s3 + $0x370] sm:$0xff] }
 0x5af   :  { %9043 = vmatprep.subr.mxu1 %v3917_v62 }
 0x5b0   :  { %v10320_v4 = vadd.f32 %v9549_v3, %v3774_v2  ;;  %9044 = vmatpush3.msra.mxu1 %v3917_v62  ;;  %v8108_v62 = vld [vmem:[%s11144_s3 + $0x3d0] sm:$0xff] }
 0x5b1   :  { %v3603_v5 = vpop.f32.mrf.mxu1  ;;  %9045 = vmatprep.subr.mxu1 %v3916_v63 }
 0x5b2   :  { %v3530_v6 = vpop.f32.mrf.mxu0  ;;  %v3780_v7 = vsel %vm46_vm0, %v10320_v4, 0.0  ;;  %v3761_v38 = vsel %vm46_vm0, %v3603_v5, 0.0  ;;  %9046 = vmatpush3.msra.mxu1 %v3916_v63  ;;  %v8095_v63 = vld [vmem:[%s11144_s3 + $0x368] sm:$0xff] }
 0x5b3   :  { %v9009_v8 = vpop.f32.mrf.mxu1  ;;  %3781 = vadd.xlane.f32.xlu0 %v3780_v7  ;;  %v3760_v54 = vsel %vm46_vm0, %v3530_v6, 0.0  ;;  %9072 = vmatprep.subr.mxu1 %v9573_v14 }
 0x5b4   :  { %v9004_v9 = vpop.f32.mrf.mxu0  ;;  %v3762_v11 = vadd.f32 %v3761_v38, %v3760_v54  ;;  %v8075_v8 = vld [vmem:[%s11152_s11] ss:$0 sm:$0xff] }
 0x5bb   :  { %v3749_v10 = vpop.f32.mrf.mxu1 }
 0x5bc   :  { %v3676_v12 = vpop.f32.mrf.mxu0  ;;  %v3765_v17 = vsel %vm46_vm0, %v3749_v10, 0.0 }
 0x5bd   :  { %v3763_v39 = vsel %vm46_vm0, %v3676_v12, 0.0  ;;  %v9019_v13 = vpop.f32.mrf.mxu1 }
 0x5be   :  { %v3764_v15 = vadd.f32 %v3763_v39, %v3762_v11  ;;  %v9014_v16 = vpop.f32.mrf.mxu0 }
 0x5c0   :  { %v3766_v43 = vadd.f32 %v3765_v17, %v3764_v15 }
 0x5c2   :  { %v3775_v42 = vadd.f32 %v8069_v0, %v3766_v43  ;;  %v8072_v0 = vld [vmem:[%s11150_s9] ss:$0 sm:$0xff] }
 0x5c4   :  { %v10331_v19 = vadd.f32 %v9550_v18, %v3775_v42 }
 0x5c6   :  { %v3783_v20 = vsel %vm46_vm0, %v10331_v19, 0.0 }
 0x5c7   :  { %3784 = vadd.xlane.f32.xlu1 %v3783_v20 }
 0x63c   :  { %v3782_v46 = vpop.xlane.xlu0 %3781 }
 0x63d   :  { %v3786_v47 = vmul.f32 0.03125, %v3782_v46 }
 0x63f   :  { %v3788_v21 = vsub.f32 %v10320_v4, %v3786_v47  ;;  %v8085_v47 = vld [vmem:[%s11144_s3 + $0x318] sm:$0xff] }
 0x641   :  { %v3790_v22 = vmul.f32 %v3788_v21, %v3788_v21 }
 0x643   :  { %v3792_v23 = vsel %vm46_vm0, %v3790_v22, 0.0  ;;  %v8084_v22 = vld [vmem:[%s11144_s3 + $0x310] sm:$0xff] }
 0x644   :  { %3793 = vadd.xlane.f32.xlu0 %v3792_v23  ;;  %v8092_v23 = vld [vmem:[%s11144_s3 + $0x350] sm:$0xff] }
 0x650   :  { %v3785_v24 = vpop.xlane.xlu1 %3784 }
 0x651   :  { %v3787_v25 = vmul.f32 0.03125, %v3785_v24  ;;  %v8083_v24 = vld [vmem:[%s11144_s3 + $0x308] sm:$0xff] }
 0x653   :  { %v3789_v26 = vsub.f32 %v10331_v19, %v3787_v25  ;;  %v8091_v25 = vld [vmem:[%s11144_s3 + $0x348] sm:$0xff] }
 0x655   :  { %v3791_v27 = vmul.f32 %v3789_v26, %v3789_v26 }
 0x657   :  { %v3795_v28 = vsel %vm46_vm0, %v3791_v27, 0.0  ;;  %v8090_v27 = vld [vmem:[%s11144_s3 + $0x340] sm:$0xff] }
 0x658   :  { %3796 = vadd.xlane.f32.xlu1 %v3795_v28 }
 0x6cd   :  { %v3794_v40 = vpop.xlane.xlu0 %3793 }
 0x6ce   :  { %v3798_v41 = vmul.f32 0.03125, %v3794_v40 }
 0x6d0   :  { %v3800_v44 = vadd.f32 1e-05, %v3798_v41 }
 0x6d2   :  { %9505 = vrsqrt.f32 %v3800_v44  ;;  %v8081_v44 = vld [vmem:[%s11143_s2 + $0x1] ss:$0 sm:$0xff]  ;;  %s9575_s2 = smov [#allocation2]  }
 0x6d3   :  { %s8000_s0 = sshll.u32 %s9575_s2, 4  ;;  %s8001_s0 = int_to_ptr.vmem [resolvable:$true] %s8000_s0 }
 0x6d4   :  { %p9556_p1 = scmp.lt.s32.totalorder %s8001_s0, %s8001_s0 }
 0x6df   :  { %v9506_v45 = vpop.eup %9505 }
 0x6e0   :  { %v3804_v49 = vmul.f32 %v9506_v45, %v3788_v21  ;;  %v8093_v21 = vld [vmem:[%s11144_s3 + $0x358] sm:$0xff] }
 0x6e1   :  { %v3797_v50 = vpop.xlane.xlu1 %3796 }
 0x6e2   :  { %v3799_v52 = vmul.f32 0.03125, %v3797_v50  ;;  %v3812_v34 = vmul.f32 %v8070_v48, %v3804_v49  ;;  %v8101_v49 = vld [vmem:[%s11144_s3 + $0x398] sm:$0xff] }
 0x6e4   :  { %v3801_v53 = vadd.f32 1e-05, %v3799_v52  ;;  %v3820_v55 = vadd.f32 %v8071_v51, %v3812_v34  ;;  %v8100_v52 = vld [vmem:[%s11144_s3 + $0x390] sm:$0xff]  ;;  %v8087_v34 = vld [vmem:[%s11144_s3 + $0x328] sm:$0xff] }
 0x6e6   :  { %9507 = vrsqrt.f32 %v3801_v53  ;;  %9028 = vmatprep.mubr.msk.f32.mxu0 %vm46_vm0, %v3820_v55  ;;  %v8099_v53 = vld [vmem:[%s11144_s3 + $0x388] sm:$0xff] }
 0x6f3   :  { %v9508_v56 = vpop.eup %9507 }
 0x6f4   :  { %v3805_v57 = vmul.f32 %v9508_v56, %v3789_v26  ;;  %v8082_v26 = vld [vmem:[%s11144_s3 + $0x300] sm:$0xff] }
 0x6f5   :  { %v8086_v56 = vld [vmem:[%s11144_s3 + $0x320] sm:$0xff] }
 0x6f6   :  { %v3813_v58 = vmul.f32 %v8070_v48, %v3805_v57  ;;  %v8089_v48 = vld [vmem:[%s11144_s3 + $0x338] sm:$0xff]  ;;  %v8098_v57 = vld [vmem:[%s11144_s3 + $0x380] sm:$0xff] }
 0x6f8   :  { %v3821_v59 = vadd.f32 %v8071_v51, %v3813_v58  ;;  %v8088_v51 = vld [vmem:[%s11144_s3 + $0x330] sm:$0xff] }
 0x6fa   :  { %9029 = vmatmul.mubr.msk.f32.vlgmr.msra.gmra.mxu0 %vm46_vm0, %v3821_v59  ;;  %v8097_v59 = vld [vmem:[%s11144_s3 + $0x378] sm:$0xff] }
 0x6fb   :  { %9058 = vmatprep.mubr.msk.f32.mxu0 %vm9574_vm1, %v9573_v14  ;;  %9051 = vmatpush3.msra.mxu0 %v8085_v47  ;;  %v8131_v47 = vld [vmem:[%s11144_s3 + $0x488] sm:$0xff] }
 0x6fc   :  { %9052 = vmatprep.subr.mxu0 %v9573_v14 }
 0x6fd   :  { %9053 = vmatpush3.msra.mxu0 %v8084_v22  ;;  %v8130_v22 = vld [vmem:[%s11144_s3 + $0x480] sm:$0xff] }
 0x6fe   :  { %9054 = vmatprep.subr.mxu0 %v9573_v14 }
 0x6ff   :  { %9055 = vmatpush3.msra.mxu0 %v8083_v24  ;;  %v8141_v24 = vld [vmem:[%s11144_s3 + $0x4d8] sm:$0xff] }
 0x700   :  { %9056 = vmatprep.subr.mxu0 %v9573_v14 }
 0x701   :  { %9057 = vmatpush3.msra.mxu0 %v8082_v26  ;;  %v8140_v26 = vld [vmem:[%s11144_s3 + $0x4d0] sm:$0xff] }
 0x702   :  { %9061 = vmatprep.subr.mxu0 %v9573_v14 }
 0x7ba   :  { %v9030_v1 = vpop.f32.mrf.mxu0 }
 0x7bb   :  { %v3911_v2 = vadd.f32 %v9030_v1, %v8072_v0  ;;  %v8094_v1 = vld [vmem:[%s11144_s3 + $0x360] sm:$0xff] }
 0x7bc   :  { %v3905_v3 = vpop.f32.mrf.mxu0 }
 0x7bd   :  { %v3906_v5 = vadd.f32 %v8072_v0, %v3905_v3  ;;  %v3915_v7 = vmax.f32 %v3911_v2, 0.0  ;;  %v8107_v0 = vld [vmem:[%s11144_s3 + $0x3c8] sm:$0xff]  ;;  %v8106_v2 = vld [vmem:[%s11144_s3 + $0x3c0] sm:$0xff]  ;;  %v8105_v3 = vld [vmem:[%s11144_s3 + $0x3b8] sm:$0xff] }
 0x7bf   :  { %v3914_v6 = vmax.f32 %v3906_v5, 0.0  ;;  %v8117_v5 = vld [vmem:[%s11144_s3 + $0x418] sm:$0xff] }
 0x7c1   :  { %9047 = vmatprep.mubr.msk.f32.mxu1 %vm3931_vm3, %v3914_v6  ;;  %v8104_v6 = vld [vmem:[%s11144_s3 + $0x3b0] sm:$0xff] }
 0x7c2   :  { %9048 = vmatmul.mubr.msk.f32.vlgmr.msra.gmra.mxu1 %vm3931_vm3, %v3915_v7  ;;  %v8116_v7 = vld [vmem:[%s11144_s3 + $0x410] sm:$0xff] }
 0x7c3   :  { %9080 = vmatprep.mubr.msk.f32.mxu1 %vm9574_vm1, %v9573_v14  ;;  %9073 = vmatpush3.msra.mxu1 %v8093_v21  ;;  %v8118_v21 = vld [vmem:[%s11144_s3 + $0x420] sm:$0xff] }
 0x7c4   :  { %9074 = vmatprep.subr.mxu1 %v9573_v14 }
 0x7c5   :  { %9075 = vmatpush3.msra.mxu1 %v8092_v23  ;;  %v8129_v23 = vld [vmem:[%s11144_s3 + $0x478] sm:$0xff] }
 0x7c6   :  { %9076 = vmatprep.subr.mxu1 %v9573_v14 }
 0x7c7   :  { %9077 = vmatpush3.msra.mxu1 %v8091_v25  ;;  %v8128_v25 = vld [vmem:[%s11144_s3 + $0x470] sm:$0xff] }
 0x7c8   :  { %9078 = vmatprep.subr.mxu1 %v9573_v14 }
 0x7c9   :  { %9079 = vmatpush3.msra.mxu1 %v8090_v27  ;;  %v8127_v27 = vld [vmem:[%s11144_s3 + $0x468] sm:$0xff] }
 0x7ca   :  { %9094 = vmatprep.subr.mxu1 %v9573_v14 }
 0x882   :  { %v9049_v9 = vpop.f32.mrf.mxu1 }
 0x883   :  { %v4010_v54 = vadd.f32 %v9049_v9, %v8075_v8  ;;  %v8115_v9 = vld [vmem:[%s11144_s3 + $0x408] sm:$0xff] }
 0x884   :  { %v4004_v38 = vpop.f32.mrf.mxu1 }
 0x885   :  { %v10398_v10 = vadd.f32 %v4010_v54, %v10331_v19  ;;  %v4005_v11 = vadd.f32 %v8075_v8, %v4004_v38  ;;  %v8103_v8 = vld [vmem:[%s11144_s3 + $0x3a8] sm:$0xff]  ;;  %v8102_v54 = vld [vmem:[%s11144_s3 + $0x3a0] sm:$0xff] }
 0x886   :  { %v8114_v38 = vld [vmem:[%s11144_s3 + $0x400] sm:$0xff] }
 0x887   :  { %v10401_v12 = vadd.f32 %v4005_v11, %v10320_v4  ;;  %v4022_v39 = vsel %vm46_vm0, %v10398_v10, 0.0  ;;  %v8113_v11 = vld [vmem:[%s11144_s3 + $0x3f8] sm:$0xff] }
 0x888   :  { %4023 = vadd.xlane.f32.xlu1 %v4022_v39  ;;  %v8125_v39 = vld [vmem:[%s11144_s3 + $0x458] sm:$0xff] }
 0x889   :  { %v4019_v13 = vsel %vm46_vm0, %v10401_v12, 0.0 }
 0x88a   :  { %4020 = vadd.xlane.f32.xlu0 %v4019_v13  ;;  %v8112_v13 = vld [vmem:[%s11144_s3 + $0x3f0] sm:$0xff] }
 0x911   :  { %v4024_v15 = vpop.xlane.xlu1 %4023 }
 0x912   :  { %v4026_v16 = vmul.f32 0.03125, %v4024_v15  ;;  %v8124_v15 = vld [vmem:[%s11144_s3 + $0x450] sm:$0xff] }
 0x913   :  { %v4021_v17 = vpop.xlane.xlu0 %4020 }
 0x914   :  { %v4028_v43 = vsub.f32 %v10398_v10, %v4026_v16  ;;  %v4025_v42 = vmul.f32 0.03125, %v4021_v17  ;;  %v8111_v16 = vld [vmem:[%s11144_s3 + $0x3e8] sm:$0xff] }
 0x915   :  { %v8123_v17 = vld [vmem:[%s11144_s3 + $0x448] sm:$0xff] }
 0x916   :  { %v4027_v18 = vsub.f32 %v10401_v12, %v4025_v42  ;;  %v4030_v19 = vmul.f32 %v4028_v43, %v4028_v43  ;;  %v8122_v42 = vld [vmem:[%s11144_s3 + $0x440] sm:$0xff] }
 0x918   :  { %v4034_v4 = vsel %vm46_vm0, %v4030_v19, 0.0  ;;  %v4029_v20 = vmul.f32 %v4027_v18, %v4027_v18  ;;  %v8133_v19 = vld [vmem:[%s11144_s3 + $0x498] sm:$0xff] }
 0x919   :  { %4035 = vadd.xlane.f32.xlu1 %v4034_v4  ;;  %v8120_v4 = vld [vmem:[%s11144_s3 + $0x430] sm:$0xff] }
 0x91a   :  { %v4031_v46 = vsel %vm46_vm0, %v4029_v20, 0.0  ;;  %v8132_v20 = vld [vmem:[%s11144_s3 + $0x490] sm:$0xff] }
 0x91b   :  { %4032 = vadd.xlane.f32.xlu0 %v4031_v46  ;;  %v8119_v46 = vld [vmem:[%s11144_s3 + $0x428] sm:$0xff] }
 0x9a2   :  { %v4036_v28 = vpop.xlane.xlu1 %4035 }
 0x9a3   :  { %v4038_v30 = vmul.f32 0.03125, %v4036_v28  ;;  %v8139_v28 = vld [vmem:[%s11144_s3 + $0x4c8] sm:$0xff] }
 0x9a4   :  { %v4033_v29 = vpop.xlane.xlu0 %4032 }
 0x9a5   :  { %v4037_v31 = vmul.f32 0.03125, %v4033_v29  ;;  %v4040_v33 = vadd.f32 1e-05, %v4038_v30  ;;  %v8126_v29 = vld [vmem:[%s11144_s3 + $0x460] sm:$0xff] }
 0x9a6   :  { %v8138_v30 = vld [vmem:[%s11144_s3 + $0x4c0] sm:$0xff] }
 0x9a7   :  { %v4039_v32 = vadd.f32 1e-05, %v4037_v31  ;;  %v8137_v31 = vld [vmem:[%s11144_s3 + $0x4b8] sm:$0xff] }
 0x9a9   :  { %9509 = vrsqrt.f32 %v4039_v32  ;;  %v8149_v32 = vld [vmem:[%s11144_s3 + $0x518] sm:$0xff] }
 0x9aa   :  { %9511 = vrsqrt.f32 %v4040_v33  ;;  %v8136_v33 = vld [vmem:[%s11144_s3 + $0x4b0] sm:$0xff] }
 0x9b6   :  { %v9510_v35 = vpop.eup %9509 }
 0x9b7   :  { %v4043_v36 = vmul.f32 %v9510_v35, %v4027_v18  ;;  %v9512_v41 = vpop.eup %9511  ;;  %v8121_v18 = vld [vmem:[%s11144_s3 + $0x438] sm:$0xff]  ;;  %v8148_v35 = vld [vmem:[%s11144_s3 + $0x510] sm:$0xff] }
 0x9b8   :  { %v4044_v50 = vmul.f32 %v9512_v41, %v4028_v43  ;;  %v8110_v43 = vld [vmem:[%s11144_s3 + $0x3e0] sm:$0xff] }
 0x9b9   :  { %v4051_v40 = vmul.f32 %v8080_v37, %v4043_v36  ;;  %v8135_v36 = vld [vmem:[%s11144_s3 + $0x4a8] sm:$0xff]  ;;  %v8146_v41 = vld [vmem:[%s11144_s3 + $0x500] sm:$0xff] }
 0x9ba   :  { %v4052_v55 = vmul.f32 %v8080_v37, %v4044_v50  ;;  %v8147_v37 = vld [vmem:[%s11144_s3 + $0x508] sm:$0xff]  ;;  %v8156_v50 = vld [vmem:[%s11144_s3 + $0x550] sm:$0xff] }
 0x9bb   :  { %v10449_v45 = vadd.f32 %v8081_v44, %v4051_v40  ;;  %v8134_v40 = vld [vmem:[%s11144_s3 + $0x4a0] sm:$0xff] }
 0x9bc   :  { %v10487_v58 = vadd.f32 %v8081_v44, %v4052_v55  ;;  %v8145_v44 = vld [vmem:[%s11144_s3 + $0x4f8] sm:$0xff] }
 0x9bd   :  { %9059 = vmatmul.mubr.msk.f32.vlgmr.msra.gmra.mxu0 %vm46_vm0, %v10449_v45  ;;  %9081 = vmatmul.mubr.msk.f32.vlgmr.msra.gmra.mxu1 %vm46_vm0, %v10449_v45  ;;  %v8153_v55 = vld [vmem:[%s11144_s3 + $0x538] sm:$0xff] }
 0x9be   :  { %9062 = vmatpush3.msra.mxu0 %v8089_v48  ;;  %9095 = vmatpush3.msra.mxu1 %v8101_v49  ;;  %v8157_v48 = vld [vmem:[%s11144_s3 + $0x558] sm:$0xff]  ;;  %v8144_v49 = vld [vmem:[%s11144_s3 + $0x4f0] sm:$0xff] }
 0x9bf   :  { %9063 = vmatprep.subr.mxu0 %v9573_v14  ;;  %9096 = vmatprep.subr.mxu1 %v9573_v14 }
 0x9c0   :  { %9064 = vmatpush3.msra.mxu0 %v8088_v51  ;;  %9097 = vmatpush3.msra.mxu1 %v8100_v52  ;;  %v8143_v51 = vld [vmem:[%s11144_s3 + $0x4e8] sm:$0xff] }
 0x9c1   :  { %9065 = vmatprep.subr.mxu0 %v9573_v14  ;;  %9098 = vmatprep.subr.mxu1 %v9573_v14  ;;  %v8155_v52 = vld [vmem:[%s11144_s3 + $0x548] sm:$0xff] }
 0x9c2   :  { %9066 = vmatpush3.msra.mxu0 %v8087_v34  ;;  %9099 = vmatpush3.msra.mxu1 %v8099_v53  ;;  %v8142_v34 = vld [vmem:[%s11144_s3 + $0x4e0] sm:$0xff] }
 0x9c3   :  { %9067 = vmatprep.subr.mxu0 %v9573_v14  ;;  %9100 = vmatprep.subr.mxu1 %v9573_v14  ;;  %v8154_v53 = vld [vmem:[%s11144_s3 + $0x540] sm:$0xff] }
 0x9c4   :  { %9068 = vmatpush3.msra.mxu0 %v8086_v56  ;;  %9069 = vmatprep.mubr.msk.f32.mxu0 %vm9574_vm1, %v9573_v14  ;;  %v8165_v56 = vld [vmem:[%s11144_s3 + $0x598] sm:$0xff] }
 0x9c5   :  { %9101 = vmatpush3.msra.mxu1 %v8098_v57  ;;  %9102 = vmatprep.mubr.msk.f32.mxu1 %vm9574_vm1, %v9573_v14  ;;  %v8152_v57 = vld [vmem:[%s11144_s3 + $0x530] sm:$0xff] }
 0x9c6   :  { %9070 = vmatmul.mubr.msk.f32.vlgmr.msra.gmra.mxu0 %vm46_vm0, %v10449_v45  ;;  %9083 = vmatprep.subr.mxu0 %v9573_v14 }
 0x9c7   :  { %9103 = vmatmul.mubr.msk.f32.vlgmr.msra.gmra.mxu1 %vm46_vm0, %v10487_v58  ;;  %9116 = vmatprep.subr.mxu1 %v9573_v14 }
 0x9c8   :  { %9084 = vmatpush3.msra.mxu0 %v8097_v59  ;;  %9117 = vmatpush3.msra.mxu1 %v8109_v60  ;;  %v8164_v59 = vld [vmem:[%s11144_s3 + $0x590] sm:$0xff]  ;;  %v8151_v60 = vld [vmem:[%s11144_s3 + $0x528] sm:$0xff] }
 0x9c9   :  { %9085 = vmatprep.subr.mxu0 %v9573_v14  ;;  %9118 = vmatprep.subr.mxu1 %v9573_v14 }
 0x9ca   :  { %9086 = vmatpush3.msra.mxu0 %v8096_v61  ;;  %9119 = vmatpush3.msra.mxu1 %v8108_v62  ;;  %v8163_v61 = vld [vmem:[%s11144_s3 + $0x588] sm:$0xff]  ;;  %v8150_v62 = vld [vmem:[%s11144_s3 + $0x520] sm:$0xff] }
 0x9cb   :  { %9087 = vmatprep.subr.mxu0 %v9573_v14  ;;  %9120 = vmatprep.subr.mxu1 %v9573_v14 }
 0x9cc   :  { %9088 = vmatpush3.msra.mxu0 %v8095_v63  ;;  %9121 = vmatpush3.msra.mxu1 %v8107_v0  ;;  %v8162_v63 = vld [vmem:[%s11144_s3 + $0x580] sm:$0xff]  ;;  %v8161_v0 = vld [vmem:[%s11144_s3 + $0x578] sm:$0xff] }
 0x9cd   :  { %9089 = vmatprep.subr.mxu0 %v9573_v14  ;;  %9122 = vmatprep.subr.mxu1 %v9573_v14 }
 0x9ce   :  { %9090 = vmatpush3.msra.mxu0 %v8094_v1  ;;  %9091 = vmatprep.mubr.msk.f32.mxu0 %vm9574_vm1, %v9573_v14  ;;  %v8173_v1 = vld [vmem:[%s11144_s3 + $0x5d8] sm:$0xff] }
 0x9cf   :  { %9123 = vmatpush3.msra.mxu1 %v8106_v2  ;;  %9124 = vmatprep.mubr.msk.f32.mxu1 %vm9574_vm1, %v9573_v14  ;;  %v8160_v2 = vld [vmem:[%s11144_s3 + $0x570] sm:$0xff] }
 0x9d0   :  { %9092 = vmatmul.mubr.msk.f32.vlgmr.msra.gmra.mxu0 %vm46_vm0, %v10449_v45  ;;  %9105 = vmatprep.subr.mxu0 %v9573_v14 }
 0x9d1   :  { %9125 = vmatmul.mubr.msk.f32.vlgmr.msra.gmra.mxu1 %vm46_vm0, %v10487_v58  ;;  %9138 = vmatprep.subr.mxu1 %v9573_v14 }
 0x9d2   :  { %9106 = vmatpush3.msra.mxu0 %v8105_v3  ;;  %9139 = vmatpush3.msra.mxu1 %v8117_v5  ;;  %v8172_v3 = vld [vmem:[%s11144_s3 + $0x5d0] sm:$0xff]  ;;  %v8159_v5 = vld [vmem:[%s11144_s3 + $0x568] sm:$0xff] }
 0x9d3   :  { %9107 = vmatprep.subr.mxu0 %v9573_v14  ;;  %9140 = vmatprep.subr.mxu1 %v9573_v14 }
 0x9d4   :  { %9108 = vmatpush3.msra.mxu0 %v8104_v6  ;;  %9141 = vmatpush3.msra.mxu1 %v8116_v7  ;;  %v8171_v6 = vld [vmem:[%s11144_s3 + $0x5c8] sm:$0xff]  ;;  %v8158_v7 = vld [vmem:[%s11144_s3 + $0x560] sm:$0xff] }
 0x9d5   :  { %9109 = vmatprep.subr.mxu0 %v9573_v14  ;;  %9142 = vmatprep.subr.mxu1 %v9573_v14 }
 0x9d6   :  { %9110 = vmatpush3.msra.mxu0 %v8103_v8  ;;  %9143 = vmatpush3.msra.mxu1 %v8115_v9  ;;  %v8170_v8 = vld [vmem:[%s11144_s3 + $0x5c0] sm:$0xff]  ;;  %v8169_v9 = vld [vmem:[%s11144_s3 + $0x5b8] sm:$0xff] }
 0x9d7   :  { %9111 = vmatprep.subr.mxu0 %v9573_v14  ;;  %9144 = vmatprep.subr.mxu1 %v9573_v14 }
 0x9d8   :  { %9112 = vmatpush3.msra.mxu0 %v8102_v54  ;;  %9113 = vmatprep.mubr.msk.f32.mxu0 %vm9574_vm1, %v9573_v14  ;;  %v8168_v54 = vld [vmem:[%s11144_s3 + $0x5b0] sm:$0xff] }
 0x9d9   :  { %9145 = vmatpush3.msra.mxu1 %v8114_v38  ;;  %9146 = vmatprep.mubr.msk.f32.mxu1 %vm9574_vm1, %v9573_v14  ;;  %v8167_v38 = vld [vmem:[%s11144_s3 + $0x5a8] sm:$0xff] }
 0x9da   :  { %9114 = vmatmul.mubr.msk.f32.vlgmr.msra.gmra.mxu0 %vm46_vm0, %v10487_v58  ;;  %9127 = vmatprep.subr.mxu0 %v9573_v14 }
 0x9db   :  { %9147 = vmatmul.mubr.msk.f32.vlgmr.msra.gmra.mxu1 %vm46_vm0, %v10449_v45  ;;  %9160 = vmatprep.subr.mxu1 %v9573_v14 }
 0x9dc   :  { %9128 = vmatpush3.msra.mxu0 %v8113_v11  ;;  %9161 = vmatpush3.msra.mxu1 %v8125_v39  ;;  %v8177_v11 = vld [vmem:[%s11144_s3 + $0x5f8] sm:$0xff]  ;;  %v8176_v39 = vld [vmem:[%s11144_s3 + $0x5f0] sm:$0xff] }
 0x9dd   :  { %9129 = vmatprep.subr.mxu0 %v9573_v14  ;;  %9162 = vmatprep.subr.mxu1 %v9573_v14 }
 0x9de   :  { %9130 = vmatpush3.msra.mxu0 %v8112_v13  ;;  %9163 = vmatpush3.msra.mxu1 %v8124_v15  ;;  %v8175_v13 = vld [vmem:[%s11144_s3 + $0x5e8] sm:$0xff]  ;;  %v8174_v15 = vld [vmem:[%s11144_s3 + $0x5e0] sm:$0xff] }
 0x9df   :  { %9131 = vmatprep.subr.mxu0 %v9573_v14  ;;  %9164 = vmatprep.subr.mxu1 %v9573_v14 }
 0x9e0   :  { %9132 = vmatpush3.msra.mxu0 %v8111_v16  ;;  %9165 = vmatpush3.msra.mxu1 %v8123_v17 }
 0x9e1   :  { %9133 = vmatprep.subr.mxu0 %v9573_v14  ;;  %9166 = vmatprep.subr.mxu1 %v9573_v14 }
 0x9e2   :  { %9134 = vmatpush3.msra.mxu0 %v8110_v43  ;;  %9135 = vmatprep.mubr.msk.f32.mxu0 %vm9574_vm1, %v9573_v14 }
 0x9e3   :  { %9167 = vmatpush3.msra.mxu1 %v8122_v42  ;;  %9168 = vmatprep.mubr.msk.f32.mxu1 %vm9574_vm1, %v9573_v14 }
 0x9e4   :  { %9136 = vmatmul.mubr.msk.f32.vlgmr.msra.gmra.mxu0 %vm46_vm0, %v10487_v58  ;;  %9149 = vmatprep.subr.mxu0 %v9573_v14 }
 0x9e5   :  { %9169 = vmatmul.mubr.msk.f32.vlgmr.msra.gmra.mxu1 %vm46_vm0, %v10449_v45  ;;  %9182 = vmatprep.subr.mxu1 %v9573_v14 }
 0x9e6   :  { %9150 = vmatpush3.msra.mxu0 %v8121_v18  ;;  %9183 = vmatpush3.msra.mxu1 %v8133_v19 }
 0x9e7   :  { %9151 = vmatprep.subr.mxu0 %v9573_v14  ;;  %9184 = vmatprep.subr.mxu1 %v9573_v14 }
 0x9e8   :  { %9152 = vmatpush3.msra.mxu0 %v8120_v4  ;;  %9185 = vmatpush3.msra.mxu1 %v8132_v20 }
 0x9e9   :  { %9153 = vmatprep.subr.mxu0 %v9573_v14  ;;  %9186 = vmatprep.subr.mxu1 %v9573_v14 }
 0x9ea   :  { %9154 = vmatpush3.msra.mxu0 %v8119_v46  ;;  %9187 = vmatpush3.msra.mxu1 %v8131_v47 }
 0x9eb   :  { %9155 = vmatprep.subr.mxu0 %v9573_v14  ;;  %9188 = vmatprep.subr.mxu1 %v9573_v14 }
 0x9ec   :  { %9156 = vmatpush3.msra.mxu0 %v8118_v21  ;;  %9157 = vmatprep.mubr.msk.f32.mxu0 %vm9574_vm1, %v9573_v14 }
 0x9ed   :  { %9189 = vmatpush3.msra.mxu1 %v8130_v22  ;;  %9190 = vmatprep.mubr.msk.f32.mxu1 %vm9574_vm1, %v9573_v14 }
 0x9ee   :  { %9158 = vmatmul.mubr.msk.f32.vlgmr.msra.gmra.mxu0 %vm46_vm0, %v10449_v45  ;;  %9171 = vmatprep.subr.mxu0 %v9573_v14 }
 0x9ef   :  { %9191 = vmatmul.mubr.msk.f32.vlgmr.msra.gmra.mxu1 %vm46_vm0, %v10487_v58  ;;  %9204 = vmatprep.subr.mxu1 %v9573_v14 }
 0x9f0   :  { %9172 = vmatpush3.msra.mxu0 %v8129_v23  ;;  %9205 = vmatpush3.msra.mxu1 %v8141_v24 }
 0x9f1   :  { %9173 = vmatprep.subr.mxu0 %v9573_v14  ;;  %9206 = vmatprep.subr.mxu1 %v9573_v14 }
 0x9f2   :  { %9174 = vmatpush3.msra.mxu0 %v8128_v25  ;;  %9207 = vmatpush3.msra.mxu1 %v8140_v26 }
 0x9f3   :  { %9175 = vmatprep.subr.mxu0 %v9573_v14  ;;  %9208 = vmatprep.subr.mxu1 %v9573_v14 }
 0x9f4   :  { %9176 = vmatpush3.msra.mxu0 %v8127_v27  ;;  %9209 = vmatpush3.msra.mxu1 %v8139_v28 }
 0x9f5   :  { %9177 = vmatprep.subr.mxu0 %v9573_v14  ;;  %9210 = vmatprep.subr.mxu1 %v9573_v14 }
 0x9f6   :  { %9178 = vmatpush3.msra.mxu0 %v8126_v29  ;;  %9179 = vmatprep.mubr.msk.f32.mxu0 %vm9574_vm1, %v9573_v14 }
 0x9f7   :  { %9211 = vmatpush3.msra.mxu1 %v8138_v30  ;;  %9212 = vmatprep.mubr.msk.f32.mxu1 %vm9574_vm1, %v9573_v14 }
 0x9f8   :  { %9180 = vmatmul.mubr.msk.f32.vlgmr.msra.gmra.mxu0 %vm46_vm0, %v10449_v45  ;;  %9193 = vmatprep.subr.mxu0 %v9573_v14 }
 0x9f9   :  { %9213 = vmatmul.mubr.msk.f32.vlgmr.msra.gmra.mxu1 %vm46_vm0, %v10487_v58  ;;  %9226 = vmatprep.subr.mxu1 %v9573_v14 }
 0x9fa   :  { %9194 = vmatpush3.msra.mxu0 %v8137_v31  ;;  %9227 = vmatpush3.msra.mxu1 %v8149_v32 }
 0x9fb   :  { %9195 = vmatprep.subr.mxu0 %v9573_v14  ;;  %9228 = vmatprep.subr.mxu1 %v9573_v14 }
 0x9fc   :  { %9196 = vmatpush3.msra.mxu0 %v8136_v33  ;;  %9229 = vmatpush3.msra.mxu1 %v8148_v35 }
 0x9fd   :  { %9197 = vmatprep.subr.mxu0 %v9573_v14  ;;  %9230 = vmatprep.subr.mxu1 %v9573_v14 }
 0x9fe   :  { %9198 = vmatpush3.msra.mxu0 %v8135_v36  ;;  %9231 = vmatpush3.msra.mxu1 %v8147_v37 }
 0x9ff   :  { %9199 = vmatprep.subr.mxu0 %v9573_v14  ;;  %9232 = vmatprep.subr.mxu1 %v9573_v14 }
 0xa00   :  { %9200 = vmatpush3.msra.mxu0 %v8134_v40  ;;  %9201 = vmatprep.mubr.msk.f32.mxu0 %vm9574_vm1, %v9573_v14 }
 0xa01   :  { %9233 = vmatpush3.msra.mxu1 %v8146_v41  ;;  %9234 = vmatprep.mubr.msk.f32.mxu1 %vm9574_vm1, %v9573_v14 }
 0xa02   :  { %9202 = vmatmul.mubr.msk.f32.vlgmr.msra.gmra.mxu0 %vm46_vm0, %v10487_v58  ;;  %9215 = vmatprep.subr.mxu0 %v9573_v14 }
 0xa03   :  { %9235 = vmatmul.mubr.msk.f32.vlgmr.msra.gmra.mxu1 %vm46_vm0, %v10449_v45  ;;  %9248 = vmatprep.subr.mxu1 %v9573_v14 }
 0xa04   :  { %9216 = vmatpush3.msra.mxu0 %v8145_v44  ;;  %9249 = vmatpush3.msra.mxu1 %v8157_v48 }
 0xa05   :  { %9217 = vmatprep.subr.mxu0 %v9573_v14  ;;  %9250 = vmatprep.subr.mxu1 %v9573_v14 }
 0xa06   :  { %9218 = vmatpush3.msra.mxu0 %v8144_v49  ;;  %9251 = vmatpush3.msra.mxu1 %v8156_v50 }
 0xa07   :  { %9219 = vmatprep.subr.mxu0 %v9573_v14  ;;  %9252 = vmatprep.subr.mxu1 %v9573_v14 }
 0xa08   :  { %9220 = vmatpush3.msra.mxu0 %v8143_v51  ;;  %9253 = vmatpush3.msra.mxu1 %v8155_v52 }
 0xa09   :  { %9221 = vmatprep.subr.mxu0 %v9573_v14  ;;  %9254 = vmatprep.subr.mxu1 %v9573_v14 }
 0xa0a   :  { %9222 = vmatpush3.msra.mxu0 %v8142_v34  ;;  %9223 = vmatprep.mubr.msk.f32.mxu0 %vm9574_vm1, %v9573_v14 }
 0xa0b   :  { %9255 = vmatpush3.msra.mxu1 %v8154_v53  ;;  %9256 = vmatprep.mubr.msk.f32.mxu1 %vm9574_vm1, %v9573_v14 }
 0xa0c   :  { %9224 = vmatmul.mubr.msk.f32.vlgmr.msra.gmra.mxu0 %vm46_vm0, %v10487_v58  ;;  %9237 = vmatprep.subr.mxu0 %v9573_v14 }
 0xa0d   :  { %9257 = vmatmul.mubr.msk.f32.vlgmr.msra.gmra.mxu1 %vm46_vm0, %v10449_v45  ;;  %9270 = vmatprep.subr.mxu1 %v9573_v14 }
 0xa0e   :  { %9238 = vmatpush3.msra.mxu0 %v8153_v55  ;;  %9271 = vmatpush3.msra.mxu1 %v8165_v56 }
 0xa0f   :  { %9239 = vmatprep.subr.mxu0 %v9573_v14  ;;  %9272 = vmatprep.subr.mxu1 %v9573_v14 }
 0xa10   :  { %9240 = vmatpush3.msra.mxu0 %v8152_v57  ;;  %9273 = vmatpush3.msra.mxu1 %v8164_v59 }
 0xa11   :  { %9241 = vmatprep.subr.mxu0 %v9573_v14  ;;  %9274 = vmatprep.subr.mxu1 %v9573_v14 }
 0xa12   :  { %9242 = vmatpush3.msra.mxu0 %v8151_v60  ;;  %9275 = vmatpush3.msra.mxu1 %v8163_v61 }
 0xa13   :  { %9243 = vmatprep.subr.mxu0 %v9573_v14  ;;  %9276 = vmatprep.subr.mxu1 %v9573_v14 }
 0xa14   :  { %9244 = vmatpush3.msra.mxu0 %v8150_v62  ;;  %9245 = vmatprep.mubr.msk.f32.mxu0 %vm9574_vm1, %v9573_v14 }
 0xa15   :  { %9277 = vmatpush3.msra.mxu1 %v8162_v63  ;;  %9278 = vmatprep.mubr.msk.f32.mxu1 %vm9574_vm1, %v9573_v14 }
 0xa16   :  { %9246 = vmatmul.mubr.msk.f32.vlgmr.msra.gmra.mxu0 %vm46_vm0, %v10449_v45  ;;  %9259 = vmatprep.subr.mxu0 %v9573_v14 }
 0xa17   :  { %9279 = vmatmul.mubr.msk.f32.vlgmr.msra.gmra.mxu1 %vm46_vm0, %v10487_v58  ;;  %9292 = vmatprep.subr.mxu1 %v9573_v14 }
 0xa18   :  { %9260 = vmatpush3.msra.mxu0 %v8161_v0  ;;  %9293 = vmatpush3.msra.mxu1 %v8173_v1 }
 0xa19   :  { %9261 = vmatprep.subr.mxu0 %v9573_v14  ;;  %9294 = vmatprep.subr.mxu1 %v9573_v14 }
 0xa1a   :  { %9262 = vmatpush3.msra.mxu0 %v8160_v2  ;;  %9295 = vmatpush3.msra.mxu1 %v8172_v3 }
 0xa1b   :  { %9263 = vmatprep.subr.mxu0 %v9573_v14  ;;  %9296 = vmatprep.subr.mxu1 %v9573_v14 }
 0xa1c   :  { %9264 = vmatpush3.msra.mxu0 %v8159_v5  ;;  %9297 = vmatpush3.msra.mxu1 %v8171_v6 }
 0xa1d   :  { %9265 = vmatprep.subr.mxu0 %v9573_v14  ;;  %9298 = vmatprep.subr.mxu1 %v9573_v14 }
 0xa1e   :  { %9266 = vmatpush3.msra.mxu0 %v8158_v7  ;;  %9267 = vmatprep.mubr.msk.f32.mxu0 %vm9574_vm1, %v9573_v14 }
 0xa1f   :  { %9299 = vmatpush3.msra.mxu1 %v8170_v8  ;;  %9300 = vmatprep.mubr.msk.f32.mxu1 %vm9574_vm1, %v9573_v14 }
 0xa20   :  { %9268 = vmatmul.mubr.msk.f32.vlgmr.msra.gmra.mxu0 %vm46_vm0, %v10449_v45  ;;  %9281 = vmatprep.subr.mxu0 %v9573_v14  ;;  %v8166_v45 = vld [vmem:[%s11144_s3 + $0x5a0] sm:$0xff] }
 0xa21   :  { %9301 = vmatmul.mubr.msk.f32.vlgmr.msra.gmra.mxu1 %vm46_vm0, %v10487_v58  ;;  %9282 = vmatpush3.msra.mxu0 %v8169_v9 }
 0xa22   :  { %9283 = vmatprep.subr.mxu0 %v9573_v14  ;;  %9289 = vmatprep.mubr.msk.f32.mxu0 %vm9574_vm1, %v9573_v14 }
 0xa23   :  { %9284 = vmatpush3.msra.mxu0 %v8168_v54  ;;  %9314 = vmatprep.subr.mxu1 %v9573_v14 }
 0xa24   :  { %9285 = vmatprep.subr.mxu0 %v9573_v14  ;;  %9316 = vmatprep.mubr.msk.f32.mxu1 %vm9574_vm1, %v9573_v14 }
 0xa25   :  { %9286 = vmatpush3.msra.mxu0 %v8167_v38 }
 0xa26   :  { %9287 = vmatprep.subr.mxu0 %v9573_v14 }
 0xa27   :  { %9288 = vmatpush3.msra.mxu0 %v8166_v45 }
 0xa28   :  { %9290 = vmatmul.mubr.msk.f32.vlgmr.msra.gmra.mxu0 %vm46_vm0, %v10487_v58  ;;  %9303 = vmatprep.subr.mxu0 %v9573_v14 }
 0xa29   :  { %9304 = vmatpush3.msra.mxu0 %v8177_v11  ;;  %9311 = vmatprep.mubr.msk.f32.mxu0 %vm9574_vm1, %v9573_v14 }
 0xa2a   :  { %9305 = vmatprep.subr.mxu0 %v9573_v14 }
 0xa2b   :  { %9306 = vmatpush3.msra.mxu0 %v8176_v39 }
 0xa2c   :  { %9307 = vmatprep.subr.mxu0 %v9573_v14 }
 0xa2d   :  { %9308 = vmatpush3.msra.mxu0 %v8175_v13 }
 0xa2e   :  { %9309 = vmatprep.subr.mxu0 %v9573_v14 }
 0xa2f   :  { %9310 = vmatpush3.msra.mxu0 %v8174_v15 }
 0xa30   :  { %9312 = vmatmul.mubr.msk.f32.vlgmr.msra.gmra.mxu0 %vm46_vm0, %v10487_v58  ;;  %9324 = vmatprep.subr.mxu0 %v9573_v14 }
 0xa31   :  { %9326 = vmatprep.mubr.msk.f32.mxu0 %vm9574_vm1, %v9573_v14 }
 0xa7d   :  { %v4227_v16 = vpop.f32.mrf.mxu0  ;;  %v4367_v17 = vpop.f32.mrf.mxu1 }
 0xa7f   :  { %v9060_v43 = vpop.f32.mrf.mxu0  ;;  %v9082_v42 = vpop.f32.mrf.mxu1 }
 0xa86   :  { %v4297_v18 = vpop.f32.mrf.mxu0 }
 0xa87   :  { %v4510_v19 = vpop.f32.mrf.mxu1 }
 0xa88   :  { %v9071_v4 = vpop.f32.mrf.mxu0 }
 0xa89   :  { %v9104_v20 = vpop.f32.mrf.mxu1 }
 0xa90   :  { %v4437_v46 = vpop.f32.mrf.mxu0 }
 0xa91   :  { %v4650_v47 = vpop.f32.mrf.mxu1 }
 0xa92   :  { %v9093_v21 = vpop.f32.mrf.mxu0 }
 0xa93   :  { %v9126_v22 = vpop.f32.mrf.mxu1 }
 0xa9a   :  { %v4580_v23 = vpop.f32.mrf.mxu0 }
 0xa9b   :  { %v4790_v24 = vpop.f32.mrf.mxu1 }
 0xa9c   :  { %9315 = vmatpush3.xpose.msk.msra.mxu1 %vm1872_vm2, %v4790_v24  ;;  %v9115_v58 = vpop.f32.mrf.mxu0 }
 0xa9d   :  { %v9148_v25 = vpop.f32.mrf.mxu1  ;;  %9319 = vmatprep.subr.mxu1 %v9573_v14 }
 0xa9f   :  { %9317 = vmatmul.mubr.msk.f32.vlgmr.msra.gmra.mxu1 %vm1872_vm2, %v4227_v16 }
 0xaa0   :  { %9321 = vmatprep.mubr.msk.f32.mxu1 %vm9574_vm1, %v9573_v14 }
 0xaa4   :  { %v4720_v26 = vpop.f32.mrf.mxu0 }
 0xaa5   :  { %v4930_v27 = vpop.f32.mrf.mxu1 }
 0xaa6   :  { %9325 = vmatpush3.xpose.msk.msra.mxu0 %vm1872_vm2, %v4930_v27  ;;  %v9137_v28 = vpop.f32.mrf.mxu0 }
 0xaa7   :  { %v9170_v29 = vpop.f32.mrf.mxu1  ;;  %9334 = vmatprep.subr.mxu0 %v9573_v14 }
 0xaa9   :  { %9327 = vmatmul.mubr.msk.f32.vlgmr.msra.gmra.mxu0 %vm1872_vm2, %v4367_v17 }
 0xaaa   :  { %9336 = vmatprep.mubr.msk.f32.mxu0 %vm9574_vm1, %v9573_v14 }
 0xaae   :  { %v4860_v30 = vpop.f32.mrf.mxu0 }
 0xaaf   :  { %v5070_v31 = vpop.f32.mrf.mxu1  ;;  %9320 = vmatpush3.xpose.msk.msra.mxu1 %vm1872_vm2, %v4860_v30 }
 0xab0   :  { %9335 = vmatpush3.xpose.msk.msra.mxu0 %vm1872_vm2, %v5070_v31  ;;  %v9159_v32 = vpop.f32.mrf.mxu0  ;;  %9329 = vmatprep.subr.mxu1 %v9573_v14 }
 0xab1   :  { %v9192_v33 = vpop.f32.mrf.mxu1  ;;  %9344 = vmatprep.subr.mxu0 %v9573_v14 }
 0xab2   :  { %9322 = vmatmul.mubr.msk.f32.vlgmr.msra.gmra.mxu1 %vm1872_vm2, %v4297_v18 }
 0xab3   :  { %9337 = vmatmul.mubr.msk.f32.vlgmr.msra.gmra.mxu0 %vm1872_vm2, %v4510_v19  ;;  %9331 = vmatprep.mubr.msk.f32.mxu1 %vm9574_vm1, %v9573_v14 }
 0xab4   :  { %9346 = vmatprep.mubr.msk.f32.mxu0 %vm9574_vm1, %v9573_v14 }
 0xab8   :  { %v5000_v35 = vpop.f32.mrf.mxu0 }
 0xab9   :  { %v5210_v36 = vpop.f32.mrf.mxu1  ;;  %9330 = vmatpush3.xpose.msk.msra.mxu1 %vm1872_vm2, %v5000_v35 }
 0xaba   :  { %9345 = vmatpush3.xpose.msk.msra.mxu0 %vm1872_vm2, %v5210_v36  ;;  %v9181_v37 = vpop.f32.mrf.mxu0  ;;  %9339 = vmatprep.subr.mxu1 %v9573_v14 }
 0xabb   :  { %v9214_v40 = vpop.f32.mrf.mxu1  ;;  %9354 = vmatprep.subr.mxu0 %v9573_v14 }
 0xabc   :  { %9332 = vmatmul.mubr.msk.f32.vlgmr.msra.gmra.mxu1 %vm1872_vm2, %v4437_v46 }
 0xabd   :  { %9347 = vmatmul.mubr.msk.f32.vlgmr.msra.gmra.mxu0 %vm1872_vm2, %v4650_v47  ;;  %9341 = vmatprep.mubr.msk.f32.mxu1 %vm9574_vm1, %v9573_v14 }
 0xabe   :  { %9356 = vmatprep.mubr.msk.f32.mxu0 %vm9574_vm1, %v9573_v14 }
 0xac2   :  { %v5140_v41 = vpop.f32.mrf.mxu0 }
 0xac3   :  { %v5350_v44 = vpop.f32.mrf.mxu1  ;;  %9340 = vmatpush3.xpose.msk.msra.mxu1 %vm1872_vm2, %v5140_v41 }
 0xac4   :  { %9355 = vmatpush3.msra.mxu0 %v5350_v44  ;;  %v9203_v48 = vpop.f32.mrf.mxu0  ;;  %9349 = vmatprep.subr.mxu1 %v9573_v14 }
 0xac5   :  { %v9236_v49 = vpop.f32.mrf.mxu1  ;;  %9364 = vmatprep.subr.mxu0 %v9573_v14 }
 0xac6   :  { %9342 = vmatmul.mubr.msk.f32.vlgmr.msra.gmra.mxu1 %vm1872_vm2, %v4580_v23 }
 0xac7   :  { %9351 = vmatprep.mubr.msk.f32.mxu1 %vm9574_vm1, %v9573_v14 }
 0xacc   :  { %v5280_v50 = vpop.f32.mrf.mxu0 }
 0xacd   :  { %v10937_v51 = vpop.f32.mrf.mxu1  ;;  %9350 = vmatpush3.xpose.msk.msra.mxu1 %vm1872_vm2, %v5280_v50 }
 0xace   :  { %v9225_v52 = vpop.f32.mrf.mxu0  ;;  %9359 = vmatprep.subr.mxu1 %v9573_v14 }
 0xacf   :  { %v9258_v34 = vpop.f32.mrf.mxu1 }
 0xad0   :  { %9352 = vmatmul.mubr.msk.f32.vlgmr.msra.gmra.mxu1 %vm1872_vm2, %v4720_v26 }
 0xad1   :  { %9361 = vmatprep.mubr.msk.f32.mxu1 %vm9574_vm1, %v9573_v14 }
 0xad6   :  { %v5420_v53 = vpop.f32.mrf.mxu0 }
 0xad7   :  { %v10944_v55 = vpop.f32.mrf.mxu1  ;;  %9360 = vmatpush3.msra.mxu1 %v5420_v53 }
 0xad8   :  { %v9247_v56 = vpop.f32.mrf.mxu0  ;;  %9369 = vmatprep.subr.mxu1 %v9573_v14 }
 0xad9   :  { %v9280_v57 = vpop.f32.mrf.mxu1 }
 0xae0   :  { %v10947_v59 = vpop.f32.mrf.mxu0 }
 0xae1   :  { %v10949_v60 = vpop.f32.mrf.mxu1 }
 0xae2   :  { %v9269_v61 = vpop.f32.mrf.mxu0 }
 0xae3   :  { %v9302_v62 = vpop.f32.mrf.mxu1 }
 0xae8   :  { %v10951_v63 = vpop.f32.mrf.mxu0 }
 0xaea   :  { %v9291_v0 = vpop.f32.mrf.mxu0 }
 0xaf0   :  { %v10953_v1 = vpop.f32.mrf.mxu0 }
 0xaf2   :  { %v9313_v2 = vpop.f32.mrf.mxu0 }
 0xb5f   :  { %v5916_v3 = vpop.f32.mrf.mxu1 }
 0xb60   :  { %v6452_v5 = vmul.f32 0.35355338, %v5916_v3 }
 0xb61   :  { %v9318_v6 = vpop.f32.mrf.mxu1 }
 0xb62   :  { %v6460_v7 = vsel %vm1872_vm2, %v6452_v5, -inf }
 0xb63   :  { %6461 = vmax.xlane.f32.xlu0 %v6460_v7 }
 0xb69   :  { %v6068_v8 = vpop.f32.mrf.mxu0 }
 0xb6a   :  { %v6454_v9 = vmul.f32 0.35355338, %v6068_v8 }
 0xb6b   :  { %v9328_v54 = vpop.f32.mrf.mxu0 }
 0xb6c   :  { %v6466_v38 = vsel %vm1872_vm2, %v6454_v9, -inf }
 0xb6d   :  { %6467 = vmax.xlane.f32.xlu0 %v6466_v38 }
 0xb72   :  { %v5992_v45 = vpop.f32.mrf.mxu1 }
 0xb73   :  { %v6453_v11 = vmul.f32 0.35355338, %v5992_v45  ;;  %v6220_v39 = vpop.f32.mrf.mxu0 }
 0xb74   :  { %v6456_v13 = vmul.f32 0.35355338, %v6220_v39  ;;  %v9323_v15 = vpop.f32.mrf.mxu1 }
 0xb75   :  { %v9338_v16 = vpop.f32.mrf.mxu0  ;;  %v6463_v17 = vsel %vm1872_vm2, %v6453_v11, -inf }
 0xb76   :  { %6464 = vmax.xlane.f32.xlu1 %v6463_v17  ;;  %v6472_v43 = vsel %vm1872_vm2, %v6456_v13, -inf }
 0xb77   :  { %6473 = vmax.xlane.f32.xlu0 %v6472_v43 }
 0xb7c   :  { %v6144_v42 = vpop.f32.mrf.mxu1 }
 0xb7d   :  { %v6455_v18 = vmul.f32 0.35355338, %v6144_v42  ;;  %v6372_v19 = vpop.f32.mrf.mxu0 }
 0xb7e   :  { %v6458_v4 = vmul.f32 0.35355338, %v6372_v19  ;;  %v9333_v20 = vpop.f32.mrf.mxu1 }
 0xb7f   :  { %v9348_v46 = vpop.f32.mrf.mxu0  ;;  %v6469_v47 = vsel %vm1872_vm2, %v6455_v18, -inf }
 0xb80   :  { %6470 = vmax.xlane.f32.xlu1 %v6469_v47  ;;  %v6478_v21 = vsel %vm1872_vm2, %v6458_v4, -inf }
 0xb81   :  { %6479 = vmax.xlane.f32.xlu0 %v6478_v21 }
 0xb86   :  { %v6296_v22 = vpop.f32.mrf.mxu1 }
 0xb87   :  { %v6457_v23 = vmul.f32 0.35355338, %v6296_v22 }
 0xb88   :  { %v9343_v24 = vpop.f32.mrf.mxu1 }
 0xb89   :  { %v6475_v58 = vsel %vm1872_vm2, %v6457_v23, -inf }
 0xb8a   :  { %6476 = vmax.xlane.f32.xlu1 %v6475_v58 }
 0xb90   :  { %v6448_v25 = vpop.f32.mrf.mxu1 }
 0xb91   :  { %v6459_v26 = vmul.f32 0.35355338, %v6448_v25 }
 0xb92   :  { %v9353_v27 = vpop.f32.mrf.mxu1 }
 0xb93   :  { %v6481_v28 = vsel %vm1872_vm2, %v6459_v26, -inf }
 0xb94   :  { %6482 = vmax.xlane.f32.xlu1 %v6481_v28 }
 0xbec   :  { %v6462_v29 = vpop.xlane.xlu0 %6461 }
 0xbed   :  { %v6484_v30 = vsub.f32 %v6452_v5, %v6462_v29 }
 0xbef   :  { %v6492_v31 = vmul.f32 1.442695, %v6484_v30 }
 0xbf1   :  { %9513 = vpow2.f32 %v6492_v31 }
 0xbf6   :  { %v6468_v32 = vpop.xlane.xlu0 %6467 }
 0xbf7   :  { %v6486_v33 = vsub.f32 %v6454_v9, %v6468_v32 }
 0xbf9   :  { %v6496_v35 = vmul.f32 1.442695, %v6486_v33  ;;  %v8226_v33 = vld [vmem:[%s11145_s4 + $0x40] sm:$0xff] }
 0xbfb   :  { %9515 = vpow2.f32 %v6496_v35  ;;  %v8228_v35 = vld [vmem:[%s11145_s4 + $0x50] sm:$0xff] }
 0xbfe   :  { %v9514_v36 = vpop.eup %9513 }
 0xbff   :  { %v6465_v37 = vpop.xlane.xlu1 %6464  ;;  %v6508_v40 = vsel %vm1872_vm2, %v9514_v36, 0.0 }
 0xc00   :  { %v6485_v41 = vsub.f32 %v6453_v11, %v6465_v37  ;;  %v6474_v44 = vpop.xlane.xlu0 %6473  ;;  %6509 = vadd.xlane.f32.xlu0 %v6508_v40  ;;  %v8230_v40 = vld [vmem:[%s11145_s4 + $0x60] sm:$0xff] }
 0xc01   :  { %v6488_v48 = vsub.f32 %v6456_v13, %v6474_v44 }
 0xc02   :  { %v6494_v49 = vmul.f32 1.442695, %v6485_v41 }
 0xc03   :  { %v6500_v50 = vmul.f32 1.442695, %v6488_v48  ;;  %v8229_v48 = vld [vmem:[%s11145_s4 + $0x58] sm:$0xff] }
 0xc04   :  { %9517 = vpow2.f32 %v6494_v49 }
 0xc05   :  { %9519 = vpow2.f32 %v6500_v50  ;;  %v8232_v50 = vld [vmem:[%s11145_s4 + $0x70] sm:$0xff] }
 0xc08   :  { %v9516_v52 = vpop.eup %9515 }
 0xc09   :  { %v6471_v34 = vpop.xlane.xlu1 %6470  ;;  %v6514_v53 = vsel %vm1872_vm2, %v9516_v52, 0.0 }
 0xc0a   :  { %v6487_v56 = vsub.f32 %v6455_v18, %v6471_v34  ;;  %v6480_v57 = vpop.xlane.xlu0 %6479  ;;  %6515 = vadd.xlane.f32.xlu0 %v6514_v53 }
 0xc0b   :  { %v6490_v61 = vsub.f32 %v6458_v4, %v6480_v57 }
 0xc0c   :  { %v6498_v62 = vmul.f32 1.442695, %v6487_v56  ;;  %v8231_v56 = vld [vmem:[%s11145_s4 + $0x68] sm:$0xff] }
 0xc0d   :  { %v6504_v0 = vmul.f32 1.442695, %v6490_v61 }
 0xc0e   :  { %9521 = vpow2.f32 %v6498_v62 }
 0xc0f   :  { %9523 = vpow2.f32 %v6504_v0 }
 0xc11   :  { %v9518_v2 = vpop.eup %9517 }
 0xc12   :  { %v9520_v3 = vpop.eup %9519  ;;  %v6511_v5 = vsel %vm1872_vm2, %v9518_v2, 0.0 }
 0xc13   :  { %v6477_v6 = vpop.xlane.xlu1 %6476  ;;  %6512 = vadd.xlane.f32.xlu1 %v6511_v5  ;;  %v6520_v7 = vsel %vm1872_vm2, %v9520_v3, 0.0 }
 0xc14   :  { %v6489_v8 = vsub.f32 %v6457_v23, %v6477_v6  ;;  %6521 = vadd.xlane.f32.xlu0 %v6520_v7 }
 0xc16   :  { %v6502_v9 = vmul.f32 1.442695, %v6489_v8 }
 0xc18   :  { %9525 = vpow2.f32 %v6502_v9 }
 0xc1b   :  { %v9522_v54 = vpop.eup %9521 }
 0xc1c   :  { %v9524_v38 = vpop.eup %9523  ;;  %v6517_v45 = vsel %vm1872_vm2, %v9522_v54, 0.0 }
 0xc1d   :  { %v6483_v11 = vpop.xlane.xlu1 %6482  ;;  %6518 = vadd.xlane.f32.xlu1 %v6517_v45  ;;  %v6526_v39 = vsel %vm1872_vm2, %v9524_v38, 0.0 }
 0xc1e   :  { %v6491_v13 = vsub.f32 %v6459_v26, %v6483_v11  ;;  %6527 = vadd.xlane.f32.xlu0 %v6526_v39 }
 0xc20   :  { %v6506_v15 = vmul.f32 1.442695, %v6491_v13 }
 0xc22   :  { %9527 = vpow2.f32 %v6506_v15 }
 0xc25   :  { %v9526_v16 = vpop.eup %9525 }
 0xc26   :  { %v6523_v17 = vsel %vm1872_vm2, %v9526_v16, 0.0 }
 0xc27   :  { %6524 = vadd.xlane.f32.xlu1 %v6523_v17 }
 0xc2f   :  { %v9528_v43 = vpop.eup %9527 }
 0xc30   :  { %v6529_v42 = vsel %vm1872_vm2, %v9528_v43, 0.0 }
 0xc31   :  { %6530 = vadd.xlane.f32.xlu1 %v6529_v42 }
 0xc89   :  { %v6510_v18 = vpop.xlane.xlu0 %6509 }
 0xc8a   :  { %9529 = vrcp.f32 %v6510_v18 }
 0xc93   :  { %v6516_v19 = vpop.xlane.xlu0 %6515 }
 0xc94   :  { %9531 = vrcp.f32 %v6516_v19  ;;  %v8243_v19 = vld [vmem:[%s11146_s5 + $0x1] ss:$0 sm:$0xff] }
 0xc97   :  { %v9530_v4 = vpop.eup %9529 }
 0xc98   :  { %v6540_v20 = vmul.f32 %v9530_v4, %v9514_v36 }
 0xc9a   :  { %9357 = vmatmul.mubr.msk.f32.vlgmr.msra.gmra.mxu0 %vm1872_vm2, %v6540_v20 }
 0xc9b   :  { %9365 = vmatpush3.msra.mxu0 %v10937_v51  ;;  %9366 = vmatprep.mubr.msk.f32.mxu0 %vm9574_vm1, %v9573_v14 }
 0xc9c   :  { %v6513_v46 = vpop.xlane.xlu1 %6512  ;;  %9374 = vmatprep.subr.mxu0 %v9573_v14 }
 0xc9d   :  { %9533 = vrcp.f32 %v6513_v46  ;;  %v6522_v47 = vpop.xlane.xlu0 %6521 }
 0xc9e   :  { %9535 = vrcp.f32 %v6522_v47 }
 0xca1   :  { %v9532_v21 = vpop.eup %9531 }
 0xca2   :  { %v6542_v22 = vmul.f32 %v9532_v21, %v9516_v52 }
 0xca4   :  { %9367 = vmatmul.mubr.msk.f32.vlgmr.msra.gmra.mxu0 %vm1872_vm2, %v6542_v22 }
 0xca5   :  { %9375 = vmatpush3.msra.mxu0 %v10944_v55  ;;  %9376 = vmatprep.mubr.msk.f32.mxu0 %vm9574_vm1, %v9573_v14 }
 0xca6   :  { %v6519_v23 = vpop.xlane.xlu1 %6518  ;;  %9384 = vmatprep.subr.mxu0 %v9573_v14 }
 0xca7   :  { %9537 = vrcp.f32 %v6519_v23  ;;  %v6528_v51 = vpop.xlane.xlu0 %6527 }
 0xca8   :  { %9539 = vrcp.f32 %v6528_v51 }
 0xcaa   :  { %v9534_v24 = vpop.eup %9533 }
 0xcab   :  { %v9536_v58 = vpop.eup %9535  ;;  %v6541_v25 = vmul.f32 %v9534_v24, %v9518_v2  ;;  %v8233_v2 = vld [vmem:[%s11145_s4 + $0x78] sm:$0xff] }
 0xcac   :  { %v6544_v26 = vmul.f32 %v9536_v58, %v9520_v3 }
 0xcad   :  { %9362 = vmatmul.mubr.msk.f32.vlgmr.msra.gmra.mxu1 %vm1872_vm2, %v6541_v25 }
 0xcae   :  { %9370 = vmatpush3.msra.mxu1 %v10947_v59  ;;  %9377 = vmatmul.mubr.msk.f32.vlgmr.msra.gmra.mxu0 %vm1872_vm2, %v6544_v26 }
 0xcaf   :  { %9385 = vmatpush3.msra.mxu0 %v10949_v60  ;;  %9371 = vmatprep.mubr.msk.f32.mxu1 %vm9574_vm1, %v9573_v14 }
 0xcb0   :  { %v6525_v55 = vpop.xlane.xlu1 %6524  ;;  %9379 = vmatprep.subr.mxu1 %v9573_v14  ;;  %9386 = vmatprep.mubr.msk.f32.mxu0 %vm9574_vm1, %v9573_v14 }
 0xcb1   :  { %9541 = vrcp.f32 %v6525_v55  ;;  %9394 = vmatprep.subr.mxu0 %v9573_v14 }
 0xcb4   :  { %v9538_v27 = vpop.eup %9537 }
 0xcb5   :  { %v9540_v28 = vpop.eup %9539  ;;  %v6543_v29 = vmul.f32 %v9538_v27, %v9522_v54 }
 0xcb6   :  { %v6546_v59 = vmul.f32 %v9540_v28, %v9524_v38 }
 0xcb7   :  { %9372 = vmatmul.mubr.msk.f32.vlgmr.msra.gmra.mxu1 %vm1872_vm2, %v6543_v29 }
 0xcb8   :  { %9380 = vmatpush3.msra.mxu1 %v10951_v63  ;;  %9387 = vmatmul.mubr.msk.f32.vlgmr.msra.gmra.mxu0 %vm1872_vm2, %v6546_v59 }
 0xcb9   :  { %9381 = vmatprep.mubr.msk.f32.mxu1 %vm9574_vm1, %v9573_v14  ;;  %9389 = vmatprep.subr.mxu1 %v9573_v14 }
 0xcba   :  { %v6531_v60 = vpop.xlane.xlu1 %6530  ;;  %9396 = vmatprep.mubr.msk.f32.mxu0 %vm9574_vm1, %v9573_v14  ;;  %9395 = vmatpush3.msra.mxu0 %v8226_v33 }
 0xcbb   :  { %9543 = vrcp.f32 %v6531_v60  ;;  %9404 = vmatprep.subr.mxu0 %v9573_v14 }
 0xcbe   :  { %v9542_v30 = vpop.eup %9541 }
 0xcbf   :  { %v6545_v31 = vmul.f32 %v9542_v30, %v9526_v16 }
 0xcc1   :  { %9382 = vmatmul.mubr.msk.f32.vlgmr.msra.gmra.mxu1 %vm1872_vm2, %v6545_v31 }
 0xcc2   :  { %9390 = vmatpush3.msra.mxu1 %v10953_v1  ;;  %9391 = vmatprep.mubr.msk.f32.mxu1 %vm9574_vm1, %v9573_v14  ;;  %v8227_v1 = vld [vmem:[%s11145_s4 + $0x48] sm:$0xff] }
 0xcc3   :  { %9399 = vmatprep.subr.mxu1 %v9573_v14 }
 0xcc8   :  { %v9544_v63 = vpop.eup %9543 }
 0xcc9   :  { %v6547_v32 = vmul.f32 %v9544_v63, %v9528_v43 }
 0xccb   :  { %9392 = vmatmul.mubr.msk.f32.vlgmr.msra.gmra.mxu1 %vm1872_vm2, %v6547_v32 }
 0xccc   :  { %9401 = vmatprep.mubr.msk.f32.mxu1 %vm9574_vm1, %v9573_v14  ;;  %9400 = vmatpush3.msra.mxu1 %v8227_v1 }
 0xccd   :  { %9409 = vmatprep.subr.mxu1 %v9573_v14 }
 0xd5a   :  { %v6617_v36 = vpop.f32.mrf.mxu0 }
 0xd5b   :  { %9397 = vmatmul.mubr.msk.f32.vlgmr.msra.gmra.mxu0 %vm1872_vm2, %v6617_v36 }
 0xd5c   :  { %v9358_v37 = vpop.f32.mrf.mxu0  ;;  %9405 = vmatpush3.msra.mxu0 %v8228_v35  ;;  %9406 = vmatprep.mubr.msk.f32.mxu0 %vm9574_vm1, %v9573_v14 }
 0xd5d   :  { %9414 = vmatprep.subr.mxu0 %v9573_v14 }
 0xd64   :  { %v6763_v41 = vpop.f32.mrf.mxu0 }
 0xd65   :  { %9407 = vmatmul.mubr.msk.f32.vlgmr.msra.gmra.mxu0 %vm1872_vm2, %v6763_v41 }
 0xd66   :  { %v9368_v44 = vpop.f32.mrf.mxu0  ;;  %9415 = vmatpush3.msra.mxu0 %v8230_v40  ;;  %9416 = vmatprep.mubr.msk.f32.mxu0 %vm9574_vm1, %v9573_v14 }
 0xd67   :  { %9424 = vmatprep.subr.mxu0 %v9573_v14  ;;  %v8251_v44 = vld [vmem:[%s11149_s8 + $0x38] sm:$0xff] }
 0xd6d   :  { %v6690_v49 = vpop.f32.mrf.mxu1 }
 0xd6e   :  { %v6909_v52 = vpop.f32.mrf.mxu0  ;;  %9402 = vmatmul.mubr.msk.f32.vlgmr.msra.gmra.mxu1 %vm1872_vm2, %v6690_v49  ;;  %v8249_v49 = vld [vmem:[%s11149_s8 + $0x28] sm:$0xff] }
 0xd6f   :  { %9417 = vmatmul.mubr.msk.f32.vlgmr.msra.gmra.mxu0 %vm1872_vm2, %v6909_v52  ;;  %v9363_v34 = vpop.f32.mrf.mxu1  ;;  %9410 = vmatpush3.msra.mxu1 %v8229_v48  ;;  %v8250_v48 = vld [vmem:[%s11149_s8 + $0x30] sm:$0xff]  ;;  %v8263_v52 = vld [vmem:[%s11151_s10 + $0x78] sm:$0xff] }
 0xd70   :  { %v9378_v53 = vpop.f32.mrf.mxu0  ;;  %9411 = vmatprep.mubr.msk.f32.mxu1 %vm9574_vm1, %v9573_v14  ;;  %9425 = vmatpush3.msra.mxu0 %v8232_v50  ;;  %v8248_v50 = vld [vmem:[%s11149_s8 + $0x20] sm:$0xff]  ;;  %v8262_v34 = vld [vmem:[%s11151_s10 + $0x70] sm:$0xff] }
 0xd71   :  { %9426 = vmatprep.mubr.msk.f32.mxu0 %vm9574_vm1, %v9573_v14  ;;  %9419 = vmatprep.subr.mxu1 %v9573_v14  ;;  %v8261_v53 = vld [vmem:[%s11151_s10 + $0x68] sm:$0xff] }
 0xd72   :  { %9434 = vmatprep.subr.mxu0 %v8251_v44 }
 0xd77   :  { %v6836_v57 = vpop.f32.mrf.mxu1 }
 0xd78   :  { %v7055_v61 = vpop.f32.mrf.mxu0  ;;  %9412 = vmatmul.mubr.msk.f32.vlgmr.msra.gmra.mxu1 %vm1872_vm2, %v6836_v57 }
 0xd79   :  { %9427 = vmatmul.mubr.msk.f32.vlgmr.msra.gmra.mxu0 %vm1872_vm2, %v7055_v61  ;;  %v9373_v62 = vpop.f32.mrf.mxu1  ;;  %9420 = vmatpush3.msra.mxu1 %v8231_v56  ;;  %v8260_v56 = vld [vmem:[%s11151_s10 + $0x60] sm:$0xff] }
 0xd7a   :  { %v9388_v0 = vpop.f32.mrf.mxu0  ;;  %9421 = vmatprep.mubr.msk.f32.mxu1 %vm9574_vm1, %v9573_v14  ;;  %9429 = vmatprep.subr.mxu1 %v9573_v14 }
 0xd7b   :  { %9435 = vmatpush3.msra.mxu0 %v8251_v44 }
 0xd7c   :  { %9436 = vmatprep.subr.mxu0 %v8250_v48 }
 0xd7d   :  { %9437 = vmatpush3.msra.mxu0 %v8250_v48 }
 0xd7e   :  { %9438 = vmatprep.subr.mxu0 %v8249_v49 }
 0xd7f   :  { %9439 = vmatpush3.msra.mxu0 %v8249_v49 }
 0xd80   :  { %9440 = vmatprep.subr.mxu0 %v8248_v50 }
 0xd81   :  { %v6982_v3 = vpop.f32.mrf.mxu1  ;;  %9441 = vmatpush3.msra.mxu0 %v8248_v50 }
 0xd82   :  { %9422 = vmatmul.mubr.msk.f32.vlgmr.msra.gmra.mxu1 %vm1872_vm2, %v6982_v3 }
 0xd83   :  { %v9383_v5 = vpop.f32.mrf.mxu1  ;;  %9430 = vmatpush3.msra.mxu1 %v8233_v2  ;;  %9431 = vmatprep.mubr.msk.f32.mxu1 %vm9574_vm1, %v9573_v14  ;;  %v8246_v2 = vld [vmem:[%s11147_s6 + $0x1] ss:$0 sm:$0xff] }
 0xd84   :  { %9445 = vmatprep.subr.mxu1 %v8263_v52 }
 0xd8b   :  { %v7128_v6 = vpop.f32.mrf.mxu1 }
 0xd8c   :  { %9432 = vmatmul.mubr.msk.f32.vlgmr.msra.gmra.mxu1 %vm1872_vm2, %v7128_v6  ;;  %v8247_v6 = vld [vmem:[%s11148_s7 + $0x1] ss:$0 sm:$0xff] }
 0xd8d   :  { %v9393_v7 = vpop.f32.mrf.mxu1  ;;  %9446 = vmatpush3.msra.mxu1 %v8263_v52 }
 0xd8e   :  { %9447 = vmatprep.subr.mxu1 %v8262_v34 }
 0xd8f   :  { %9448 = vmatpush3.msra.mxu1 %v8262_v34 }
 0xd90   :  { %9449 = vmatprep.subr.mxu1 %v8261_v53 }
 0xd91   :  { %9450 = vmatpush3.msra.mxu1 %v8261_v53 }
 0xd92   :  { %9451 = vmatprep.subr.mxu1 %v8260_v56 }
 0xd93   :  { %9452 = vmatpush3.msra.mxu1 %v8260_v56 }
 0xe1b   :  { %v7210_v8 = vpop.f32.mrf.mxu0 }
 0xe1c   :  { %v7725_v16 = vsel %vm46_vm0, %v7210_v8, 0.0 }
 0xe1d   :  { %v9398_v9 = vpop.f32.mrf.mxu0 }
 0xe25   :  { %v7356_v54 = vpop.f32.mrf.mxu0 }
 0xe26   :  { %v7728_v43 = vsel %vm46_vm0, %v7356_v54, 0.0 }
 0xe27   :  { %v9408_v38 = vpop.f32.mrf.mxu0 }
 0xe2e   :  { %v7283_v45 = vpop.f32.mrf.mxu1 }
 0xe2f   :  { %v7502_v11 = vpop.f32.mrf.mxu0  ;;  %v7726_v13 = vsel %vm46_vm0, %v7283_v45, 0.0 }
 0xe30   :  { %v9403_v39 = vpop.f32.mrf.mxu1  ;;  %v7727_v17 = vadd.f32 %v7726_v13, %v7725_v16  ;;  %v7732_v25 = vsel %vm46_vm0, %v7502_v11, 0.0  ;;  %v8259_v13 = vld [vmem:[%s11151_s10 + $0x58] sm:$0xff]  ;;  %v8257_v16 = vld [vmem:[%s11151_s10 + $0x48] sm:$0xff] }
 0xe31   :  { %v9418_v15 = vpop.f32.mrf.mxu0  ;;  %9453 = vmatprep.subr.mxu1 %v8259_v13 }
 0xe32   :  { %v7729_v42 = vadd.f32 %v7728_v43, %v7727_v17  ;;  %9454 = vmatpush3.msra.mxu1 %v8259_v13  ;;  %v8258_v15 = vld [vmem:[%s11151_s10 + $0x50] sm:$0xff]  ;;  %v8256_v17 = vld [vmem:[%s11151_s10 + $0x40] sm:$0xff] }
 0xe33   :  { %9455 = vmatprep.subr.mxu1 %v8258_v15  ;;  %v8253_v43 = vld [vmem:[%s11150_s9 + $0x1] ss:$0 sm:$0xff]  ;;  %s9551_s9 = scalar_lea.vmem %s8001_s0, 256 }
 0xe34   :  { %9456 = vmatpush3.msra.mxu1 %v8258_v15  ;;  %p9552_p0 = scmp.ne.s32.totalorder %s8001_s0, %s9551_s9  ;;  %p9557_p2 = scmp.lt.s32.totalorder %s9551_s9, %s9551_s9 }
 0xe35   :  { %9457 = vmatprep.subr.mxu1 %v8257_v16 }
 0xe36   :  { %9458 = vmatpush3.msra.mxu1 %v8257_v16  ;;  %p9558_p3 = por %p9557_p2, %p9556_p1 }
 0xe37   :  { %9459 = vmatprep.subr.mxu1 %v8256_v17 }
 0xe38   :  { %v7429_v14 = vpop.f32.mrf.mxu1  ;;  %9460 = vmatpush3.msra.mxu1 %v8256_v17  ;;  %p9559_p4 = pnand %p9558_p3, %p9552_p0 }
 0xe39   :  { %v7730_v18 = vsel %vm46_vm0, %v7429_v14, 0.0  ;;  %v7648_v4 = vpop.f32.mrf.mxu0 }
 0xe3a   :  { %v7731_v20 = vadd.f32 %v7730_v18, %v7729_v42  ;;  %v9413_v46 = vpop.f32.mrf.mxu1  ;;  %v7735_v55 = vsel %vm46_vm0, %v7648_v4, 0.0 }
 0xe3b   :  { %v9428_v47 = vpop.f32.mrf.mxu0  ;;  %v8265_v46 = vld [vmem:[%s11152_s11 + $0x1] ss:$0 sm:$0xff] }
 0xe3c   :  { %v7747_v21 = vadd.f32 %v8243_v19, %v7731_v20 }
 0xe3e   :  { %v11065_v22 = vadd.f32 %v7747_v21, %v10401_v12 }
 0xe40   :  { %v7755_v23 = vsel %vm46_vm0, %v11065_v22, 0.0 }
 0xe41   :  { %7756 = vadd.xlane.f32.xlu0 %v7755_v23 }
 0xe42   :  { %v7575_v51 = vpop.f32.mrf.mxu1 }
 0xe43   :  { %v7733_v58 = vsel %vm46_vm0, %v7575_v51, 0.0 }
 0xe44   :  { %v9423_v24 = vpop.f32.mrf.mxu1  ;;  %v7734_v26 = vadd.f32 %v7733_v58, %v7732_v25 }
 0xe46   :  { %v7736_v28 = vadd.f32 %v7735_v55, %v7734_v26 }
 0xe4c   :  { %v7721_v27 = vpop.f32.mrf.mxu1 }
 0xe4d   :  { %v7737_v29 = vsel %vm46_vm0, %v7721_v27, 0.0 }
 0xe4e   :  { %v7738_v59 = vadd.f32 %v7737_v29, %v7736_v28  ;;  %v9433_v12 = vpop.f32.mrf.mxu1 }
 0xe50   :  { %v7748_v60 = vadd.f32 %v8243_v19, %v7738_v59 }
 0xe52   :  { %v11074_v30 = vadd.f32 %v7748_v60, %v10398_v10 }
 0xe54   :  { %v7758_v31 = vsel %vm46_vm0, %v11074_v30, 0.0 }
 0xe55   :  { %7759 = vadd.xlane.f32.xlu1 %v7758_v31 }
 0xeca   :  { %v7757_v63 = vpop.xlane.xlu0 %7756 }
 0xecb   :  { %v7761_v32 = vmul.f32 0.03125, %v7757_v63 }
 0xecd   :  { %v7763_v33 = vsub.f32 %v11065_v22, %v7761_v32 }
 0xecf   :  { %v7765_v1 = vmul.f32 %v7763_v33, %v7763_v33 }
 0xed1   :  { %v7767_v35 = vsel %vm46_vm0, %v7765_v1, 0.0 }
 0xed2   :  { %7768 = vadd.xlane.f32.xlu0 %v7767_v35 }
 0xede   :  { %v7760_v36 = vpop.xlane.xlu1 %7759 }
 0xedf   :  { %v7762_v37 = vmul.f32 0.03125, %v7760_v36 }
 0xee1   :  { %v7764_v40 = vsub.f32 %v11074_v30, %v7762_v37 }
 0xee3   :  { %v7766_v41 = vmul.f32 %v7764_v40, %v7764_v40 }
 0xee5   :  { %v7770_v10 = vsel %vm46_vm0, %v7766_v41, 0.0 }
 0xee6   :  { %7771 = vadd.xlane.f32.xlu1 %v7770_v10 }
 0xf5b   :  { %v7769_v57 = vpop.xlane.xlu0 %7768 }
 0xf5c   :  { %v7773_v61 = vmul.f32 0.03125, %v7769_v57 }
 0xf5e   :  { %v7775_v62 = vadd.f32 1e-05, %v7773_v61 }
 0xf60   :  { %9545 = vrsqrt.f32 %v7775_v62 }
 0xf6d   :  { %v9546_v0 = vpop.eup %9545 }
 0xf6e   :  { %v7779_v3 = vmul.f32 %v9546_v0, %v7763_v33 }
 0xf6f   :  { %v7772_v5 = vpop.xlane.xlu1 %7771 }
 0xf70   :  { %v7774_v7 = vmul.f32 0.03125, %v7772_v5  ;;  %v7787_v8 = vmul.f32 %v8246_v2, %v7779_v3 }
 0xf72   :  { %v7776_v9 = vadd.f32 1e-05, %v7774_v7  ;;  %v7795_v54 = vadd.f32 %v8247_v6, %v7787_v8 }
 0xf74   :  { %9547 = vrsqrt.f32 %v7776_v9  ;;  %9442 = vmatprep.mubr.msk.f32.mxu0 %vm46_vm0, %v7795_v54 }
 0xf81   :  { %v9548_v38 = vpop.eup %9547 }
 0xf82   :  { %v7780_v45 = vmul.f32 %v9548_v38, %v7764_v40 }
 0xf84   :  { %v7788_v11 = vmul.f32 %v8246_v2, %v7780_v45 }
 0xf86   :  { %v7796_v39 = vadd.f32 %v8247_v6, %v7788_v11 }
 0xf88   :  { %9443 = vmatmul.mubr.msk.f32.vlgmr.msra.gmra.mxu0 %vm46_vm0, %v7796_v39 }
0x1048   :  { %v9444_v14 = vpop.f32.mrf.mxu0 }
0x1049   :  { %v7888_v42 = vadd.f32 %v9444_v14, %v8253_v43 }
0x104a   :  { %v7882_v18 = vpop.f32.mrf.mxu0 }
0x104b   :  { %v7883_v19 = vadd.f32 %v8253_v43, %v7882_v18  ;;  %v7892_v20 = vmax.f32 %v7888_v42, 0.0 }
0x104d   :  { %v7891_v4 = vmax.f32 %v7883_v19, 0.0 }
0x104f   :  { %9461 = vmatprep.mubr.msk.f32.mxu1 %vm3931_vm3, %v7891_v4 }
0x1050   :  { %9462 = vmatmul.mubr.msk.f32.vlgmr.msra.gmra.mxu1 %vm3931_vm3, %v7892_v20 }
0x1110   :  { %v9463_v47 = vpop.f32.mrf.mxu1 }
0x1111   :  { %v7988_v21 = vadd.f32 %v9463_v47, %v8265_v46 }
0x1112   :  { %v7982_v23 = vpop.f32.mrf.mxu1 }
0x1113   :  { %v7992_v51 = vadd.f32 %v7988_v21, %v11074_v30  ;;  %v7983_v24 = vadd.f32 %v8265_v46, %v7982_v23 }
0x1115   :  { %7994 = vst.msk [vmem:[#allocation2 + $0x8] sm:$0xff] %vm46_vm0, %v7992_v51  ;;  %v7991_v58 = vadd.f32 %v7983_v24, %v11065_v22 }
0x1117   :  { %7993 = vst.msk [vmem:[#allocation2] sm:$0xff] %vm46_vm0, %v7991_v58 }
0x1118   :  { %9562 = shalt.err (!%p9559_p4)
}
0x1119   :  { %s9576_s11 = smov 128   ;;  %s9577_s3 = smov 8  }
0x111a   :  { %8006 = dma.vmem_to_hbm [thread:$0]  %s8001_s0, 256, %s11153_s12, [#allocation3], %s9576_s11, %s9576_s11, %s9577_s3  }
0x111b   :  { %9571 = dma.done.wait [#allocation3], 256  }
0x111c   :  { %9572 = vsyncadd [#allocation3], 4294967040 }
0x111d   :  { %8010 = vsyncpa [#allocation3], 1 }

</bundles_post_ra>
